<compile_context>
chip_gen: v7x
topology: tpu7x:2x2x1
jax: 0.10.0
libtpu: 0.0.40
codegen_flags: <defaults>
</compile_context>

<pallas_src>
import functools

import jax
import jax.numpy as jnp
from jax.experimental import pallas as pl
from jax.experimental.pallas import tpu as pltpu

D_MODEL = 1024      # fixed by nn.Linear(in_features=1024, ...)
OUT_LANES = 128     # lane-dense packed output width (unmasked stores)


def _ists_head_kernel(
    feat_ref,     # [TB, TS, D] feature tile (any float dtype)
    w13_ref,      # [D, 2H]  fused linear1 || linear3 weight
    b13_ref,      # [1, 2H]
    w2_ref,       # [H, 1]
    b2_ref,       # [1, 1]
    w4_ref,       # [H, C]
    b4_ref,       # [1, C]
    out_ref,      # [TB, OUT_LANES] packed output (col 0 = out1, cols 1..C = out2)
    acc_ref,      # [TB, D] f32 scratch: running sequence sum
    *,
    inv_s,        # 1 / S (original, unpadded sequence length)
    hidden,       # H
    num_classes,  # C
):
    s = pl.program_id(1)

    @pl.when(s == 0)
    def _init():
        acc_ref[...] = jnp.zeros_like(acc_ref)

    # Accumulate the sequence sum for this tile; cast keeps accumulation in f32
    # regardless of the streamed feature dtype (e.g. bf16 on v5e).
    acc_ref[...] += jnp.sum(feat_ref[...].astype(jnp.float32), axis=1)

    @pl.when(s == pl.num_programs(1) - 1)
    def _finalize():
        # torch.mean(features, 1)
        x = acc_ref[...] * inv_s                                   # [TB, D]
        # dropout1 / dropout2: identity in eval mode.

        # Fused linear1 || linear3 + ReLU: one MXU push with 2H output lanes.
        h = jnp.dot(x, w13_ref[...], preferred_element_type=jnp.float32) + b13_ref[...]
        h = jnp.maximum(h, 0.0)                                    # relu1 || relu2
        x1 = h[:, :hidden]
        x2 = h[:, hidden:]

        # Head 1: STS value prediction.
        out1 = jnp.dot(x1, w2_ref[...], preferred_element_type=jnp.float32) + b2_ref[...]

        # Head 2: explanatory-layer classification, stable log_softmax (dim=1).
        logits = jnp.dot(x2, w4_ref[...], preferred_element_type=jnp.float32) + b4_ref[...]
        m = jnp.max(logits, axis=1, keepdims=True)
        z = logits - m
        lse = jnp.log(jnp.sum(jnp.exp(z), axis=1, keepdims=True))
        logsm = z - lse                                            # [TB, C]

        tb = out_ref.shape[0]
        pad = jnp.zeros((tb, OUT_LANES - 1 - num_classes), jnp.float32)
        out_ref[...] = jnp.concatenate([out1, logsm, pad], axis=1)


def roberta_ists_forward(features, params, *, tb=8, ts=128):
    """features: [B, S, 1024] float. Returns (out1 [B], out2 [B, num_classes])."""
    B, S, D = features.shape
    assert D == D_MODEL
    w1, b1, w2, b2, w3, b3, w4, b4 = params
    H = w1.shape[1]
    C = w4.shape[1]
    assert 1 + C <= OUT_LANES, "num_classes too large for packed output width"

    # Shrink tiles for small problems (keep multiples of 8 for sublane alignment).
    tb = max(8, min(tb, pl.cdiv(B, 8) * 8))
    ts = max(8, min(ts, pl.cdiv(S, 8) * 8))

    # Fuse linear1 || linear3 into a single [D, 2H] projection.
    w13 = jnp.concatenate([w1, w3], axis=1)
    b13 = jnp.concatenate([b1, b3], axis=0).reshape(1, 2 * H)

    # Pad batch / seq to tile multiples. Zero seq-padding adds 0 to the running
    # sum and we divide by the *original* S, so the mean stays exact; extra
    # batch rows are sliced off at the end.
    Bp = pl.cdiv(B, tb) * tb
    Sp = pl.cdiv(S, ts) * ts
    if (Bp, Sp) != (B, S):
        features = jnp.pad(features, ((0, Bp - B), (0, Sp - S), (0, 0)))

    grid = (Bp // tb, Sp // ts)

    cost = pl.CostEstimate(
        flops=Bp * Sp * D + 2 * Bp * (D * 2 * H + H * (1 + C)),
        transcendentals=Bp * (C + 1),
        bytes_accessed=(Bp * Sp * D * features.dtype.itemsize
                        + sum(a.size * a.dtype.itemsize
                              for a in (w13, b13, w2, b2, w4, b4))
                        + Bp * OUT_LANES * 4),
    )

    kernel = functools.partial(
        _ists_head_kernel, inv_s=1.0 / S, hidden=H, num_classes=C)

    packed = pl.pallas_call(
        kernel,
        out_shape=jax.ShapeDtypeStruct((Bp, OUT_LANES), jnp.float32),
        grid_spec=pltpu.PrefetchScalarGridSpec(
            num_scalar_prefetch=0,
            grid=grid,
            in_specs=[
                # Streamed, auto double-buffered feature tiles (HBM bound).
                pl.BlockSpec((tb, ts, D), lambda b, s: (b, s, 0)),
                # Weights/biases: constant index_map -> DMA'd once, VMEM-resident.
                pl.BlockSpec((D, 2 * H), lambda b, s: (0, 0)),
                pl.BlockSpec((1, 2 * H), lambda b, s: (0, 0)),
                pl.BlockSpec((H, 1), lambda b, s: (0, 0)),
                pl.BlockSpec((1, 1), lambda b, s: (0, 0)),
                pl.BlockSpec((H, C), lambda b, s: (0, 0)),
                pl.BlockSpec((1, C), lambda b, s: (0, 0)),
            ],
            out_specs=pl.BlockSpec((tb, OUT_LANES), lambda b, s: (b, 0)),
            scratch_shapes=[pltpu.VMEM((tb, D), jnp.float32)],
        ),
        compiler_params=pltpu.CompilerParams(
            # Batch tiles shard across TensorCores (v7x megacore); seq axis is
            # the sequential reduction.
            dimension_semantics=("parallel", "arbitrary"),
            # Sized for v7x's 64 MiB VMEM: 2x double-buffered <=4 MiB feature
            # tiles + ~0.5 MiB resident weights + scratch fit comfortably.
            vmem_limit_bytes=32 * 1024 * 1024,
        ),
        cost_estimate=cost,
    )(features, w13, b13, w2, b2.reshape(1, 1), w4, b4.reshape(1, C))

    out1 = packed[:B, 0]            # .squeeze(-1) of the [B, 1] head-1 output
    out2 = packed[:B, 1:1 + C]      # log_softmax over classes
    return out1, out2


def init_params(key, hidden_neurons, num_classes, d_model=1024):
    """Deterministic synthetic init matching nn.Linear shapes (stored as [in, out])."""
    ks = jax.random.split(key, 8)

    def lin(kw, kb, fan_in, fan_out):
        bound = 1.0 / jnp.sqrt(fan_in)
        w = jax.random.uniform(kw, (fan_in, fan_out), jnp.float32, -bound, bound)
        b = jax.random.uniform(kb, (fan_out,), jnp.float32, -bound, bound)
        return w, b

    w1, b1 = lin(ks[0], ks[1], d_model, hidden_neurons)        # linear1: 1024 -> H
    w2, b2 = lin(ks[2], ks[3], hidden_neurons, 1)              # linear2: H -> 1
    w3, b3 = lin(ks[4], ks[5], d_model, hidden_neurons)        # linear3: 1024 -> H
    w4, b4 = lin(ks[6], ks[7], hidden_neurons, num_classes)    # linear4: H -> C
    return (w1, b1, w2, b2, w3, b3, w4, b4)


if __name__ == "__main__":
    # Small shapes consistent with the module: hidden dim is fixed to 1024 by
    # the Linear layers; batch / seq / hidden_neurons / num_classes kept small,
    # but S spans two seq tiles to exercise the accumulator pipeline.
    B, S, D = 8, 256, D_MODEL
    hidden_neurons = 32
    num_classes = 5

    key = jax.random.PRNGKey(0)
    k_feat, k_params = jax.random.split(key)

    # Synthetic stand-in for roberta.extract_features(x) output.
    features = jax.random.normal(k_feat, (B, S, D), dtype=jnp.float32)
    params = init_params(k_params, hidden_neurons, num_classes, d_model=D)

    out1, out2 = roberta_ists_forward(features, params)
    jax.block_until_ready((out1, out2))

    assert out1.shape == (B,), out1.shape
    assert out2.shape == (B, num_classes), out2.shape

    # Pure-JAX reference for correctness.
    w1, b1, w2, b2, w3, b3, w4, b4 = params
    x = jnp.mean(features, axis=1)
    r1 = jnp.maximum(x @ w1 + b1, 0.0)
    ref_out1 = (r1 @ w2 + b2)[:, 0]
    r2 = jnp.maximum(x @ w3 + b3, 0.0)
    ref_out2 = jax.nn.log_softmax(r2 @ w4 + b4, axis=1)

    assert jnp.allclose(out1, ref_out1, atol=1e-2), float(jnp.max(jnp.abs(out1 - ref_out1)))
    assert jnp.allclose(out2, ref_out2, atol=1e-2), float(jnp.max(jnp.abs(out2 - ref_out2)))
    # log_softmax rows must exponentiate-sum to 1.
    assert jnp.allclose(jnp.sum(jnp.exp(out2), axis=1), 1.0, atol=1e-4)

    print("KERNEL_OK")
</pallas_src>

<mosaic_0001>
module attributes {stable_mosaic.version = 11 : i64} {
  func.func @_ists_head_kernel(%arg0: i32, %arg1: i32, %arg2: memref<8x128x1024xf32, #tpu.memory_space<vmem>>, %arg3: memref<1024x64xf32, #tpu.memory_space<vmem>>, %arg4: memref<1x64xf32, #tpu.memory_space<vmem>>, %arg5: memref<32x1xf32, #tpu.memory_space<vmem>>, %arg6: memref<1x1xf32, #tpu.memory_space<vmem>>, %arg7: memref<32x5xf32, #tpu.memory_space<vmem>>, %arg8: memref<1x5xf32, #tpu.memory_space<vmem>>, %arg9: memref<8x128xf32, #tpu.memory_space<vmem>>, %arg10: memref<8x1024xf32, #tpu.memory_space<vmem>>) attributes {dimension_semantics = [#tpu.dimension_semantics<parallel>, #tpu.dimension_semantics<arbitrary>], iteration_bounds = array<i64: 1, 2>, scalar_prefetch = 0 : i64, scratch_operands = 1 : i64, tpu.core_type = #tpu.core_type<tc>, window_params = [{transform_indices = @transform_0, window_bounds = array<i64: 8, 128, 1024>}, {pipeline_mode = #tpu.pipeline_mode<synchronous>, transform_indices = @transform_1, window_bounds = array<i64: 1024, 64>}, {pipeline_mode = #tpu.pipeline_mode<synchronous>, transform_indices = @transform_2, window_bounds = array<i64: 1, 64>}, {pipeline_mode = #tpu.pipeline_mode<synchronous>, transform_indices = @transform_3, window_bounds = array<i64: 32, 1>}, {pipeline_mode = #tpu.pipeline_mode<synchronous>, transform_indices = @transform_4, window_bounds = array<i64: 1, 1>}, {pipeline_mode = #tpu.pipeline_mode<synchronous>, transform_indices = @transform_5, window_bounds = array<i64: 32, 5>}, {pipeline_mode = #tpu.pipeline_mode<synchronous>, transform_indices = @transform_6, window_bounds = array<i64: 1, 5>}, {transform_indices = @transform_7, window_bounds = array<i64: 8, 128>}]} {
    %c0_i32 = arith.constant 0 : i32
    %0 = arith.cmpi eq, %arg1, %c0_i32 : i32
    %1 = arith.extui %0 : i1 to i32
    %c0_i32_0 = arith.constant 0 : i32
    %2 = arith.cmpi ne, %1, %c0_i32_0 : i32
    scf.if %2 {
      %cst_8 = arith.constant 0.000000e+00 : f32
      %11 = vector.broadcast %cst_8 : f32 to vector<8x1024xf32>
      %c0_9 = arith.constant 0 : index
      %c0_10 = arith.constant 0 : index
      %12 = vector.load %arg10[%c0_9, %c0_10] : memref<8x1024xf32, #tpu.memory_space<vmem>>, vector<8x1024xf32>
      tpu.vector_store %arg10[%c0_9, %c0_10], %11 {strides = array<i32>} : memref<8x1024xf32, #tpu.memory_space<vmem>>, vector<8x1024xf32>,
    } else {
    }
    %c0 = arith.constant 0 : index
    %c0_1 = arith.constant 0 : index
    %3 = vector.load %arg10[%c0, %c0_1] : memref<8x1024xf32, #tpu.memory_space<vmem>>, vector<8x1024xf32>
    %c0_2 = arith.constant 0 : index
    %c0_3 = arith.constant 0 : index
    %c0_4 = arith.constant 0 : index
    %4 = vector.load %arg2[%c0_2, %c0_3, %c0_4] : memref<8x128x1024xf32, #tpu.memory_space<vmem>>, vector<8x128x1024xf32>
    %cst = arith.constant dense<0.000000e+00> : vector<8x1024xf32>
    %5 = vector.multi_reduction <add>, %4, %cst [1] : vector<8x128x1024xf32> to vector<8x1024xf32>
    %6 = arith.addf %3, %5 : vector<8x1024xf32>
    %c0_5 = arith.constant 0 : index
    %c0_6 = arith.constant 0 : index
    %7 = vector.load %arg10[%c0_5, %c0_6] : memref<8x1024xf32, #tpu.memory_space<vmem>>, vector<8x1024xf32>
    tpu.vector_store %arg10[%c0_5, %c0_6], %6 {strides = array<i32>} : memref<8x1024xf32, #tpu.memory_space<vmem>>, vector<8x1024xf32>,
    %c1_i32 = arith.constant 1 : i32
    %8 = arith.cmpi eq, %arg1, %c1_i32 : i32
    %9 = arith.extui %8 : i1 to i32
    %c0_i32_7 = arith.constant 0 : i32
    %10 = arith.cmpi ne, %9, %c0_i32_7 : i32
    scf.if %10 {
      %c0_8 = arith.constant 0 : index
      %c0_9 = arith.constant 0 : index
      %11 = vector.load %arg10[%c0_8, %c0_9] : memref<8x1024xf32, #tpu.memory_space<vmem>>, vector<8x1024xf32>
      %cst_10 = arith.constant 3.906250e-03 : f32
      %12 = vector.broadcast %cst_10 : f32 to vector<8x1024xf32>
      %13 = arith.mulf %11, %12 : vector<8x1024xf32>
      %c0_11 = arith.constant 0 : index
      %c0_12 = arith.constant 0 : index
      %14 = vector.load %arg3[%c0_11, %c0_12] : memref<1024x64xf32, #tpu.memory_space<vmem>>, vector<1024x64xf32>
      %cst_13 = arith.constant dense<0.000000e+00> : vector<8x64xf32>
      %15 = tpu.matmul %13, %14, %cst_13 {dimension_numbers = #tpu.dot_dimension_numbers<[1], [0], [0], [1], [0, 0, 1, 1], [], []>} : vector<8x1024xf32>, vector<1024x64xf32>, vector<8x64xf32> -> vector<8x64xf32>
      %c0_14 = arith.constant 0 : index
      %c0_15 = arith.constant 0 : index
      %16 = vector.load %arg4[%c0_14, %c0_15] : memref<1x64xf32, #tpu.memory_space<vmem>>, vector<1x64xf32>
      %17 = vector.broadcast %16 : vector<1x64xf32> to vector<8x64xf32>
      %18 = arith.addf %15, %17 : vector<8x64xf32>
      %cst_16 = arith.constant 0.000000e+00 : f32
      %19 = vector.broadcast %cst_16 : f32 to vector<8x64xf32>
      %20 = arith.maximumf %18, %19 : vector<8x64xf32>
      %21 = vector.extract_strided_slice %20 {offsets = [0, 0], sizes = [8, 32], strides = [1, 1]} : vector<8x64xf32> to vector<8x32xf32>
      %22 = vector.extract_strided_slice %20 {offsets = [0, 32], sizes = [8, 32], strides = [1, 1]} : vector<8x64xf32> to vector<8x32xf32>
      %c0_17 = arith.constant 0 : index
      %c0_18 = arith.constant 0 : index
      %23 = vector.load %arg5[%c0_17, %c0_18] : memref<32x1xf32, #tpu.memory_space<vmem>>, vector<32x1xf32>
      %cst_19 = arith.constant dense<0.000000e+00> : vector<8x1xf32>
      %24 = tpu.matmul %21, %23, %cst_19 {dimension_numbers = #tpu.dot_dimension_numbers<[1], [0], [0], [1], [0, 0, 1, 1], [], []>} : vector<8x32xf32>, vector<32x1xf32>, vector<8x1xf32> -> vector<8x1xf32>
      %c0_20 = arith.constant 0 : index
      %c0_21 = arith.constant 0 : index
      %25 = vector.load %arg6[%c0_20, %c0_21] : memref<1x1xf32, #tpu.memory_space<vmem>>, vector<1x1xf32>
      %26 = vector.broadcast %25 : vector<1x1xf32> to vector<8x1xf32>
      %27 = arith.addf %24, %26 : vector<8x1xf32>
      %c0_22 = arith.constant 0 : index
      %c0_23 = arith.constant 0 : index
      %28 = vector.load %arg7[%c0_22, %c0_23] : memref<32x5xf32, #tpu.memory_space<vmem>>, vector<32x5xf32>
      %cst_24 = arith.constant dense<0.000000e+00> : vector<8x5xf32>
      %29 = tpu.matmul %22, %28, %cst_24 {dimension_numbers = #tpu.dot_dimension_numbers<[1], [0], [0], [1], [0, 0, 1, 1], [], []>} : vector<8x32xf32>, vector<32x5xf32>, vector<8x5xf32> -> vector<8x5xf32>
      %c0_25 = arith.constant 0 : index
      %c0_26 = arith.constant 0 : index
      %30 = vector.load %arg8[%c0_25, %c0_26] : memref<1x5xf32, #tpu.memory_space<vmem>>, vector<1x5xf32>
      %31 = vector.broadcast %30 : vector<1x5xf32> to vector<8x5xf32>
      %32 = arith.addf %29, %31 : vector<8x5xf32>
      %cst_27 = arith.constant dense<0xFF800000> : vector<8xf32>
      %33 = vector.multi_reduction <maximumf>, %32, %cst_27 [1] : vector<8x5xf32> to vector<8xf32>
      %34 = vector.shape_cast %33 : vector<8xf32> to vector<8x1xf32>
      %35 = vector.broadcast %34 : vector<8x1xf32> to vector<8x5xf32>
      %36 = arith.subf %32, %35 : vector<8x5xf32>
      %37 = math.exp %36 : vector<8x5xf32>
      %cst_28 = arith.constant dense<0.000000e+00> : vector<8xf32>
      %38 = vector.multi_reduction <add>, %37, %cst_28 [1] : vector<8x5xf32> to vector<8xf32>
      %39 = vector.shape_cast %38 : vector<8xf32> to vector<8x1xf32>
      %40 = math.log %39 : vector<8x1xf32>
      %41 = vector.broadcast %40 : vector<8x1xf32> to vector<8x5xf32>
      %42 = arith.subf %36, %41 : vector<8x5xf32>
      %cst_29 = arith.constant 0.000000e+00 : f32
      %43 = vector.broadcast %cst_29 : f32 to vector<8x122xf32>
      %44 = tpu.concatenate %27, %42, %43 in 1 : vector<8x1xf32>, vector<8x5xf32>, vector<8x122xf32> -> vector<8x128xf32>
      %c0_30 = arith.constant 0 : index
      %c0_31 = arith.constant 0 : index
      %45 = vector.load %arg9[%c0_30, %c0_31] : memref<8x128xf32, #tpu.memory_space<vmem>>, vector<8x128xf32>
      tpu.vector_store %arg9[%c0_30, %c0_31], %44 {strides = array<i32>} : memref<8x128xf32, #tpu.memory_space<vmem>>, vector<8x128xf32>,
    } else {
    }
    return
  }
  func.func @transform_0(%arg0: i32, %arg1: i32) -> (i32, i32, i32) {
    %c0_i32 = arith.constant 0 : i32
    %c0_i32_0 = arith.constant 0 : i32
    return %arg0, %arg1, %c0_i32 : i32, i32, i32
  }
  func.func @transform_1(%arg0: i32, %arg1: i32) -> (i32, i32) {
    %c0_i32 = arith.constant 0 : i32
    %c0_i32_0 = arith.constant 0 : i32
    %c0_i32_1 = arith.constant 0 : i32
    return %c0_i32, %c0_i32_0 : i32, i32
  }
  func.func @transform_2(%arg0: i32, %arg1: i32) -> (i32, i32) {
    %c0_i32 = arith.constant 0 : i32
    %c0_i32_0 = arith.constant 0 : i32
    %c0_i32_1 = arith.constant 0 : i32
    return %c0_i32, %c0_i32_0 : i32, i32
  }
  func.func @transform_3(%arg0: i32, %arg1: i32) -> (i32, i32) {
    %c0_i32 = arith.constant 0 : i32
    %c0_i32_0 = arith.constant 0 : i32
    %c0_i32_1 = arith.constant 0 : i32
    return %c0_i32, %c0_i32_0 : i32, i32
  }
  func.func @transform_4(%arg0: i32, %arg1: i32) -> (i32, i32) {
    %c0_i32 = arith.constant 0 : i32
    %c0_i32_0 = arith.constant 0 : i32
    %c0_i32_1 = arith.constant 0 : i32
    return %c0_i32, %c0_i32_0 : i32, i32
  }
  func.func @transform_5(%arg0: i32, %arg1: i32) -> (i32, i32) {
    %c0_i32 = arith.constant 0 : i32
    %c0_i32_0 = arith.constant 0 : i32
    %c0_i32_1 = arith.constant 0 : i32
    return %c0_i32, %c0_i32_0 : i32, i32
  }
  func.func @transform_6(%arg0: i32, %arg1: i32) -> (i32, i32) {
    %c0_i32 = arith.constant 0 : i32
    %c0_i32_0 = arith.constant 0 : i32
    %c0_i32_1 = arith.constant 0 : i32
    return %c0_i32, %c0_i32_0 : i32, i32
  }
  func.func @transform_7(%arg0: i32, %arg1: i32) -> (i32, i32) {
    %c0_i32 = arith.constant 0 : i32
    %c0_i32_0 = arith.constant 0 : i32
    return %arg0, %c0_i32 : i32, i32
  }
}

</mosaic_0001>

<bundles_post_ra>
// kernel: tpu_custom_call.1
= control target key start
LH: loop header
LB: loop body
LE: loop exit
PB: predicated region body
PF: predicated region fallthrough
CT: control target
= control target key end

     0   :  { %s6138_s0 = inlined_call_operand.hbm [shape: f32[8,256,1024], index: 0, kind: input, shape index: {}]   ;;  %s6139_s1 = inlined_call_operand.vmem [shape: f32[1024,64], index: 1, kind: input, shape index: {}]   ;;  %s6140_s2 = inlined_call_operand.hbm [shape: f32[1,64], index: 2, kind: input, shape index: {}]   ;;  %s6141_s3 = inlined_call_operand.vmem [shape: f32[32,1], index: 3, kind: input, shape index: {}]   ;;  %s6142_s4 = inlined_call_operand.<no memory space> [shape: f32[1,1], index: 4, kind: input, shape index: {}]   ;;  %s6143_s5 = inlined_call_operand.vmem [shape: f32[32,5], index: 5, kind: input, shape index: {}]   ;;  %s6144_s6 = inlined_call_operand.hbm [shape: f32[1,5], index: 6, kind: input, shape index: {}]   ;;  %s6145_s7 = inlined_call_operand.hbm [shape: f32[8,128], index: 7, kind: output, shape index: {}]  }
   0x1   :  { %6152 = sst [smem:[#allocation53_spill]] %s6140_s2  ;;  %v12_v0 = vstv %s6142_s4 }
   0x2   :  { %13 = vst [vmem:[#allocation3] sm:$0x1] %v12_v0 }
   0x3   :  { %14 = vsyncpa [#allocation5], 0 }
   0x4   :  { %16 = vsyncpa [#allocation5 + $0x1], 0 }
   0x5   :  { %17 = vsyncpa [#allocation8], 0 }
   0x6   :  { %18 = vsyncpa [#allocation6], 0  ;;  %s4262_s26 = smov 0   ;;  %s4264_s27 = smov 0  }
   0x7   :  { %s4266_s28 = smov 0   ;;  %s4268_s29 = smov 0  }
   0x8   :  { %s4270_s30 = smov 0   ;;  %s4272_s8 = smov 0  }
   0x9 LB: > { %s6151_s4 = sadd.s32 4294967295, %s4202_s8   ;;  %s33_s9 = sadd.s32 1, %s4198_s30  ;;  %s4202_s8 = sphi %s4272_s8, %s24_s8   ;;  %s4198_s30 = sphi %s4270_s30, %s6241_s30   ;;  %s4194_s29 = sphi %s4268_s29, %s6240_s29   ;;  %s4190_s28 = sphi %s4266_s28, %s6239_s28   ;;  %s4186_s27 = sphi %s4264_s27, %s6238_s27   ;;  %s4182_s26 = sphi %s4262_s26, %s6237_s26  }
   0xa   : > { %p34_p0 = scmp.ge.s32.totalorder %s33_s9, 2  ;;  %s45_s10 = sadd.s32 1, %s4190_s28 }
   0xb   : > { %p52_p1 = scmp.ne.s32.totalorder %s4190_s28, %s4186_s27  ;;  %p53_p2 = scmp.eq.s32.totalorder %s4202_s8, 0 }
   0xc   : > { %s6243_s9 = smov (%p34_p0, %s33_s9), 0  ;;  %p58_p4 = scmp.ne.s32.totalorder %s4186_s27, %s4182_s26 }
   0xd   : > { %p4298_p3 = por %p53_p2, %p52_p1  ;;  %s41_s12 = ssub.s32 %s4198_s30, %s6243_s9 }
   0xe   : > { %p4307_p5 = scmp.eq.s32.totalorder %s6151_s4, 0  ;;  %p43_p6 = scmp.eq.s32.totalorder %s41_s12, 0 }
   0xf   : > { %s6153_s11 = scalar_select %p4298_p3, 1, 0 }
  0x10   : > { %s6154_s13 = scalar_select %p4307_p5, 1, 0 }
  0x11   : > { %p3622_p7 = scmp.ge.s32.totalorder %s4202_s8, 1  ;;  %p4314_p8 = por %p4307_p5, %p58_p4 }
  0x12   : > { %p221_p9 = scmp.lt.s32.totalorder %s4202_s8, 3  ;;  %s4204_s17 = smov [#allocation7]  }
  0x13   : > { %s6155_s14 = scalar_select %p4314_p8, 1, 0 }
  0x14   : > { %s4320_s15 = scalar_select %p43_p6, %s4190_s28, %s45_s10  }
  0x15   : > { %p4322_p10 = pnand %p3622_p7, %p221_p9  ;;  %s237_s18 = sshll.u32 %s4204_s17, 4  ;;  %s238_s18 = int_to_ptr.vmem [resolvable:$true] %s237_s18 }
  0x16   : > { %s4205_s19 = smov [#allocation9]   ;;  %s6158_s2 = sld [smem:[#allocation53_spill]] }
  0x17   : > { %s6156_s16 = scalar_select %p4322_p10, 1, 0 }
  0x18   : > { %p3982_p11 = pneg %p4322_p10  ;;  %s257_s20 = sshll.u32 %s4205_s19, 4  ;;  %s4334_s20 = int_to_ptr.vmem [resolvable:$true] %s257_s20 }
  0x1a   : > { %p4330_p12 = pnand %p3982_p11, %p4307_p5 }
  0x1c   : > { %s4062_s24 = scalar_lea.hbm %s6158_s2, 16  ;;  %p4064_p0 = pneg %p4330_p12 }
  0x1d   : > { %p4063_p13 = scmp.ne.s32.totalorder %s6158_s2, %s4062_s24  ;;  %p4069_p4 = scmp.lt.u32.totalorder %s4062_s24, %s6158_s2 }
  0x1f   : > { %p4065_p1 = pnand %p4064_p0, %p4063_p13 }
  0x21   : > { %p4066_p2 = pneg %p4065_p1 }
  0x23   : > { %p4071_p6 = pnand %p4069_p4, %p4066_p2 }
  0x25   : > { %4074 = shalt.err (!%p4071_p6)
}
  0x26   : > { %s4075_s17 = scalar_lea.vmem %s238_s18, 16  ;;  %s4082_s19 = scalar_lea.vmem %s238_s18, 32 }
  0x27   : > { %p4076_p7 = scmp.ne.s32.totalorder %s238_s18, %s4075_s17  ;;  %p4083_p5 = scmp.lt.s32.totalorder %s238_s18, %s238_s18 }
  0x28   : > { %p4084_p8 = scmp.lt.s32.totalorder %s4082_s19, %s4075_s17 }
  0x29   : > { %p4078_p9 = pnand %p4076_p7, %p4064_p0 }
  0x2a   : > { %p4085_p10 = por %p4084_p8, %p4083_p5 }
  0x2b   : > { %p4079_p11 = pneg %p4078_p9 }
  0x2d   : > { %p4086_p3 = pnand %p4085_p10, %p4079_p11 }
  0x2f   : > { %4089 = shalt.err (!%p4086_p3)
}
  0x30   : > { %3985 = dma.hbm_to_vmem [thread:$0]  (!%p4330_p12), %s6158_s2, 16, %s238_s18, [#allocation8]  }
  0x31   : > { %s4090_s26 = scalar_lea.hbm %s6144_s6, 16 }
  0x32   : > { %p4091_p13 = scmp.ne.s32.totalorder %s6144_s6, %s4090_s26  ;;  %p4097_p3 = scmp.lt.u32.totalorder %s4090_s26, %s6144_s6 }
  0x34   : > { %p4093_p5 = pnand %p4091_p13, %p4064_p0 }
  0x36   : > { %p4094_p8 = pneg %p4093_p5 }
  0x38   : > { %p4099_p10 = pnand %p4097_p3, %p4094_p8 }
  0x3a   : > { %4102 = shalt.err (!%p4099_p10)
}
  0x3b   : > { %s4103_s18 = scalar_lea.vmem %s4334_s20, 16  ;;  %s4110_s22 = scalar_lea.vmem %s4334_s20, 32 }
  0x3c   : > { %p4104_p1 = scmp.ne.s32.totalorder %s4334_s20, %s4103_s18  ;;  %p4111_p6 = scmp.lt.s32.totalorder %s4334_s20, %s4334_s20 }
  0x3d   : > { %p4112_p7 = scmp.lt.s32.totalorder %s4110_s22, %s4103_s18 }
  0x3e   : > { %p4106_p2 = pnand %p4104_p1, %p4064_p0 }
  0x3f   : > { %p4113_p9 = por %p4112_p7, %p4111_p6 }
  0x40   : > { %p4107_p4 = pneg %p4106_p2 }
  0x42   : > { %p4114_p11 = pnand %p4113_p9, %p4107_p4 }
  0x44   : > { %4117 = shalt.err (!%p4114_p11)
}
  0x45   : > { %3988 = dma.hbm_to_vmem [thread:$0]  (!%p4330_p12), %s6144_s6, 16, %s4334_s20, [#allocation8]  }
  0x46   : > { %p3625_p13 = scmp.ge.s32.totalorder %s4202_s8, 2 }
  0x48   : > { %264 = sbr.rel (%p3625_p13) target bundleno = 94 (0x5e), region = 40 }
  0x4f   : > { %s268_s25 = sand.u32 1, %s4190_s28   ;;  %s3648_s26 = sshll.u32 %s4198_s30, 14 }
  0x50   : > { %s3626_s10 = sshll.u32 %s268_s25, 13  ;;  %s282_s17 = scalar_lea.hbm %s6138_s0, %s3648_s26 }
  0x51   : > { %p6159_p0 = scmp.ne.s32.totalorder %s6153_s11, 0  ;;  %s272_s19 = scalar_lea.vmem [#allocation4], %s3626_s10 }
  0x52   : > { %s295_s18 = sshll.u32 %s272_s19, 4  ;;  %s4206_s23 = smov 32768   ;;  %s296_s18 = int_to_ptr.vmem [resolvable:$true] %s295_s18 }
  0x53   : > { %s3965_s20 = scalar_select %p6159_p0, [#allocation0], [#allocation13] }
  0x54   : > { %3966 = sst [smem:[#allocation12]] (%p6159_p0), %s4206_s23  ;;  %s4207_s24 = smov 16384  }
  0x55   : > { %s287_s22 = sld [smem:[%s3965_s20]]   ;;  %s4208_s4 = smov 16  }
  0x56   : > { %3967 = sst [smem:[#allocation12 + $0x1]] (%p6159_p0), %s4207_s24  ;;  %s4209_s2 = smov 1024  }
  0x57   : > { %3968 = sst [smem:[#allocation12 + $0x2]] (%p6159_p0), %s4208_s4  ;;  %s4210_s10 = smov 64  }
  0x58   : > { %3969 = sst [smem:[#allocation12 + $0x3]] (%p6159_p0), %s4209_s2  ;;  %s269_s12 = scalar_lea.sflag [#allocation5], %s268_s25 }
  0x59   : > { %3970 = sst [smem:[#allocation12 + $0x4]] (%p6159_p0), %s4209_s2  ;;  %s4211_s20 = smov [#allocation11]  }
  0x5a   : > { %3971 = sst [smem:[#allocation12 + $0x5]] (%p6159_p0), %s4210_s10 }
  0x5b   : > { %s3630_s26 = sshll.u32 %s287_s22, 26 }
  0x5c   : > { %s3631_s21 = sadd.s32 134217728, %s3630_s26 }
  0x5d   : > { %3972 = dma.general (%p6159_p0), %s282_s17, 131072, %s296_s18, %s269_s12, %s4211_s20, [#allocation12], %s3631_s21, 0  }
  0x5e PF: > { %p6160_p12 = scmp.ne.s32.totalorder %s6156_s16, 0 }
  0x60   : > { %320 = sbr.rel (%p6160_p12) target bundleno = 1579 (0x62b), region = 48 }
  0x67   : > { %s322_s4 = sand.u32 1, %s4186_s27   ;;  %p6161_p5 = scmp.ne.s32.totalorder %s6155_s14, 0 }
  0x68   : > { %s3633_s19 = sshll.u32 %s322_s4, 13  ;;  %s323_s23 = scalar_lea.sflag [#allocation5], %s322_s4 }
  0x69   : > { %s4409_s24 = scalar_lea.vmem [#allocation4], %s3633_s19 }
  0x6a   : > { %4169 = dma.done.wait (%p6161_p5), %s323_s23, 131072  }
  0x6b   : > { %4171 = vsyncadd (%p6161_p5), %s323_s23, 4294836224  ;;  %p6162_p8 = scmp.ne.s32.totalorder %s6154_s13, 0 }
  0x6d   : > { %4173 = dma.done.wait (%p6162_p8), [#allocation8], 32  }
  0x6e   : > { %4175 = vsyncadd (%p6162_p8), [#allocation8], 4294967264  ;;  %p3636_p3 = scmp.ne.s32.totalorder %s4194_s29, 0 }
  0x6f   : > { %v4212_v1 = vmov (!%p3636_p3), 0.0  }
  0x70   : > { %365 = sbr.rel (%p3636_p3) target bundleno = 119 (0x77), region = 64  ;;  %366 = vst [vmem:[#allocation2] sm:$0xff] (!%p3636_p3), %v4212_v1  ;;  %367 = vst [vmem:[#allocation2 + $0x8] sm:$0xff] (!%p3636_p3), %v4212_v1 }
  0x71   : > { %368 = vst [vmem:[#allocation2 + $0x10] sm:$0xff] (!%p3636_p3), %v4212_v1  ;;  %369 = vst [vmem:[#allocation2 + $0x18] sm:$0xff] (!%p3636_p3), %v4212_v1 }
  0x72   : > { %370 = vst [vmem:[#allocation2 + $0x20] sm:$0xff] (!%p3636_p3), %v4212_v1  ;;  %371 = vst [vmem:[#allocation2 + $0x28] sm:$0xff] (!%p3636_p3), %v4212_v1 }
  0x73   : > { %372 = vst [vmem:[#allocation2 + $0x30] sm:$0xff] (!%p3636_p3), %v4212_v1  ;;  %373 = vst [vmem:[#allocation2 + $0x38] sm:$0xff] (!%p3636_p3), %v4212_v1 }
  0x77 PF: > { %v382_v2 = vld [vmem:[%s4409_s24] sm:$0xff]  ;;  %v383_v3 = vld [vmem:[%s4409_s24 + $0x8] sm:$0xff]  ;;  %v384_v4 = vld [vmem:[%s4409_s24 + $0x10] sm:$0xff]  ;;  %vm2814_vm0 = vcmask 1041409   ;;  %vm2816_vm1 = vcmask 1042434   ;;  %vm2818_vm2 = vcmask 1043459  }
  0x78   : > { %v385_v5 = vld [vmem:[%s4409_s24 + $0x18] sm:$0xff]  ;;  %v390_v6 = vld [vmem:[%s4409_s24 + $0x40] sm:$0xff]  ;;  %v391_v7 = vld [vmem:[%s4409_s24 + $0x48] sm:$0xff]  ;;  %vm2820_vm3 = vcmask 1044484   ;;  %vm2822_vm4 = vcmask 1045509   ;;  %vm2824_vm5 = vcmask 1046534  }
  0x79   : > { %v392_v8 = vld [vmem:[%s4409_s24 + $0x50] sm:$0xff]  ;;  %v393_v9 = vld [vmem:[%s4409_s24 + $0x58] sm:$0xff]  ;;  %v386_v10 = vld [vmem:[%s4409_s24 + $0x20] sm:$0xff]  ;;  %v1406_v34 = vadd.f32 %v390_v6, %v382_v2  ;;  %v1427_v35 = vadd.f32 %v391_v7, %v383_v3  ;;  %vm2826_vm6 = vcmask 1047559   ;;  %p3637_p10 = scmp.ne.s32.totalorder %s4194_s29, 1 }
  0x7a   : > { %v387_v11 = vld [vmem:[%s4409_s24 + $0x28] sm:$0xff]  ;;  %v388_v12 = vld [vmem:[%s4409_s24 + $0x30] sm:$0xff]  ;;  %v389_v13 = vld [vmem:[%s4409_s24 + $0x38] sm:$0xff]  ;;  %v1448_v36 = vadd.f32 %v392_v8, %v384_v4  ;;  %v1469_v37 = vadd.f32 %v393_v9, %v385_v5  ;;  %vm4214_vm7 = vmmov (!%p3637_p10), 0   ;;  %vm3348_vm8 = vcmask (!%p3637_p10), 261120   ;;  %s4216_s17 = smov (!%p3637_p10), 96  }
  0x7b   : > { %v394_v14 = vld [vmem:[%s4409_s24 + $0x60] sm:$0xff]  ;;  %v395_v15 = vld [vmem:[%s4409_s24 + $0x68] sm:$0xff]  ;;  %v396_v16 = vld [vmem:[%s4409_s24 + $0x70] sm:$0xff]  ;;  %vm3507_vm9 = vcmask (!%p3637_p10), 39936   ;;  %s4217_s18 = smov (!%p3637_p10), 1   ;;  %vm3524_vm10 = vcmask (!%p3637_p10), 7168  }
  0x7c   : > { %v397_v17 = vld [vmem:[%s4409_s24 + $0x78] sm:$0xff]  ;;  %v398_v18 = vld [vmem:[%s4409_s24 + $0x80] sm:$0xff]  ;;  %v399_v19 = vld [vmem:[%s4409_s24 + $0x88] sm:$0xff]  ;;  %v1490_v42 = vadd.f32 %v394_v14, %v386_v10  ;;  %v1511_v43 = vadd.f32 %v395_v15, %v387_v11  ;;  %v1532_v44 = vadd.f32 %v396_v16, %v388_v12  ;;  %vm3526_vm11 = vcmask (!%p3637_p10), 48128  }
  0x7d   : > { %v400_v20 = vld [vmem:[%s4409_s24 + $0x90] sm:$0xff]  ;;  %v401_v21 = vld [vmem:[%s4409_s24 + $0x98] sm:$0xff]  ;;  %v402_v22 = vld [vmem:[%s4409_s24 + $0xa0] sm:$0xff]  ;;  %v1553_v45 = vadd.f32 %v397_v17, %v389_v13  ;;  %v1407_v50 = vadd.f32 %v1406_v34, %v398_v18  ;;  %v1428_v51 = vadd.f32 %v1427_v35, %v399_v19 }
  0x7e   : > { %v403_v23 = vld [vmem:[%s4409_s24 + $0xa8] sm:$0xff]  ;;  %v404_v24 = vld [vmem:[%s4409_s24 + $0xb0] sm:$0xff]  ;;  %v405_v25 = vld [vmem:[%s4409_s24 + $0xb8] sm:$0xff]  ;;  %v1449_v52 = vadd.f32 %v1448_v36, %v400_v20  ;;  %v1470_v53 = vadd.f32 %v1469_v37, %v401_v21  ;;  %v1491_v58 = vadd.f32 %v1490_v42, %v402_v22 }
  0x7f   : > { %v406_v26 = vld [vmem:[%s4409_s24 + $0xc0] sm:$0xff]  ;;  %v407_v27 = vld [vmem:[%s4409_s24 + $0xc8] sm:$0xff]  ;;  %v408_v28 = vld [vmem:[%s4409_s24 + $0xd0] sm:$0xff]  ;;  %v1512_v59 = vadd.f32 %v1511_v43, %v403_v23  ;;  %v1533_v60 = vadd.f32 %v1532_v44, %v404_v24  ;;  %v1554_v61 = vadd.f32 %v1553_v45, %v405_v25 }
  0x80   : > { %v409_v29 = vld [vmem:[%s4409_s24 + $0xd8] sm:$0xff]  ;;  %v410_v30 = vld [vmem:[%s4409_s24 + $0xe0] sm:$0xff]  ;;  %v411_v31 = vld [vmem:[%s4409_s24 + $0xe8] sm:$0xff]  ;;  %v1408_v2 = vadd.f32 %v1407_v50, %v406_v26  ;;  %v1429_v3 = vadd.f32 %v1428_v51, %v407_v27  ;;  %v1450_v4 = vadd.f32 %v1449_v52, %v408_v28 }
  0x81   : > { %v412_v32 = vld [vmem:[%s4409_s24 + $0xf0] sm:$0xff]  ;;  %v413_v33 = vld [vmem:[%s4409_s24 + $0xf8] sm:$0xff]  ;;  %v414_v38 = vld [vmem:[%s4409_s24 + $0x100] sm:$0xff]  ;;  %v1471_v5 = vadd.f32 %v1470_v53, %v409_v29  ;;  %v1492_v10 = vadd.f32 %v1491_v58, %v410_v30  ;;  %v1513_v11 = vadd.f32 %v1512_v59, %v411_v31 }
  0x82   : > { %v415_v39 = vld [vmem:[%s4409_s24 + $0x108] sm:$0xff]  ;;  %v416_v40 = vld [vmem:[%s4409_s24 + $0x110] sm:$0xff]  ;;  %v417_v41 = vld [vmem:[%s4409_s24 + $0x118] sm:$0xff]  ;;  %v1534_v12 = vadd.f32 %v1533_v60, %v412_v32  ;;  %v1555_v13 = vadd.f32 %v1554_v61, %v413_v33  ;;  %v1409_v18 = vadd.f32 %v1408_v2, %v414_v38 }
  0x83   : > { %v418_v46 = vld [vmem:[%s4409_s24 + $0x120] sm:$0xff]  ;;  %v419_v47 = vld [vmem:[%s4409_s24 + $0x128] sm:$0xff]  ;;  %v420_v48 = vld [vmem:[%s4409_s24 + $0x130] sm:$0xff]  ;;  %v1430_v19 = vadd.f32 %v1429_v3, %v415_v39  ;;  %v1451_v20 = vadd.f32 %v1450_v4, %v416_v40  ;;  %v1472_v21 = vadd.f32 %v1471_v5, %v417_v41 }
  0x84   : > { %v421_v49 = vld [vmem:[%s4409_s24 + $0x138] sm:$0xff]  ;;  %v422_v54 = vld [vmem:[%s4409_s24 + $0x140] sm:$0xff]  ;;  %v423_v55 = vld [vmem:[%s4409_s24 + $0x148] sm:$0xff]  ;;  %v1493_v26 = vadd.f32 %v1492_v10, %v418_v46  ;;  %v1514_v27 = vadd.f32 %v1513_v11, %v419_v47  ;;  %v1535_v28 = vadd.f32 %v1534_v12, %v420_v48 }
  0x85   : > { %v424_v56 = vld [vmem:[%s4409_s24 + $0x150] sm:$0xff]  ;;  %v425_v57 = vld [vmem:[%s4409_s24 + $0x158] sm:$0xff]  ;;  %v426_v62 = vld [vmem:[%s4409_s24 + $0x160] sm:$0xff]  ;;  %v1556_v29 = vadd.f32 %v1555_v13, %v421_v49  ;;  %v1410_v34 = vadd.f32 %v1409_v18, %v422_v54  ;;  %v1431_v35 = vadd.f32 %v1430_v19, %v423_v55 }
  0x86   : > { %v427_v63 = vld [vmem:[%s4409_s24 + $0x168] sm:$0xff]  ;;  %v428_v0 = vld [vmem:[%s4409_s24 + $0x170] sm:$0xff]  ;;  %v429_v1 = vld [vmem:[%s4409_s24 + $0x178] sm:$0xff]  ;;  %v1452_v36 = vadd.f32 %v1451_v20, %v424_v56  ;;  %v1473_v37 = vadd.f32 %v1472_v21, %v425_v57  ;;  %v1494_v42 = vadd.f32 %v1493_v26, %v426_v62 }
  0x87   : > { %v430_v6 = vld [vmem:[%s4409_s24 + $0x180] sm:$0xff]  ;;  %v431_v7 = vld [vmem:[%s4409_s24 + $0x188] sm:$0xff]  ;;  %v432_v8 = vld [vmem:[%s4409_s24 + $0x190] sm:$0xff]  ;;  %v1515_v43 = vadd.f32 %v1514_v27, %v427_v63  ;;  %v1536_v44 = vadd.f32 %v1535_v28, %v428_v0  ;;  %v1557_v45 = vadd.f32 %v1556_v29, %v429_v1 }
  0x88   : > { %v433_v9 = vld [vmem:[%s4409_s24 + $0x198] sm:$0xff]  ;;  %v434_v14 = vld [vmem:[%s4409_s24 + $0x1a0] sm:$0xff]  ;;  %v435_v15 = vld [vmem:[%s4409_s24 + $0x1a8] sm:$0xff]  ;;  %v1411_v50 = vadd.f32 %v1410_v34, %v430_v6  ;;  %v1432_v51 = vadd.f32 %v1431_v35, %v431_v7  ;;  %v1453_v52 = vadd.f32 %v1452_v36, %v432_v8 }
  0x89   : > { %v436_v16 = vld [vmem:[%s4409_s24 + $0x1b0] sm:$0xff]  ;;  %v437_v17 = vld [vmem:[%s4409_s24 + $0x1b8] sm:$0xff]  ;;  %v438_v22 = vld [vmem:[%s4409_s24 + $0x1c0] sm:$0xff]  ;;  %v1474_v53 = vadd.f32 %v1473_v37, %v433_v9  ;;  %v1495_v58 = vadd.f32 %v1494_v42, %v434_v14  ;;  %v1516_v59 = vadd.f32 %v1515_v43, %v435_v15 }
  0x8a   : > { %v439_v23 = vld [vmem:[%s4409_s24 + $0x1c8] sm:$0xff]  ;;  %v440_v24 = vld [vmem:[%s4409_s24 + $0x1d0] sm:$0xff]  ;;  %v441_v25 = vld [vmem:[%s4409_s24 + $0x1d8] sm:$0xff]  ;;  %v1537_v60 = vadd.f32 %v1536_v44, %v436_v16  ;;  %v1558_v61 = vadd.f32 %v1557_v45, %v437_v17  ;;  %v1412_v2 = vadd.f32 %v1411_v50, %v438_v22 }
  0x8b   : > { %v442_v30 = vld [vmem:[%s4409_s24 + $0x1e0] sm:$0xff]  ;;  %v443_v31 = vld [vmem:[%s4409_s24 + $0x1e8] sm:$0xff]  ;;  %v444_v32 = vld [vmem:[%s4409_s24 + $0x1f0] sm:$0xff]  ;;  %v1433_v3 = vadd.f32 %v1432_v51, %v439_v23  ;;  %v1454_v4 = vadd.f32 %v1453_v52, %v440_v24  ;;  %v1475_v5 = vadd.f32 %v1474_v53, %v441_v25 }
  0x8c   : > { %v445_v33 = vld [vmem:[%s4409_s24 + $0x1f8] sm:$0xff]  ;;  %v446_v38 = vld [vmem:[%s4409_s24 + $0x200] sm:$0xff]  ;;  %v447_v39 = vld [vmem:[%s4409_s24 + $0x208] sm:$0xff]  ;;  %v1496_v10 = vadd.f32 %v1495_v58, %v442_v30  ;;  %v1517_v11 = vadd.f32 %v1516_v59, %v443_v31  ;;  %v1538_v12 = vadd.f32 %v1537_v60, %v444_v32 }
  0x8d   : > { %v448_v40 = vld [vmem:[%s4409_s24 + $0x210] sm:$0xff]  ;;  %v449_v41 = vld [vmem:[%s4409_s24 + $0x218] sm:$0xff]  ;;  %v450_v46 = vld [vmem:[%s4409_s24 + $0x220] sm:$0xff]  ;;  %v1559_v13 = vadd.f32 %v1558_v61, %v445_v33  ;;  %v1413_v18 = vadd.f32 %v1412_v2, %v446_v38  ;;  %v1434_v19 = vadd.f32 %v1433_v3, %v447_v39 }
  0x8e   : > { %v451_v47 = vld [vmem:[%s4409_s24 + $0x228] sm:$0xff]  ;;  %v452_v48 = vld [vmem:[%s4409_s24 + $0x230] sm:$0xff]  ;;  %v453_v49 = vld [vmem:[%s4409_s24 + $0x238] sm:$0xff]  ;;  %v1455_v20 = vadd.f32 %v1454_v4, %v448_v40  ;;  %v1476_v21 = vadd.f32 %v1475_v5, %v449_v41  ;;  %v1497_v26 = vadd.f32 %v1496_v10, %v450_v46 }
  0x8f   : > { %v454_v54 = vld [vmem:[%s4409_s24 + $0x240] sm:$0xff]  ;;  %v455_v55 = vld [vmem:[%s4409_s24 + $0x248] sm:$0xff]  ;;  %v456_v56 = vld [vmem:[%s4409_s24 + $0x250] sm:$0xff]  ;;  %v1518_v27 = vadd.f32 %v1517_v11, %v451_v47  ;;  %v1539_v28 = vadd.f32 %v1538_v12, %v452_v48  ;;  %v1560_v29 = vadd.f32 %v1559_v13, %v453_v49 }
  0x90   : > { %v457_v57 = vld [vmem:[%s4409_s24 + $0x258] sm:$0xff]  ;;  %v458_v62 = vld [vmem:[%s4409_s24 + $0x260] sm:$0xff]  ;;  %v459_v63 = vld [vmem:[%s4409_s24 + $0x268] sm:$0xff]  ;;  %v1414_v34 = vadd.f32 %v1413_v18, %v454_v54  ;;  %v1435_v35 = vadd.f32 %v1434_v19, %v455_v55  ;;  %v1456_v36 = vadd.f32 %v1455_v20, %v456_v56 }
  0x91   : > { %v460_v0 = vld [vmem:[%s4409_s24 + $0x270] sm:$0xff]  ;;  %v461_v1 = vld [vmem:[%s4409_s24 + $0x278] sm:$0xff]  ;;  %v462_v6 = vld [vmem:[%s4409_s24 + $0x280] sm:$0xff]  ;;  %v1477_v37 = vadd.f32 %v1476_v21, %v457_v57  ;;  %v1498_v42 = vadd.f32 %v1497_v26, %v458_v62  ;;  %v1519_v43 = vadd.f32 %v1518_v27, %v459_v63 }
  0x92   : > { %v463_v7 = vld [vmem:[%s4409_s24 + $0x288] sm:$0xff]  ;;  %v464_v8 = vld [vmem:[%s4409_s24 + $0x290] sm:$0xff]  ;;  %v465_v9 = vld [vmem:[%s4409_s24 + $0x298] sm:$0xff]  ;;  %v1540_v44 = vadd.f32 %v1539_v28, %v460_v0  ;;  %v1561_v45 = vadd.f32 %v1560_v29, %v461_v1  ;;  %v1415_v50 = vadd.f32 %v1414_v34, %v462_v6 }
  0x93   : > { %v466_v14 = vld [vmem:[%s4409_s24 + $0x2a0] sm:$0xff]  ;;  %v467_v15 = vld [vmem:[%s4409_s24 + $0x2a8] sm:$0xff]  ;;  %v468_v16 = vld [vmem:[%s4409_s24 + $0x2b0] sm:$0xff]  ;;  %v1436_v51 = vadd.f32 %v1435_v35, %v463_v7  ;;  %v1457_v52 = vadd.f32 %v1456_v36, %v464_v8  ;;  %v1478_v53 = vadd.f32 %v1477_v37, %v465_v9 }
  0x94   : > { %v469_v17 = vld [vmem:[%s4409_s24 + $0x2b8] sm:$0xff]  ;;  %v470_v22 = vld [vmem:[%s4409_s24 + $0x2c0] sm:$0xff]  ;;  %v471_v23 = vld [vmem:[%s4409_s24 + $0x2c8] sm:$0xff]  ;;  %v1499_v57 = vadd.f32 %v1498_v42, %v466_v14  ;;  %v1520_v58 = vadd.f32 %v1519_v43, %v467_v15  ;;  %v1541_v59 = vadd.f32 %v1540_v44, %v468_v16 }
  0x95   : > { %v472_v24 = vld [vmem:[%s4409_s24 + $0x2d0] sm:$0xff]  ;;  %v473_v25 = vld [vmem:[%s4409_s24 + $0x2d8] sm:$0xff]  ;;  %v474_v30 = vld [vmem:[%s4409_s24 + $0x2e0] sm:$0xff]  ;;  %v1562_v60 = vadd.f32 %v1561_v45, %v469_v17  ;;  %v1416_v0 = vadd.f32 %v1415_v50, %v470_v22  ;;  %v1437_v1 = vadd.f32 %v1436_v51, %v471_v23 }
  0x96   : > { %v475_v31 = vld [vmem:[%s4409_s24 + $0x2e8] sm:$0xff]  ;;  %v476_v32 = vld [vmem:[%s4409_s24 + $0x2f0] sm:$0xff]  ;;  %v477_v33 = vld [vmem:[%s4409_s24 + $0x2f8] sm:$0xff]  ;;  %v1458_v2 = vadd.f32 %v1457_v52, %v472_v24  ;;  %v1479_v3 = vadd.f32 %v1478_v53, %v473_v25  ;;  %v1500_v7 = vadd.f32 %v1499_v57, %v474_v30 }
  0x97   : > { %v478_v38 = vld [vmem:[%s4409_s24 + $0x300] sm:$0xff]  ;;  %v479_v39 = vld [vmem:[%s4409_s24 + $0x308] sm:$0xff]  ;;  %v480_v40 = vld [vmem:[%s4409_s24 + $0x310] sm:$0xff]  ;;  %v1521_v8 = vadd.f32 %v1520_v58, %v475_v31  ;;  %v1542_v9 = vadd.f32 %v1541_v59, %v476_v32  ;;  %v1563_v10 = vadd.f32 %v1562_v60, %v477_v33 }
  0x98   : > { %v481_v41 = vld [vmem:[%s4409_s24 + $0x318] sm:$0xff]  ;;  %v482_v46 = vld [vmem:[%s4409_s24 + $0x320] sm:$0xff]  ;;  %v483_v47 = vld [vmem:[%s4409_s24 + $0x328] sm:$0xff]  ;;  %v1417_v14 = vadd.f32 %v1416_v0, %v478_v38  ;;  %v1438_v15 = vadd.f32 %v1437_v1, %v479_v39  ;;  %v1459_v16 = vadd.f32 %v1458_v2, %v480_v40 }
  0x99   : > { %v484_v48 = vld [vmem:[%s4409_s24 + $0x330] sm:$0xff]  ;;  %v485_v49 = vld [vmem:[%s4409_s24 + $0x338] sm:$0xff]  ;;  %v486_v54 = vld [vmem:[%s4409_s24 + $0x340] sm:$0xff]  ;;  %v1480_v17 = vadd.f32 %v1479_v3, %v481_v41  ;;  %v1501_v21 = vadd.f32 %v1500_v7, %v482_v46  ;;  %v1522_v22 = vadd.f32 %v1521_v8, %v483_v47 }
  0x9a   : > { %v487_v55 = vld [vmem:[%s4409_s24 + $0x348] sm:$0xff]  ;;  %v488_v56 = vld [vmem:[%s4409_s24 + $0x350] sm:$0xff]  ;;  %v489_v61 = vld [vmem:[%s4409_s24 + $0x358] sm:$0xff]  ;;  %v1543_v23 = vadd.f32 %v1542_v9, %v484_v48  ;;  %v1564_v24 = vadd.f32 %v1563_v10, %v485_v49  ;;  %v1418_v28 = vadd.f32 %v1417_v14, %v486_v54 }
  0x9b   : > { %v490_v62 = vld [vmem:[%s4409_s24 + $0x360] sm:$0xff]  ;;  %v491_v63 = vld [vmem:[%s4409_s24 + $0x368] sm:$0xff]  ;;  %v492_v4 = vld [vmem:[%s4409_s24 + $0x370] sm:$0xff]  ;;  %v1439_v29 = vadd.f32 %v1438_v15, %v487_v55  ;;  %v1460_v30 = vadd.f32 %v1459_v16, %v488_v56  ;;  %v1481_v31 = vadd.f32 %v1480_v17, %v489_v61 }
  0x9c   : > { %v493_v5 = vld [vmem:[%s4409_s24 + $0x378] sm:$0xff]  ;;  %v494_v6 = vld [vmem:[%s4409_s24 + $0x380] sm:$0xff]  ;;  %v495_v11 = vld [vmem:[%s4409_s24 + $0x388] sm:$0xff]  ;;  %v1502_v35 = vadd.f32 %v1501_v21, %v490_v62  ;;  %v1523_v36 = vadd.f32 %v1522_v22, %v491_v63  ;;  %v1544_v37 = vadd.f32 %v1543_v23, %v492_v4 }
  0x9d   : > { %v496_v12 = vld [vmem:[%s4409_s24 + $0x390] sm:$0xff]  ;;  %v497_v13 = vld [vmem:[%s4409_s24 + $0x398] sm:$0xff]  ;;  %v498_v18 = vld [vmem:[%s4409_s24 + $0x3a0] sm:$0xff]  ;;  %v1565_v38 = vadd.f32 %v1564_v24, %v493_v5  ;;  %v1419_v42 = vadd.f32 %v1418_v28, %v494_v6  ;;  %v1440_v43 = vadd.f32 %v1439_v29, %v495_v11 }
  0x9e   : > { %v499_v19 = vld [vmem:[%s4409_s24 + $0x3a8] sm:$0xff]  ;;  %v500_v20 = vld [vmem:[%s4409_s24 + $0x3b0] sm:$0xff]  ;;  %v501_v25 = vld [vmem:[%s4409_s24 + $0x3b8] sm:$0xff]  ;;  %v1461_v44 = vadd.f32 %v1460_v30, %v496_v12  ;;  %v1482_v45 = vadd.f32 %v1481_v31, %v497_v13  ;;  %v1503_v48 = vadd.f32 %v1502_v35, %v498_v18 }
  0x9f   : > { %v502_v26 = vld [vmem:[%s4409_s24 + $0x3c0] sm:$0xff]  ;;  %v503_v27 = vld [vmem:[%s4409_s24 + $0x3c8] sm:$0xff]  ;;  %v504_v32 = vld [vmem:[%s4409_s24 + $0x3d0] sm:$0xff]  ;;  %v1524_v49 = vadd.f32 %v1523_v36, %v499_v19  ;;  %v1545_v50 = vadd.f32 %v1544_v37, %v500_v20  ;;  %v1566_v51 = vadd.f32 %v1565_v38, %v501_v25 }
  0xa0   : > { %v505_v33 = vld [vmem:[%s4409_s24 + $0x3d8] sm:$0xff]  ;;  %v506_v34 = vld [vmem:[%s4409_s24 + $0x3e0] sm:$0xff]  ;;  %v507_v39 = vld [vmem:[%s4409_s24 + $0x3e8] sm:$0xff]  ;;  %v1420_v54 = vadd.f32 %v1419_v42, %v502_v26  ;;  %v1441_v55 = vadd.f32 %v1440_v43, %v503_v27  ;;  %v1462_v56 = vadd.f32 %v1461_v44, %v504_v32 }
  0xa1   : > { %v508_v40 = vld [vmem:[%s4409_s24 + $0x3f0] sm:$0xff]  ;;  %v509_v41 = vld [vmem:[%s4409_s24 + $0x3f8] sm:$0xff]  ;;  %v510_v46 = vld [vmem:[%s4409_s24 + $0x400] sm:$0xff]  ;;  %v1483_v57 = vadd.f32 %v1482_v45, %v505_v33  ;;  %v1504_v58 = vadd.f32 %v1503_v48, %v506_v34  ;;  %v1525_v59 = vadd.f32 %v1524_v49, %v507_v39 }
  0xa2   : > { %v518_v47 = vld [vmem:[%s4409_s24 + $0x440] sm:$0xff]  ;;  %v511_v52 = vld [vmem:[%s4409_s24 + $0x408] sm:$0xff]  ;;  %v1546_v60 = vadd.f32 %v1545_v50, %v508_v40  ;;  %v1567_v61 = vadd.f32 %v1566_v51, %v509_v41  ;;  %v1421_v62 = vrot.slane %v1420_v54, 4  ;;  %v1442_v63 = vrot.slane %v1441_v55, 4  ;;  %v512_v26 = vld [vmem:[%s4409_s24 + $0x410] sm:$0xff] }
  0xa3   : > { %v519_v53 = vld [vmem:[%s4409_s24 + $0x448] sm:$0xff]  ;;  %v1463_v0 = vrot.slane %v1462_v56, 4  ;;  %v4552_v1 = vadd.f32 %v518_v47, %v510_v46  ;;  %v1484_v2 = vrot.slane %v1483_v57, 4  ;;  %v1505_v3 = vrot.slane %v1504_v58, 4  ;;  %v520_v27 = vld [vmem:[%s4409_s24 + $0x450] sm:$0xff]  ;;  %v513_v32 = vld [vmem:[%s4409_s24 + $0x418] sm:$0xff] }
  0xa4   : > { %v1526_v4 = vrot.slane %v1525_v59, 4  ;;  %v4554_v5 = vadd.f32 %v519_v53, %v511_v52  ;;  %v1422_v6 = vadd.f32 %v1421_v62, %v1420_v54  ;;  %v1443_v7 = vadd.f32 %v1442_v63, %v1441_v55  ;;  %v514_v33 = vld [vmem:[%s4409_s24 + $0x420] sm:$0xff]  ;;  %v515_v34 = vld [vmem:[%s4409_s24 + $0x428] sm:$0xff]  ;;  %v521_v35 = vld [vmem:[%s4409_s24 + $0x458] sm:$0xff] }
  0xa5   : > { %v1464_v8 = vadd.f32 %v1463_v0, %v1462_v56  ;;  %v1547_v9 = vrot.slane %v1546_v60, 4  ;;  %v1485_v10 = vadd.f32 %v1484_v2, %v1483_v57  ;;  %v1506_v11 = vadd.f32 %v1505_v3, %v1504_v58  ;;  %v522_v36 = vld [vmem:[%s4409_s24 + $0x460] sm:$0xff]  ;;  %v523_v37 = vld [vmem:[%s4409_s24 + $0x468] sm:$0xff]  ;;  %v516_v42 = vld [vmem:[%s4409_s24 + $0x430] sm:$0xff] }
  0xa6   : > { %v1527_v12 = vadd.f32 %v1526_v4, %v1525_v59  ;;  %v1568_v13 = vrot.slane %v1567_v61, 4  ;;  %v1423_v14 = vrot.slane %v1422_v6, 2  ;;  %v1444_v15 = vrot.slane %v1443_v7, 2  ;;  %v524_v43 = vld [vmem:[%s4409_s24 + $0x470] sm:$0xff]  ;;  %v526_v44 = vld [vmem:[%s4409_s24 + $0x480] sm:$0xff]  ;;  %v527_v45 = vld [vmem:[%s4409_s24 + $0x488] sm:$0xff] }
  0xa7   : > { %v1465_v16 = vrot.slane %v1464_v8, 2  ;;  %v1548_v17 = vadd.f32 %v1547_v9, %v1546_v60  ;;  %v1486_v18 = vrot.slane %v1485_v10, 2  ;;  %v1507_v19 = vrot.slane %v1506_v11, 2  ;;  %v528_v46 = vld [vmem:[%s4409_s24 + $0x490] sm:$0xff]  ;;  %v517_v51 = vld [vmem:[%s4409_s24 + $0x438] sm:$0xff]  ;;  %v530_v54 = vld [vmem:[%s4409_s24 + $0x4a0] sm:$0xff] }
  0xa8   : > { %v1528_v20 = vrot.slane %v1527_v12, 2  ;;  %v1569_v21 = vadd.f32 %v1568_v13, %v1567_v61  ;;  %v1424_v22 = vadd.f32 %v1423_v14, %v1422_v6  ;;  %v1445_v23 = vadd.f32 %v1444_v15, %v1443_v7  ;;  %v525_v52 = vld [vmem:[%s4409_s24 + $0x478] sm:$0xff]  ;;  %v531_v55 = vld [vmem:[%s4409_s24 + $0x4a8] sm:$0xff]  ;;  %v532_v60 = vld [vmem:[%s4409_s24 + $0x4b0] sm:$0xff] }
  0xa9   : > { %v1466_v24 = vadd.f32 %v1465_v16, %v1464_v8  ;;  %v1549_v25 = vrot.slane %v1548_v17, 2  ;;  %v1487_v28 = vadd.f32 %v1486_v18, %v1485_v10  ;;  %v1508_v29 = vadd.f32 %v1507_v19, %v1506_v11  ;;  %v529_v53 = vld [vmem:[%s4409_s24 + $0x498] sm:$0xff]  ;;  %v534_v61 = vld [vmem:[%s4409_s24 + $0x4c0] sm:$0xff]  ;;  %v535_v62 = vld [vmem:[%s4409_s24 + $0x4c8] sm:$0xff] }
  0xaa   : > { %v1529_v30 = vadd.f32 %v1528_v20, %v1527_v12  ;;  %v1570_v31 = vrot.slane %v1569_v21, 2  ;;  %v1425_v38 = vrot.slane %v1424_v22, 1  ;;  %v1446_v39 = vrot.slane %v1445_v23, 1  ;;  %v536_v63 = vld [vmem:[%s4409_s24 + $0x4d0] sm:$0xff]  ;;  %v533_v6 = vld [vmem:[%s4409_s24 + $0x4b8] sm:$0xff]  ;;  %v538_v8 = vld [vmem:[%s4409_s24 + $0x4e0] sm:$0xff] }
  0xab   : > { %v1467_v40 = vrot.slane %v1466_v24, 1  ;;  %v1550_v41 = vadd.f32 %v1549_v25, %v1548_v17  ;;  %v1488_v47 = vrot.slane %v1487_v28, 1  ;;  %v1509_v48 = vrot.slane %v1508_v29, 1  ;;  %v537_v7 = vld [vmem:[%s4409_s24 + $0x4d8] sm:$0xff]  ;;  %v539_v9 = vld [vmem:[%s4409_s24 + $0x4e8] sm:$0xff]  ;;  %v540_v14 = vld [vmem:[%s4409_s24 + $0x4f0] sm:$0xff] }
  0xac   : > { %v1530_v49 = vrot.slane %v1529_v30, 1  ;;  %v1571_v50 = vadd.f32 %v1570_v31, %v1569_v21  ;;  %v4574_v56 = vadd.f32 %v1425_v38, %v1424_v22  ;;  %v4576_v57 = vadd.f32 %v1446_v39, %v1445_v23  ;;  %v542_v15 = vld [vmem:[%s4409_s24 + $0x500] sm:$0xff]  ;;  %v543_v16 = vld [vmem:[%s4409_s24 + $0x508] sm:$0xff]  ;;  %v544_v17 = vld [vmem:[%s4409_s24 + $0x510] sm:$0xff] }
  0xad   : > { %v4578_v58 = vadd.f32 %v1467_v40, %v1466_v24  ;;  %v1551_v59 = vrot.slane %v1550_v41, 1  ;;  %v4584_v0 = vadd.f32 %v1488_v47, %v1487_v28  ;;  %v4586_v2 = vadd.f32 %v1509_v48, %v1508_v29  ;;  %v541_v22 = vld [vmem:[%s4409_s24 + $0x4f8] sm:$0xff]  ;;  %v548_v28 = vld [vmem:[%s4409_s24 + $0x530] sm:$0xff]  ;;  %v550_v29 = vld [vmem:[%s4409_s24 + $0x540] sm:$0xff] }
  0xae   : > { %v4588_v3 = vadd.f32 %v1530_v49, %v1529_v30  ;;  %v1572_v4 = vrot.slane %v1571_v50, 1  ;;  %v1575_v11 = vadd.f32 %v4552_v1, %v526_v44  ;;  %v1596_v12 = vadd.f32 %v4554_v5, %v527_v45  ;;  %v545_v23 = vld [vmem:[%s4409_s24 + $0x518] sm:$0xff]  ;;  %v546_v1 = vld [vmem:[%s4409_s24 + $0x520] sm:$0xff]  ;;  %v547_v5 = vld [vmem:[%s4409_s24 + $0x528] sm:$0xff] }
  0xaf   : > { %6163 = vst [vmem:[#allocation17_spill] sm:$0xff] %v4586_v2  ;;  %v4594_v10 = vadd.f32 %v1551_v59, %v1550_v41  ;;  %v1616_v13 = vadd.f32 %v520_v27, %v512_v26  ;;  %v1637_v19 = vadd.f32 %v521_v35, %v513_v32  ;;  %v1658_v20 = vadd.f32 %v522_v36, %v514_v33  ;;  %v551_v30 = vld [vmem:[%s4409_s24 + $0x548] sm:$0xff]  ;;  %v552_v31 = vld [vmem:[%s4409_s24 + $0x550] sm:$0xff]  ;;  %v549_v36 = vld [vmem:[%s4409_s24 + $0x538] sm:$0xff] }
  0xb0   : > { %6164 = vst [vmem:[#allocation18_spill] sm:$0xff] %v4588_v3  ;;  %v4602_v18 = vadd.f32 %v1572_v4, %v1571_v50  ;;  %v1679_v21 = vadd.f32 %v523_v37, %v515_v34  ;;  %v1576_v24 = vadd.f32 %v1575_v11, %v534_v61  ;;  %v1597_v25 = vadd.f32 %v1596_v12, %v535_v62  ;;  %v553_v37 = vld [vmem:[%s4409_s24 + $0x558] sm:$0xff]  ;;  %v554_v38 = vld [vmem:[%s4409_s24 + $0x560] sm:$0xff]  ;;  %v555_v39 = vld [vmem:[%s4409_s24 + $0x568] sm:$0xff] }
  0xb1   : > { %6165 = vst [vmem:[#allocation19_spill] sm:$0xff] %v4594_v10  ;;  %v1617_v26 = vadd.f32 %v1616_v13, %v528_v46  ;;  %v1700_v27 = vadd.f32 %v524_v43, %v516_v42  ;;  %v1638_v32 = vadd.f32 %v1637_v19, %v529_v53  ;;  %v1659_v33 = vadd.f32 %v1658_v20, %v530_v54  ;;  %v556_v44 = vld [vmem:[%s4409_s24 + $0x570] sm:$0xff]  ;;  %v558_v45 = vld [vmem:[%s4409_s24 + $0x580] sm:$0xff]  ;;  %v559_v46 = vld [vmem:[%s4409_s24 + $0x588] sm:$0xff] }
  0xb2   : > { %6166 = vst [vmem:[#allocation20_spill] sm:$0xff] %v4602_v18  ;;  %v1680_v34 = vadd.f32 %v1679_v21, %v531_v55  ;;  %v1721_v35 = vadd.f32 %v525_v52, %v517_v51  ;;  %v1577_v40 = vadd.f32 %v1576_v24, %v542_v15  ;;  %v1598_v41 = vadd.f32 %v1597_v25, %v543_v16  ;;  %v560_v47 = vld [vmem:[%s4409_s24 + $0x590] sm:$0xff]  ;;  %v557_v52 = vld [vmem:[%s4409_s24 + $0x578] sm:$0xff]  ;;  %v562_v54 = vld [vmem:[%s4409_s24 + $0x5a0] sm:$0xff] }
  0xb3   : > { %v1618_v42 = vadd.f32 %v1617_v26, %v536_v63  ;;  %v1701_v43 = vadd.f32 %v1700_v27, %v532_v60  ;;  %v1639_v48 = vadd.f32 %v1638_v32, %v537_v7  ;;  %v1660_v49 = vadd.f32 %v1659_v33, %v538_v8  ;;  %v561_v53 = vld [vmem:[%s4409_s24 + $0x598] sm:$0xff]  ;;  %v563_v55 = vld [vmem:[%s4409_s24 + $0x5a8] sm:$0xff]  ;;  %v564_v63 = vld [vmem:[%s4409_s24 + $0x5b0] sm:$0xff] }
  0xb4   : > { %v1681_v50 = vadd.f32 %v1680_v34, %v539_v9  ;;  %v1722_v51 = vadd.f32 %v1721_v35, %v533_v6  ;;  %v1578_v59 = vadd.f32 %v1577_v40, %v550_v29  ;;  %v1599_v60 = vadd.f32 %v1598_v41, %v551_v30  ;;  %v566_v4 = vld [vmem:[%s4409_s24 + $0x5c0] sm:$0xff]  ;;  %v567_v7 = vld [vmem:[%s4409_s24 + $0x5c8] sm:$0xff]  ;;  %v568_v8 = vld [vmem:[%s4409_s24 + $0x5d0] sm:$0xff] }
  0xb5   : > { %v1619_v61 = vadd.f32 %v1618_v42, %v544_v17  ;;  %v1702_v62 = vadd.f32 %v1701_v43, %v540_v14  ;;  %v1640_v6 = vadd.f32 %v1639_v48, %v545_v23  ;;  %v1661_v9 = vadd.f32 %v1660_v49, %v546_v1  ;;  %v565_v13 = vld [vmem:[%s4409_s24 + $0x5b8] sm:$0xff]  ;;  %v570_v16 = vld [vmem:[%s4409_s24 + $0x5e0] sm:$0xff]  ;;  %v571_v17 = vld [vmem:[%s4409_s24 + $0x5e8] sm:$0xff] }
  0xb6   : > { %v1682_v11 = vadd.f32 %v1681_v50, %v547_v5  ;;  %v1723_v12 = vadd.f32 %v1722_v51, %v541_v22  ;;  %v569_v15 = vld [vmem:[%s4409_s24 + $0x5d8] sm:$0xff]  ;;  %v1579_v14 = vadd.f32 %v1578_v59, %v558_v45  ;;  %v1600_v19 = vadd.f32 %v1599_v60, %v559_v46  ;;  %v572_v24 = vld [vmem:[%s4409_s24 + $0x5f0] sm:$0xff]  ;;  %v574_v25 = vld [vmem:[%s4409_s24 + $0x600] sm:$0xff] }
  0xb7   : > { %v1620_v20 = vadd.f32 %v1619_v61, %v552_v31  ;;  %v1703_v21 = vadd.f32 %v1702_v62, %v548_v28  ;;  %v575_v23 = vld [vmem:[%s4409_s24 + $0x608] sm:$0xff]  ;;  %v576_v1 = vld [vmem:[%s4409_s24 + $0x610] sm:$0xff]  ;;  %v1641_v22 = vadd.f32 %v1640_v6, %v553_v37  ;;  %v1662_v5 = vadd.f32 %v1661_v9, %v554_v38  ;;  %v573_v29 = vld [vmem:[%s4409_s24 + $0x5f8] sm:$0xff] }
  0xb8   : > { %v1683_v26 = vadd.f32 %v1682_v11, %v555_v39  ;;  %v1724_v27 = vadd.f32 %v1723_v12, %v549_v36  ;;  %v577_v30 = vld [vmem:[%s4409_s24 + $0x618] sm:$0xff]  ;;  %v578_v32 = vld [vmem:[%s4409_s24 + $0x620] sm:$0xff]  ;;  %v579_v31 = vld [vmem:[%s4409_s24 + $0x628] sm:$0xff]  ;;  %v1580_v28 = vadd.f32 %v1579_v14, %v566_v4  ;;  %v1601_v33 = vadd.f32 %v1600_v19, %v567_v7 }
  0xb9   : > { %v1621_v34 = vadd.f32 %v1620_v20, %v560_v47  ;;  %v1704_v35 = vadd.f32 %v1703_v21, %v556_v44  ;;  %v580_v40 = vld [vmem:[%s4409_s24 + $0x630] sm:$0xff]  ;;  %v582_v41 = vld [vmem:[%s4409_s24 + $0x640] sm:$0xff]  ;;  %v583_v37 = vld [vmem:[%s4409_s24 + $0x648] sm:$0xff]  ;;  %v1642_v36 = vadd.f32 %v1641_v22, %v561_v53  ;;  %v1663_v39 = vadd.f32 %v1662_v5, %v562_v54 }
  0xba   : > { %v584_v38 = vld [vmem:[%s4409_s24 + $0x650] sm:$0xff]  ;;  %v1684_v42 = vadd.f32 %v1683_v26, %v563_v55  ;;  %v1725_v43 = vadd.f32 %v1724_v27, %v557_v52  ;;  %v581_v45 = vld [vmem:[%s4409_s24 + $0x638] sm:$0xff]  ;;  %v586_v48 = vld [vmem:[%s4409_s24 + $0x660] sm:$0xff]  ;;  %v1581_v44 = vadd.f32 %v1580_v28, %v574_v25  ;;  %v1602_v49 = vadd.f32 %v1601_v33, %v575_v23 }
  0xbb   : > { %v585_v46 = vld [vmem:[%s4409_s24 + $0x658] sm:$0xff]  ;;  %v587_v47 = vld [vmem:[%s4409_s24 + $0x668] sm:$0xff]  ;;  %v1622_v50 = vadd.f32 %v1621_v34, %v568_v8  ;;  %v1705_v51 = vadd.f32 %v1704_v35, %v564_v63  ;;  %v588_v59 = vld [vmem:[%s4409_s24 + $0x670] sm:$0xff]  ;;  %v1643_v52 = vadd.f32 %v1642_v36, %v569_v15  ;;  %v1664_v55 = vadd.f32 %v1663_v39, %v570_v16 }
  0xbc   : > { %v590_v60 = vld [vmem:[%s4409_s24 + $0x680] sm:$0xff]  ;;  %v591_v53 = vld [vmem:[%s4409_s24 + $0x688] sm:$0xff]  ;;  %v592_v54 = vld [vmem:[%s4409_s24 + $0x690] sm:$0xff]  ;;  %v1685_v61 = vadd.f32 %v1684_v42, %v571_v17  ;;  %v1726_v62 = vadd.f32 %v1725_v43, %v565_v13  ;;  %v1582_v63 = vadd.f32 %v1581_v44, %v582_v41  ;;  %v1603_v9 = vadd.f32 %v1602_v49, %v583_v37 }
  0xbd   : > { %v589_v4 = vld [vmem:[%s4409_s24 + $0x678] sm:$0xff]  ;;  %v594_v6 = vld [vmem:[%s4409_s24 + $0x6a0] sm:$0xff]  ;;  %v595_v8 = vld [vmem:[%s4409_s24 + $0x6a8] sm:$0xff]  ;;  %v1623_v11 = vadd.f32 %v1622_v50, %v576_v1  ;;  %v1706_v12 = vadd.f32 %v1705_v51, %v572_v24  ;;  %v1644_v13 = vadd.f32 %v1643_v52, %v577_v30  ;;  %v1665_v17 = vadd.f32 %v1664_v55, %v578_v32 }
  0xbe   : > { %v593_v7 = vld [vmem:[%s4409_s24 + $0x698] sm:$0xff]  ;;  %v596_v14 = vld [vmem:[%s4409_s24 + $0x6b0] sm:$0xff]  ;;  %v598_v19 = vld [vmem:[%s4409_s24 + $0x6c0] sm:$0xff]  ;;  %v1686_v20 = vadd.f32 %v1685_v61, %v579_v31  ;;  %v1727_v21 = vadd.f32 %v1726_v62, %v573_v29  ;;  %v1583_v24 = vadd.f32 %v1582_v63, %v590_v60  ;;  %v1604_v5 = vadd.f32 %v1603_v9, %v591_v53 }
  0xbf   : > { %v599_v15 = vld [vmem:[%s4409_s24 + $0x6c8] sm:$0xff]  ;;  %v600_v16 = vld [vmem:[%s4409_s24 + $0x6d0] sm:$0xff]  ;;  %v597_v25 = vld [vmem:[%s4409_s24 + $0x6b8] sm:$0xff]  ;;  %v1624_v26 = vadd.f32 %v1623_v11, %v584_v38  ;;  %v1707_v27 = vadd.f32 %v1706_v12, %v580_v40  ;;  %v1645_v29 = vadd.f32 %v1644_v13, %v585_v46  ;;  %v1666_v31 = vadd.f32 %v1665_v17, %v586_v48 }
  0xc0   : > { %v601_v23 = vld [vmem:[%s4409_s24 + $0x6d8] sm:$0xff]  ;;  %v602_v22 = vld [vmem:[%s4409_s24 + $0x6e0] sm:$0xff]  ;;  %v603_v1 = vld [vmem:[%s4409_s24 + $0x6e8] sm:$0xff]  ;;  %v1687_v34 = vadd.f32 %v1686_v20, %v587_v47  ;;  %v1728_v35 = vadd.f32 %v1727_v21, %v581_v45  ;;  %v1584_v38 = vadd.f32 %v1583_v24, %v598_v19  ;;  %v1605_v40 = vadd.f32 %v1604_v5, %v599_v15 }
  0xc1   : > { %v604_v28 = vld [vmem:[%s4409_s24 + $0x6f0] sm:$0xff]  ;;  %v606_v33 = vld [vmem:[%s4409_s24 + $0x700] sm:$0xff]  ;;  %v607_v30 = vld [vmem:[%s4409_s24 + $0x708] sm:$0xff]  ;;  %v1625_v42 = vadd.f32 %v1624_v26, %v592_v54  ;;  %v1708_v43 = vadd.f32 %v1707_v27, %v588_v59  ;;  %v1646_v48 = vadd.f32 %v1645_v29, %v593_v7  ;;  %v1667_v47 = vadd.f32 %v1666_v31, %v594_v6 }
  0xc2   : > { %v608_v32 = vld [vmem:[%s4409_s24 + $0x710] sm:$0xff]  ;;  %v605_v41 = vld [vmem:[%s4409_s24 + $0x6f8] sm:$0xff]  ;;  %v610_v36 = vld [vmem:[%s4409_s24 + $0x720] sm:$0xff]  ;;  %v1688_v45 = vadd.f32 %v1687_v34, %v595_v8  ;;  %v1729_v50 = vadd.f32 %v1728_v35, %v589_v4  ;;  %v1585_v52 = vadd.f32 %v1584_v38, %v606_v33  ;;  %v1606_v55 = vadd.f32 %v1605_v40, %v607_v30 }
  0xc3   : > { %v609_v37 = vld [vmem:[%s4409_s24 + $0x718] sm:$0xff]  ;;  %v611_v39 = vld [vmem:[%s4409_s24 + $0x728] sm:$0xff]  ;;  %v612_v44 = vld [vmem:[%s4409_s24 + $0x730] sm:$0xff]  ;;  %v1626_v54 = vadd.f32 %v1625_v42, %v600_v16  ;;  %v1709_v59 = vadd.f32 %v1708_v43, %v596_v14  ;;  %v1647_v7 = vadd.f32 %v1646_v48, %v601_v23  ;;  %v1668_v6 = vadd.f32 %v1667_v47, %v602_v22 }
  0xc4   : > { %v614_v49 = vld [vmem:[%s4409_s24 + $0x740] sm:$0xff]  ;;  %v615_v46 = vld [vmem:[%s4409_s24 + $0x748] sm:$0xff]  ;;  %v613_v51 = vld [vmem:[%s4409_s24 + $0x738] sm:$0xff]  ;;  %v1689_v8 = vadd.f32 %v1688_v45, %v603_v1  ;;  %v1730_v4 = vadd.f32 %v1729_v50, %v597_v25 }
  0xc5   : > { %v616_v60 = vld [vmem:[%s4409_s24 + $0x750] sm:$0xff]  ;;  %v617_v53 = vld [vmem:[%s4409_s24 + $0x758] sm:$0xff]  ;;  %v618_v61 = vld [vmem:[%s4409_s24 + $0x760] sm:$0xff]  ;;  %v1586_v19 = vadd.f32 %v1585_v52, %v614_v49  ;;  %v1607_v15 = vadd.f32 %v1606_v55, %v615_v46  ;;  %v1627_v16 = vadd.f32 %v1626_v54, %v608_v32  ;;  %v1710_v14 = vadd.f32 %v1709_v59, %v604_v28 }
  0xc6   : > { %v622_v62 = vld [vmem:[%s4409_s24 + $0x780] sm:$0xff]  ;;  %v623_v63 = vld [vmem:[%s4409_s24 + $0x788] sm:$0xff]  ;;  %v620_v11 = vld [vmem:[%s4409_s24 + $0x770] sm:$0xff]  ;;  %v1648_v21 = vadd.f32 %v1647_v7, %v609_v37  ;;  %v1669_v23 = vadd.f32 %v1668_v6, %v610_v36  ;;  %v1690_v22 = vadd.f32 %v1689_v8, %v611_v39  ;;  %v1731_v25 = vadd.f32 %v1730_v4, %v605_v41 }
  0xc7   : > { %v619_v9 = vld [vmem:[%s4409_s24 + $0x768] sm:$0xff]  ;;  %v621_v12 = vld [vmem:[%s4409_s24 + $0x778] sm:$0xff]  ;;  %v624_v13 = vld [vmem:[%s4409_s24 + $0x790] sm:$0xff]  ;;  %v1587_v26 = vadd.f32 %v1586_v19, %v622_v62  ;;  %v1608_v27 = vadd.f32 %v1607_v15, %v623_v63  ;;  %v1628_v33 = vadd.f32 %v1627_v16, %v616_v60  ;;  %v1711_v28 = vadd.f32 %v1710_v14, %v612_v44 }
  0xc8   : > { %v630_v17 = vld [vmem:[%s4409_s24 + $0x7c0] sm:$0xff]  ;;  %v631_v20 = vld [vmem:[%s4409_s24 + $0x7c8] sm:$0xff]  ;;  %v625_v1 = vld [vmem:[%s4409_s24 + $0x798] sm:$0xff]  ;;  %v1649_v31 = vadd.f32 %v1648_v21, %v617_v53  ;;  %v1670_v34 = vadd.f32 %v1669_v23, %v618_v61  ;;  %v1691_v35 = vadd.f32 %v1690_v22, %v619_v9  ;;  %v1732_v37 = vadd.f32 %v1731_v25, %v613_v51 }
  0xc9   : > { %v626_v24 = vld [vmem:[%s4409_s24 + $0x7a0] sm:$0xff]  ;;  %v627_v5 = vld [vmem:[%s4409_s24 + $0x7a8] sm:$0xff]  ;;  %v628_v30 = vld [vmem:[%s4409_s24 + $0x7b0] sm:$0xff]  ;;  %v1588_v38 = vadd.f32 %v1587_v26, %v630_v17  ;;  %v1609_v40 = vadd.f32 %v1608_v27, %v631_v20  ;;  %v1629_v42 = vadd.f32 %v1628_v33, %v624_v13  ;;  %v1712_v43 = vadd.f32 %v1711_v28, %v620_v11 }
  0xca   : > { %v629_v32 = vld [vmem:[%s4409_s24 + $0x7b8] sm:$0xff]  ;;  %v632_v29 = vld [vmem:[%s4409_s24 + $0x7d0] sm:$0xff]  ;;  %v634_v41 = vld [vmem:[%s4409_s24 + $0x7e0] sm:$0xff]  ;;  %v1650_v46 = vadd.f32 %v1649_v31, %v625_v1  ;;  %v1671_v48 = vadd.f32 %v1670_v34, %v626_v24  ;;  %v1692_v47 = vadd.f32 %v1691_v35, %v627_v5  ;;  %v1733_v44 = vadd.f32 %v1732_v37, %v621_v12 }
  0xcb   : > { %v633_v36 = vld [vmem:[%s4409_s24 + $0x7d8] sm:$0xff]  ;;  %v635_v39 = vld [vmem:[%s4409_s24 + $0x7e8] sm:$0xff]  ;;  %v636_v49 = vld [vmem:[%s4409_s24 + $0x7f0] sm:$0xff]  ;;  %v1589_v50 = vrot.slane %v1588_v38, 4  ;;  %v1610_v60 = vrot.slane %v1609_v40, 4  ;;  %v1630_v53 = vadd.f32 %v1629_v42, %v632_v29  ;;  %v1713_v52 = vadd.f32 %v1712_v43, %v628_v30 }
  0xcc   : > { %v637_v45 = vld [vmem:[%s4409_s24 + $0x7f8] sm:$0xff]  ;;  %v1651_v55 = vadd.f32 %v1650_v46, %v633_v36  ;;  %v1672_v54 = vadd.f32 %v1671_v48, %v634_v41  ;;  %v1693_v51 = vadd.f32 %v1692_v47, %v635_v39  ;;  %v1734_v59 = vadd.f32 %v1733_v44, %v629_v32  ;;  %v638_v26 = vld [vmem:[%s4409_s24 + $0x800] sm:$0xff]  ;;  %v639_v27 = vld [vmem:[%s4409_s24 + $0x808] sm:$0xff] }
  0xcd   : > { %v1590_v61 = vadd.f32 %v1589_v50, %v1588_v38  ;;  %v1611_v62 = vadd.f32 %v1610_v60, %v1609_v40  ;;  %v1631_v63 = vrot.slane %v1630_v53, 4  ;;  %v1714_v7 = vadd.f32 %v1713_v52, %v636_v49  ;;  %v640_v29 = vld [vmem:[%s4409_s24 + $0x810] sm:$0xff]  ;;  %v646_v31 = vld [vmem:[%s4409_s24 + $0x840] sm:$0xff]  ;;  %v647_v34 = vld [vmem:[%s4409_s24 + $0x848] sm:$0xff] }
  0xce   : > { %v1652_v6 = vrot.slane %v1651_v55, 4  ;;  %v1673_v8 = vrot.slane %v1672_v54, 4  ;;  %v1694_v4 = vrot.slane %v1693_v51, 4  ;;  %v1735_v9 = vadd.f32 %v1734_v59, %v637_v45  ;;  %v648_v35 = vld [vmem:[%s4409_s24 + $0x850] sm:$0xff]  ;;  %v641_v38 = vld [vmem:[%s4409_s24 + $0x818] sm:$0xff]  ;;  %v642_v40 = vld [vmem:[%s4409_s24 + $0x820] sm:$0xff] }
  0xcf   : > { %v1591_v11 = vrot.slane %v1590_v61, 2  ;;  %v1612_v12 = vrot.slane %v1611_v62, 2  ;;  %v1632_v19 = vadd.f32 %v1631_v63, %v1630_v53  ;;  %v1715_v15 = vrot.slane %v1714_v7, 4  ;;  %v643_v42 = vld [vmem:[%s4409_s24 + $0x828] sm:$0xff]  ;;  %v649_v43 = vld [vmem:[%s4409_s24 + $0x858] sm:$0xff]  ;;  %v650_v49 = vld [vmem:[%s4409_s24 + $0x860] sm:$0xff] }
  0xd0   : > { %v1653_v16 = vadd.f32 %v1652_v6, %v1651_v55  ;;  %v1674_v14 = vadd.f32 %v1673_v8, %v1672_v54  ;;  %v1695_v13 = vadd.f32 %v1694_v4, %v1693_v51  ;;  %v1736_v17 = vrot.slane %v1735_v9, 4  ;;  %v651_v46 = vld [vmem:[%s4409_s24 + $0x868] sm:$0xff]  ;;  %v644_v50 = vld [vmem:[%s4409_s24 + $0x830] sm:$0xff]  ;;  %v654_v53 = vld [vmem:[%s4409_s24 + $0x880] sm:$0xff] }
  0xd1   : > { %v1592_v20 = vadd.f32 %v1591_v11, %v1590_v61  ;;  %v1613_v21 = vadd.f32 %v1612_v12, %v1611_v62  ;;  %v1633_v23 = vrot.slane %v1632_v19, 2  ;;  %v1716_v22 = vadd.f32 %v1715_v15, %v1714_v7  ;;  %v652_v60 = vld [vmem:[%s4409_s24 + $0x870] sm:$0xff]  ;;  %v655_v52 = vld [vmem:[%s4409_s24 + $0x888] sm:$0xff]  ;;  %v645_v62 = vld [vmem:[%s4409_s24 + $0x838] sm:$0xff] }
  0xd2   : > { %v1654_v25 = vrot.slane %v1653_v16, 2  ;;  %v1675_v1 = vrot.slane %v1674_v14, 2  ;;  %v1696_v24 = vrot.slane %v1695_v13, 2  ;;  %v1737_v5 = vadd.f32 %v1736_v17, %v1735_v9  ;;  %v656_v55 = vld [vmem:[%s4409_s24 + $0x890] sm:$0xff]  ;;  %v653_v63 = vld [vmem:[%s4409_s24 + $0x878] sm:$0xff]  ;;  %v658_v6 = vld [vmem:[%s4409_s24 + $0x8a0] sm:$0xff] }
  0xd3   : > { %v1593_v33 = vrot.slane %v1592_v20, 1  ;;  %v1614_v28 = vrot.slane %v1613_v21, 1  ;;  %v1634_v30 = vadd.f32 %v1633_v23, %v1632_v19  ;;  %v1717_v32 = vrot.slane %v1716_v22, 2  ;;  %v657_v7 = vld [vmem:[%s4409_s24 + $0x898] sm:$0xff]  ;;  %v659_v8 = vld [vmem:[%s4409_s24 + $0x8a8] sm:$0xff]  ;;  %v660_v19 = vld [vmem:[%s4409_s24 + $0x8b0] sm:$0xff] }
  0xd4   : > { %v1655_v37 = vadd.f32 %v1654_v25, %v1653_v16  ;;  %v1676_v36 = vadd.f32 %v1675_v1, %v1674_v14  ;;  %v1697_v41 = vadd.f32 %v1696_v24, %v1695_v13  ;;  %v1738_v39 = vrot.slane %v1737_v5, 2  ;;  %v662_v15 = vld [vmem:[%s4409_s24 + $0x8c0] sm:$0xff]  ;;  %v663_v16 = vld [vmem:[%s4409_s24 + $0x8c8] sm:$0xff]  ;;  %v664_v14 = vld [vmem:[%s4409_s24 + $0x8d0] sm:$0xff] }
  0xd5   : > { %v4710_v48 = vadd.f32 %v1593_v33, %v1592_v20  ;;  %v4712_v47 = vadd.f32 %v1614_v28, %v1613_v21  ;;  %v1635_v44 = vrot.slane %v1634_v30, 1  ;;  %v1718_v45 = vadd.f32 %v1717_v32, %v1716_v22  ;;  %v661_v23 = vld [vmem:[%s4409_s24 + $0x8b8] sm:$0xff]  ;;  %v666_v25 = vld [vmem:[%s4409_s24 + $0x8e0] sm:$0xff]  ;;  %v667_v1 = vld [vmem:[%s4409_s24 + $0x8e8] sm:$0xff] }
  0xd6   : > { %v1656_v54 = vrot.slane %v1655_v37, 1  ;;  %v1677_v51 = vrot.slane %v1676_v36, 1  ;;  %v1698_v59 = vrot.slane %v1697_v41, 1  ;;  %v1739_v61 = vadd.f32 %v1738_v39, %v1737_v5  ;;  %v665_v22 = vld [vmem:[%s4409_s24 + $0x8d8] sm:$0xff]  ;;  %v668_v33 = vld [vmem:[%s4409_s24 + $0x8f0] sm:$0xff]  ;;  %v670_v28 = vld [vmem:[%s4409_s24 + $0x900] sm:$0xff] }
  0xd7   : > { %v4724_v4 = vadd.f32 %v1635_v44, %v1634_v30  ;;  %v1719_v9 = vrot.slane %v1718_v45, 1  ;;  %v1742_v11 = vadd.f32 %v646_v31, %v638_v26  ;;  %v1763_v12 = vadd.f32 %v647_v34, %v639_v27  ;;  %v671_v30 = vld [vmem:[%s4409_s24 + $0x908] sm:$0xff]  ;;  %v672_v32 = vld [vmem:[%s4409_s24 + $0x910] sm:$0xff]  ;;  %v673_v39 = vld [vmem:[%s4409_s24 + $0x918] sm:$0xff] }
  0xd8   : > { %v4730_v13 = vadd.f32 %v1656_v54, %v1655_v37  ;;  %v4732_v17 = vadd.f32 %v1677_v51, %v1676_v36  ;;  %v4734_v20 = vadd.f32 %v1698_v59, %v1697_v41  ;;  %v1740_v21 = vrot.slane %v1739_v61, 1  ;;  %v669_v41 = vld [vmem:[%s4409_s24 + $0x8f8] sm:$0xff]  ;;  %v674_v44 = vld [vmem:[%s4409_s24 + $0x920] sm:$0xff]  ;;  %v676_v54 = vld [vmem:[%s4409_s24 + $0x930] sm:$0xff] }
  0xd9   : > { %v4740_v24 = vadd.f32 %v1719_v9, %v1718_v45  ;;  %v1743_v5 = vadd.f32 %v1742_v11, %v654_v53  ;;  %v1764_v26 = vadd.f32 %v1763_v12, %v655_v52  ;;  %v1784_v27 = vadd.f32 %v648_v35, %v640_v29  ;;  %v675_v29 = vld [vmem:[%s4409_s24 + $0x928] sm:$0xff]  ;;  %v678_v51 = vld [vmem:[%s4409_s24 + $0x940] sm:$0xff] }
  0xda   : > { %6167 = vst [vmem:[#allocation21_spill] sm:$0xff] %v4732_v17  ;;  %6168 = vst [vmem:[#allocation22_spill] sm:$0xff] %v4734_v20  ;;  %v4746_v31 = vadd.f32 %v1740_v21, %v1739_v61  ;;  %v1805_v34 = vadd.f32 %v649_v43, %v641_v38  ;;  %v1826_v37 = vadd.f32 %v650_v49, %v642_v40  ;;  %v679_v59 = vld [vmem:[%s4409_s24 + $0x948] sm:$0xff]  ;;  %v680_v38 = vld [vmem:[%s4409_s24 + $0x950] sm:$0xff] }
  0xdb   : > { %6169 = vst [vmem:[#allocation23_spill] sm:$0xff] %v4740_v24  ;;  %v1847_v36 = vadd.f32 %v651_v46, %v643_v42  ;;  %v1744_v35 = vadd.f32 %v1743_v5, %v662_v15  ;;  %v1765_v45 = vadd.f32 %v1764_v26, %v663_v16  ;;  %v1785_v53 = vadd.f32 %v1784_v27, %v656_v55  ;;  %v677_v46 = vld [vmem:[%s4409_s24 + $0x938] sm:$0xff]  ;;  %v682_v9 = vld [vmem:[%s4409_s24 + $0x960] sm:$0xff]  ;;  %v683_v55 = vld [vmem:[%s4409_s24 + $0x968] sm:$0xff] }
  0xdc   : > { %6170 = vst [vmem:[#allocation24_spill] sm:$0xff] %v4746_v31  ;;  %v1868_v52 = vadd.f32 %v652_v60, %v644_v50  ;;  %v1806_v40 = vadd.f32 %v1805_v34, %v657_v7  ;;  %v1827_v42 = vadd.f32 %v1826_v37, %v658_v6  ;;  %v1889_v49 = vadd.f32 %v653_v63, %v645_v62  ;;  %v681_v61 = vld [vmem:[%s4409_s24 + $0x958] sm:$0xff]  ;;  %v684_v15 = vld [vmem:[%s4409_s24 + $0x970] sm:$0xff]  ;;  %v686_v16 = vld [vmem:[%s4409_s24 + $0x980] sm:$0xff] }
  0xdd   : > { %v1848_v43 = vadd.f32 %v1847_v36, %v659_v8  ;;  %v1745_v50 = vadd.f32 %v1744_v35, %v670_v28  ;;  %v1766_v60 = vadd.f32 %v1765_v45, %v671_v30  ;;  %v1786_v11 = vadd.f32 %v1785_v53, %v664_v14  ;;  %v687_v7 = vld [vmem:[%s4409_s24 + $0x988] sm:$0xff]  ;;  %v688_v6 = vld [vmem:[%s4409_s24 + $0x990] sm:$0xff]  ;;  %v685_v5 = vld [vmem:[%s4409_s24 + $0x978] sm:$0xff] }
  0xde   : > { %v1869_v12 = vadd.f32 %v1868_v52, %v660_v19  ;;  %v1807_v62 = vadd.f32 %v1806_v40, %v665_v22  ;;  %v1828_v63 = vadd.f32 %v1827_v42, %v666_v25  ;;  %v1890_v21 = vadd.f32 %v1889_v49, %v661_v23  ;;  %v689_v26 = vld [vmem:[%s4409_s24 + $0x998] sm:$0xff]  ;;  %v690_v27 = vld [vmem:[%s4409_s24 + $0x9a0] sm:$0xff]  ;;  %v691_v14 = vld [vmem:[%s4409_s24 + $0x9a8] sm:$0xff] }
  0xdf   : > { %v1849_v8 = vadd.f32 %v1848_v43, %v667_v1  ;;  %v1746_v19 = vadd.f32 %v1745_v50, %v678_v51  ;;  %v1767_v28 = vadd.f32 %v1766_v60, %v679_v59  ;;  %v1787_v30 = vadd.f32 %v1786_v11, %v672_v32  ;;  %v692_v37 = vld [vmem:[%s4409_s24 + $0x9b0] sm:$0xff]  ;;  %v694_v36 = vld [vmem:[%s4409_s24 + $0x9c0] sm:$0xff]  ;;  %v695_v22 = vld [vmem:[%s4409_s24 + $0x9c8] sm:$0xff] }
  0xe0   : > { %v1870_v34 = vadd.f32 %v1869_v12, %v668_v33  ;;  %v696_v25 = vld [vmem:[%s4409_s24 + $0x9d0] sm:$0xff]  ;;  %v1808_v23 = vadd.f32 %v1807_v62, %v673_v39  ;;  %v1829_v1 = vadd.f32 %v1828_v63, %v674_v44  ;;  %v1891_v45 = vadd.f32 %v1890_v21, %v669_v41  ;;  %v693_v53 = vld [vmem:[%s4409_s24 + $0x9b8] sm:$0xff]  ;;  %v698_v51 = vld [vmem:[%s4409_s24 + $0x9e0] sm:$0xff] }
  0xe1   : > { %v1850_v35 = vadd.f32 %v1849_v8, %v675_v29  ;;  %v697_v52 = vld [vmem:[%s4409_s24 + $0x9d8] sm:$0xff]  ;;  %v699_v32 = vld [vmem:[%s4409_s24 + $0x9e8] sm:$0xff]  ;;  %v1747_v33 = vadd.f32 %v1746_v19, %v686_v16  ;;  %v1768_v59 = vadd.f32 %v1767_v28, %v687_v7  ;;  %v1788_v40 = vadd.f32 %v1787_v30, %v680_v38  ;;  %v700_v43 = vld [vmem:[%s4409_s24 + $0x9f0] sm:$0xff] }
  0xe2   : > { %v1871_v42 = vadd.f32 %v1870_v34, %v676_v54  ;;  %v702_v49 = vld [vmem:[%s4409_s24 + $0xa00] sm:$0xff]  ;;  %v703_v39 = vld [vmem:[%s4409_s24 + $0xa08] sm:$0xff]  ;;  %v704_v44 = vld [vmem:[%s4409_s24 + $0xa10] sm:$0xff]  ;;  %v1809_v41 = vadd.f32 %v1808_v23, %v681_v61  ;;  %v1830_v29 = vadd.f32 %v1829_v1, %v682_v9  ;;  %v1892_v60 = vadd.f32 %v1891_v45, %v677_v46 }
  0xe3   : > { %v1851_v50 = vadd.f32 %v1850_v35, %v683_v55  ;;  %v701_v11 = vld [vmem:[%s4409_s24 + $0x9f8] sm:$0xff]  ;;  %v706_v16 = vld [vmem:[%s4409_s24 + $0xa20] sm:$0xff]  ;;  %v707_v38 = vld [vmem:[%s4409_s24 + $0xa28] sm:$0xff]  ;;  %v1748_v54 = vadd.f32 %v1747_v33, %v694_v36  ;;  %v1769_v7 = vadd.f32 %v1768_v59, %v695_v22  ;;  %v1789_v62 = vadd.f32 %v1788_v40, %v688_v6 }
  0xe4   : > { %v705_v12 = vld [vmem:[%s4409_s24 + $0xa18] sm:$0xff]  ;;  %v1872_v63 = vadd.f32 %v1871_v42, %v684_v15  ;;  %v708_v8 = vld [vmem:[%s4409_s24 + $0xa30] sm:$0xff]  ;;  %v710_v21 = vld [vmem:[%s4409_s24 + $0xa40] sm:$0xff]  ;;  %v1810_v46 = vadd.f32 %v1809_v41, %v689_v26  ;;  %v1831_v55 = vadd.f32 %v1830_v29, %v690_v27  ;;  %v1893_v28 = vadd.f32 %v1892_v60, %v685_v5 }
  0xe5   : > { %v711_v61 = vld [vmem:[%s4409_s24 + $0xa48] sm:$0xff]  ;;  %v712_v9 = vld [vmem:[%s4409_s24 + $0xa50] sm:$0xff]  ;;  %v1852_v19 = vadd.f32 %v1851_v50, %v691_v14  ;;  %v709_v30 = vld [vmem:[%s4409_s24 + $0xa38] sm:$0xff]  ;;  %v1749_v15 = vadd.f32 %v1748_v54, %v702_v49  ;;  %v1770_v22 = vadd.f32 %v1769_v7, %v703_v39  ;;  %v1790_v23 = vadd.f32 %v1789_v62, %v696_v25 }
  0xe6   : > { %v713_v34 = vld [vmem:[%s4409_s24 + $0xa58] sm:$0xff]  ;;  %v714_v36 = vld [vmem:[%s4409_s24 + $0xa60] sm:$0xff]  ;;  %v715_v6 = vld [vmem:[%s4409_s24 + $0xa68] sm:$0xff]  ;;  %v1873_v1 = vadd.f32 %v1872_v63, %v692_v37  ;;  %v1811_v5 = vadd.f32 %v1810_v46, %v697_v52  ;;  %v1832_v14 = vadd.f32 %v1831_v55, %v698_v51  ;;  %v1894_v59 = vadd.f32 %v1893_v28, %v693_v53 }
  0xe7   : > { %v716_v35 = vld [vmem:[%s4409_s24 + $0xa70] sm:$0xff]  ;;  %v718_v45 = vld [vmem:[%s4409_s24 + $0xa80] sm:$0xff]  ;;  %v719_v26 = vld [vmem:[%s4409_s24 + $0xa88] sm:$0xff]  ;;  %v1853_v33 = vadd.f32 %v1852_v19, %v699_v32  ;;  %v1750_v37 = vadd.f32 %v1749_v15, %v710_v21  ;;  %v1771_v39 = vadd.f32 %v1770_v22, %v711_v61  ;;  %v1791_v41 = vadd.f32 %v1790_v23, %v704_v44 }
  0xe8   : > { %v720_v27 = vld [vmem:[%s4409_s24 + $0xa90] sm:$0xff]  ;;  %v717_v40 = vld [vmem:[%s4409_s24 + $0xa78] sm:$0xff]  ;;  %v722_v49 = vld [vmem:[%s4409_s24 + $0xaa0] sm:$0xff]  ;;  %v1874_v29 = vadd.f32 %v1873_v1, %v700_v43  ;;  %v1812_v53 = vadd.f32 %v1811_v5, %v705_v12  ;;  %v1833_v32 = vadd.f32 %v1832_v14, %v706_v16  ;;  %v1895_v7 = vadd.f32 %v1894_v59, %v701_v11 }
  0xe9   : > { %v721_v42 = vld [vmem:[%s4409_s24 + $0xa98] sm:$0xff]  ;;  %v723_v25 = vld [vmem:[%s4409_s24 + $0xaa8] sm:$0xff]  ;;  %v724_v50 = vld [vmem:[%s4409_s24 + $0xab0] sm:$0xff]  ;;  %v1854_v54 = vadd.f32 %v1853_v33, %v707_v38  ;;  %v1751_v43 = vadd.f32 %v1750_v37, %v718_v45  ;;  %v1772_v61 = vadd.f32 %v1771_v39, %v719_v26  ;;  %v1792_v46 = vadd.f32 %v1791_v41, %v712_v9 }
  0xea   : > { %v726_v60 = vld [vmem:[%s4409_s24 + $0xac0] sm:$0xff]  ;;  %v727_v52 = vld [vmem:[%s4409_s24 + $0xac8] sm:$0xff]  ;;  %v728_v51 = vld [vmem:[%s4409_s24 + $0xad0] sm:$0xff]  ;;  %v1875_v55 = vadd.f32 %v1874_v29, %v708_v8  ;;  %v1813_v11 = vadd.f32 %v1812_v53, %v713_v34  ;;  %v1834_v38 = vadd.f32 %v1833_v32, %v714_v36  ;;  %v1896_v22 = vadd.f32 %v1895_v7, %v709_v30 }
  0xeb   : > { %v725_v62 = vld [vmem:[%s4409_s24 + $0xab8] sm:$0xff]  ;;  %v730_v21 = vld [vmem:[%s4409_s24 + $0xae0] sm:$0xff]  ;;  %v731_v44 = vld [vmem:[%s4409_s24 + $0xae8] sm:$0xff]  ;;  %v1855_v15 = vadd.f32 %v1854_v54, %v715_v6  ;;  %v1752_v9 = vadd.f32 %v1751_v43, %v726_v60  ;;  %v1773_v8 = vadd.f32 %v1772_v61, %v727_v52  ;;  %v1793_v5 = vadd.f32 %v1792_v46, %v720_v27 }
  0xec   : > { %v729_v63 = vld [vmem:[%s4409_s24 + $0xad8] sm:$0xff]  ;;  %v732_v19 = vld [vmem:[%s4409_s24 + $0xaf0] sm:$0xff]  ;;  %v734_v28 = vld [vmem:[%s4409_s24 + $0xb00] sm:$0xff]  ;;  %v1876_v14 = vadd.f32 %v1875_v55, %v716_v35  ;;  %v1814_v36 = vadd.f32 %v1813_v11, %v721_v42  ;;  %v1835_v6 = vadd.f32 %v1834_v38, %v722_v49  ;;  %v1897_v37 = vadd.f32 %v1896_v22, %v717_v40 }
  0xed   : > { %v735_v12 = vld [vmem:[%s4409_s24 + $0xb08] sm:$0xff]  ;;  %v736_v16 = vld [vmem:[%s4409_s24 + $0xb10] sm:$0xff]  ;;  %v733_v23 = vld [vmem:[%s4409_s24 + $0xaf8] sm:$0xff]  ;;  %v1856_v30 = vadd.f32 %v1855_v15, %v723_v25  ;;  %v1753_v60 = vadd.f32 %v1752_v9, %v734_v28  ;;  %v1794_v27 = vadd.f32 %v1793_v5, %v728_v51 }
  0xee   : > { %v737_v1 = vld [vmem:[%s4409_s24 + $0xb18] sm:$0xff]  ;;  %v738_v45 = vld [vmem:[%s4409_s24 + $0xb20] sm:$0xff]  ;;  %v739_v26 = vld [vmem:[%s4409_s24 + $0xb28] sm:$0xff]  ;;  %v1774_v52 = vadd.f32 %v1773_v8, %v735_v12  ;;  %v1877_v35 = vadd.f32 %v1876_v14, %v724_v50  ;;  %v1815_v42 = vadd.f32 %v1814_v36, %v729_v63  ;;  %v1836_v49 = vadd.f32 %v1835_v6, %v730_v21 }
  0xef   : > { %v740_v33 = vld [vmem:[%s4409_s24 + $0xb30] sm:$0xff]  ;;  %v742_v59 = vld [vmem:[%s4409_s24 + $0xb40] sm:$0xff]  ;;  %v743_v34 = vld [vmem:[%s4409_s24 + $0xb48] sm:$0xff]  ;;  %v1857_v25 = vadd.f32 %v1856_v30, %v731_v44  ;;  %v1898_v40 = vadd.f32 %v1897_v37, %v725_v62  ;;  %v1795_v51 = vadd.f32 %v1794_v27, %v736_v16 }
  0xf0   : > { %v741_v39 = vld [vmem:[%s4409_s24 + $0xb38] sm:$0xff]  ;;  %v744_v41 = vld [vmem:[%s4409_s24 + $0xb50] sm:$0xff]  ;;  %v746_v53 = vld [vmem:[%s4409_s24 + $0xb60] sm:$0xff]  ;;  %v1754_v46 = vadd.f32 %v1753_v60, %v742_v59  ;;  %v1775_v55 = vadd.f32 %v1774_v52, %v743_v34  ;;  %v1878_v50 = vadd.f32 %v1877_v35, %v732_v19  ;;  %v1816_v63 = vadd.f32 %v1815_v42, %v737_v1 }
  0xf1   : > { %v745_v29 = vld [vmem:[%s4409_s24 + $0xb58] sm:$0xff]  ;;  %v750_v32 = vld [vmem:[%s4409_s24 + $0xb80] sm:$0xff]  ;;  %v751_v54 = vld [vmem:[%s4409_s24 + $0xb88] sm:$0xff]  ;;  %v1837_v21 = vadd.f32 %v1836_v49, %v738_v45  ;;  %v1858_v44 = vadd.f32 %v1857_v25, %v739_v26  ;;  %v1899_v62 = vadd.f32 %v1898_v40, %v733_v23  ;;  %v1796_v16 = vadd.f32 %v1795_v51, %v744_v41 }
  0xf2   : > { %v747_v7 = vld [vmem:[%s4409_s24 + $0xb68] sm:$0xff]  ;;  %v748_v43 = vld [vmem:[%s4409_s24 + $0xb70] sm:$0xff]  ;;  %v749_v61 = vld [vmem:[%s4409_s24 + $0xb78] sm:$0xff]  ;;  %v1755_v9 = vadd.f32 %v1754_v46, %v750_v32  ;;  %v1776_v8 = vadd.f32 %v1775_v55, %v751_v54  ;;  %v1879_v19 = vadd.f32 %v1878_v50, %v740_v33  ;;  %v1817_v34 = vadd.f32 %v1816_v63, %v745_v29 }
  0xf3   : > { %v752_v28 = vld [vmem:[%s4409_s24 + $0xb90] sm:$0xff]  ;;  %v758_v12 = vld [vmem:[%s4409_s24 + $0xbc0] sm:$0xff]  ;;  %v759_v11 = vld [vmem:[%s4409_s24 + $0xbc8] sm:$0xff]  ;;  %v1838_v1 = vadd.f32 %v1837_v21, %v746_v53  ;;  %v1859_v45 = vadd.f32 %v1858_v44, %v747_v7  ;;  %v1900_v26 = vadd.f32 %v1899_v62, %v741_v39 }
  0xf4   : > { %v753_v38 = vld [vmem:[%s4409_s24 + $0xb98] sm:$0xff]  ;;  %v754_v15 = vld [vmem:[%s4409_s24 + $0xba0] sm:$0xff]  ;;  %v755_v22 = vld [vmem:[%s4409_s24 + $0xba8] sm:$0xff]  ;;  %v1756_v30 = vadd.f32 %v1755_v9, %v758_v12  ;;  %v1777_v37 = vadd.f32 %v1776_v8, %v759_v11  ;;  %v1797_v60 = vadd.f32 %v1796_v16, %v752_v28  ;;  %v1880_v52 = vadd.f32 %v1879_v19, %v748_v43 }
  0xf5   : > { %v756_v5 = vld [vmem:[%s4409_s24 + $0xbb0] sm:$0xff]  ;;  %v757_v14 = vld [vmem:[%s4409_s24 + $0xbb8] sm:$0xff]  ;;  %v762_v23 = vld [vmem:[%s4409_s24 + $0xbe0] sm:$0xff]  ;;  %v1818_v35 = vadd.f32 %v1817_v34, %v753_v38  ;;  %v1839_v41 = vadd.f32 %v1838_v1, %v754_v15  ;;  %v1860_v32 = vadd.f32 %v1859_v45, %v755_v22  ;;  %v1901_v33 = vadd.f32 %v1900_v26, %v749_v61 }
  0xf6   : > { %v760_v59 = vld [vmem:[%s4409_s24 + $0xbd0] sm:$0xff]  ;;  %v761_v36 = vld [vmem:[%s4409_s24 + $0xbd8] sm:$0xff]  ;;  %v763_v6 = vld [vmem:[%s4409_s24 + $0xbe8] sm:$0xff]  ;;  %v1757_v42 = vrot.slane %v1756_v30, 4  ;;  %v1778_v49 = vrot.slane %v1777_v37, 4  ;;  %v1881_v25 = vadd.f32 %v1880_v52, %v756_v5 }
  0xf7   : > { %v764_v27 = vld [vmem:[%s4409_s24 + $0xbf0] sm:$0xff]  ;;  %v765_v54 = vld [vmem:[%s4409_s24 + $0xbf8] sm:$0xff]  ;;  %v1798_v29 = vadd.f32 %v1797_v60, %v760_v59  ;;  %v1819_v53 = vadd.f32 %v1818_v35, %v761_v36  ;;  %v1840_v40 = vadd.f32 %v1839_v41, %v762_v23  ;;  %v1861_v39 = vadd.f32 %v1860_v32, %v763_v6  ;;  %v766_v1 = vld [vmem:[%s4409_s24 + $0xc00] sm:$0xff] }
  0xf8   : > { %v1902_v7 = vadd.f32 %v1901_v33, %v757_v14  ;;  %v1758_v46 = vadd.f32 %v1757_v42, %v1756_v30  ;;  %v1779_v55 = vadd.f32 %v1778_v49, %v1777_v37  ;;  %v1882_v50 = vadd.f32 %v1881_v25, %v764_v27  ;;  %v767_v45 = vld [vmem:[%s4409_s24 + $0xc08] sm:$0xff]  ;;  %v768_v30 = vld [vmem:[%s4409_s24 + $0xc10] sm:$0xff]  ;;  %v774_v37 = vld [vmem:[%s4409_s24 + $0xc40] sm:$0xff] }
  0xf9   : > { %v1799_v51 = vrot.slane %v1798_v29, 4  ;;  %v1820_v28 = vrot.slane %v1819_v53, 4  ;;  %v1841_v43 = vrot.slane %v1840_v40, 4  ;;  %v1862_v12 = vrot.slane %v1861_v39, 4  ;;  %v775_v60 = vld [vmem:[%s4409_s24 + $0xc48] sm:$0xff]  ;;  %v776_v52 = vld [vmem:[%s4409_s24 + $0xc50] sm:$0xff] }
  0xfa   : > { %v1903_v11 = vadd.f32 %v1902_v7, %v765_v54  ;;  %v1759_v63 = vrot.slane %v1758_v46, 2  ;;  %v1780_v61 = vrot.slane %v1779_v55, 2  ;;  %v1883_v44 = vrot.slane %v1882_v50, 4  ;;  %v769_v33 = vld [vmem:[%s4409_s24 + $0xc18] sm:$0xff]  ;;  %v770_v54 = vld [vmem:[%s4409_s24 + $0xc20] sm:$0xff]  ;;  %v771_v42 = vld [vmem:[%s4409_s24 + $0xc28] sm:$0xff] }
  0xfb   : > { %v1800_v21 = vadd.f32 %v1799_v51, %v1798_v29  ;;  %v1821_v62 = vadd.f32 %v1820_v28, %v1819_v53  ;;  %v1842_v38 = vadd.f32 %v1841_v43, %v1840_v40  ;;  %v1863_v15 = vadd.f32 %v1862_v12, %v1861_v39  ;;  %v777_v49 = vld [vmem:[%s4409_s24 + $0xc58] sm:$0xff]  ;;  %v778_v29 = vld [vmem:[%s4409_s24 + $0xc60] sm:$0xff]  ;;  %v779_v25 = vld [vmem:[%s4409_s24 + $0xc68] sm:$0xff] }
  0xfc   : > { %v1904_v22 = vrot.slane %v1903_v11, 4  ;;  %v1760_v9 = vadd.f32 %v1759_v63, %v1758_v46  ;;  %v1781_v8 = vadd.f32 %v1780_v61, %v1779_v55  ;;  %v1884_v19 = vadd.f32 %v1883_v44, %v1882_v50  ;;  %v772_v46 = vld [vmem:[%s4409_s24 + $0xc30] sm:$0xff]  ;;  %v782_v51 = vld [vmem:[%s4409_s24 + $0xc80] sm:$0xff]  ;;  %v783_v50 = vld [vmem:[%s4409_s24 + $0xc88] sm:$0xff] }
  0xfd   : > { %v1801_v16 = vrot.slane %v1800_v21, 2  ;;  %v1822_v5 = vrot.slane %v1821_v62, 2  ;;  %v1843_v14 = vrot.slane %v1842_v38, 2  ;;  %v1864_v59 = vrot.slane %v1863_v15, 2  ;;  %v780_v55 = vld [vmem:[%s4409_s24 + $0xc70] sm:$0xff]  ;;  %v773_v61 = vld [vmem:[%s4409_s24 + $0xc38] sm:$0xff] }
  0xfe   : > { %v1905_v34 = vadd.f32 %v1904_v22, %v1903_v11  ;;  %v1761_v26 = vrot.slane %v1760_v9, 1  ;;  %v1782_v36 = vrot.slane %v1781_v8, 1  ;;  %v1885_v6 = vrot.slane %v1884_v19, 2  ;;  %v784_v28 = vld [vmem:[%s4409_s24 + $0xc90] sm:$0xff]  ;;  %v785_v44 = vld [vmem:[%s4409_s24 + $0xc98] sm:$0xff] }
  0xff   : > { %v1802_v23 = vadd.f32 %v1801_v16, %v1800_v21  ;;  %v1823_v27 = vadd.f32 %v1822_v5, %v1821_v62  ;;  %v1844_v35 = vadd.f32 %v1843_v14, %v1842_v38  ;;  %v1865_v41 = vadd.f32 %v1864_v59, %v1863_v15  ;;  %v781_v21 = vld [vmem:[%s4409_s24 + $0xc78] sm:$0xff]  ;;  %v786_v62 = vld [vmem:[%s4409_s24 + $0xca0] sm:$0xff]  ;;  %v787_v38 = vld [vmem:[%s4409_s24 + $0xca8] sm:$0xff] }
 0x100   : > { %v1906_v32 = vrot.slane %v1905_v34, 2  ;;  %v4854_v53 = vadd.f32 %v1761_v26, %v1760_v9  ;;  %v4856_v40 = vadd.f32 %v1782_v36, %v1781_v8  ;;  %v1886_v7 = vadd.f32 %v1885_v6, %v1884_v19  ;;  %v788_v16 = vld [vmem:[%s4409_s24 + $0xcb0] sm:$0xff]  ;;  %v790_v19 = vld [vmem:[%s4409_s24 + $0xcc0] sm:$0xff]  ;;  %v791_v5 = vld [vmem:[%s4409_s24 + $0xcc8] sm:$0xff] }
 0x101   : > { %v1803_v39 = vrot.slane %v1802_v23, 1  ;;  %v1824_v43 = vrot.slane %v1823_v27, 1  ;;  %v1845_v12 = vrot.slane %v1844_v35, 1  ;;  %v1866_v11 = vrot.slane %v1865_v41, 1  ;;  %v792_v14 = vld [vmem:[%s4409_s24 + $0xcd0] sm:$0xff]  ;;  %v793_v6 = vld [vmem:[%s4409_s24 + $0xcd8] sm:$0xff] }
 0x102   : > { %v1907_v63 = vadd.f32 %v1906_v32, %v1905_v34  ;;  %v1887_v22 = vrot.slane %v1886_v7, 1  ;;  %v1910_v9 = vadd.f32 %v774_v37, %v766_v1  ;;  %v1931_v8 = vadd.f32 %v775_v60, %v767_v45  ;;  %v794_v1 = vld [vmem:[%s4409_s24 + $0xce0] sm:$0xff]  ;;  %v795_v45 = vld [vmem:[%s4409_s24 + $0xce8] sm:$0xff] }
 0x103   : > { %v4868_v15 = vadd.f32 %v1803_v39, %v1802_v23  ;;  %v4874_v59 = vadd.f32 %v1824_v43, %v1823_v27  ;;  %v4876_v34 = vadd.f32 %v1845_v12, %v1844_v35  ;;  %v4878_v26 = vadd.f32 %v1866_v11, %v1865_v41  ;;  %v789_v23 = vld [vmem:[%s4409_s24 + $0xcb8] sm:$0xff]  ;;  %v796_v27 = vld [vmem:[%s4409_s24 + $0xcf0] sm:$0xff]  ;;  %v798_v35 = vld [vmem:[%s4409_s24 + $0xd00] sm:$0xff] }
 0x104   : > { %v1908_v36 = vrot.slane %v1907_v63, 1  ;;  %v4884_v37 = vadd.f32 %v1887_v22, %v1886_v7  ;;  %v1911_v60 = vadd.f32 %v1910_v9, %v782_v51  ;;  %v1932_v32 = vadd.f32 %v1931_v8, %v783_v50  ;;  %v799_v41 = vld [vmem:[%s4409_s24 + $0xd08] sm:$0xff]  ;;  %v800_v43 = vld [vmem:[%s4409_s24 + $0xd10] sm:$0xff]  ;;  %v801_v7 = vld [vmem:[%s4409_s24 + $0xd18] sm:$0xff] }
 0x105   : > { %6171 = vst [vmem:[#allocation25_spill] sm:$0xff] %v4876_v34  ;;  %6172 = vst [vmem:[#allocation26_spill] sm:$0xff] %v4878_v26  ;;  %v1952_v39 = vadd.f32 %v776_v52, %v768_v30  ;;  %v1973_v11 = vadd.f32 %v777_v49, %v769_v33  ;;  %v1994_v31 = vadd.f32 %v778_v29, %v770_v54  ;;  %v797_v26 = vld [vmem:[%s4409_s24 + $0xcf8] sm:$0xff]  ;;  %v802_v51 = vld [vmem:[%s4409_s24 + $0xd20] sm:$0xff] }
 0x106   : > { %6173 = vst [vmem:[#allocation27_spill] sm:$0xff] %v4884_v37  ;;  %v4890_v12 = vadd.f32 %v1908_v36, %v1907_v63  ;;  %v2015_v18 = vadd.f32 %v779_v25, %v771_v42  ;;  %v803_v30 = vld [vmem:[%s4409_s24 + $0xd28] sm:$0xff]  ;;  %v1912_v52 = vadd.f32 %v1911_v60, %v790_v19  ;;  %v1933_v50 = vadd.f32 %v1932_v32, %v791_v5  ;;  %v804_v8 = vld [vmem:[%s4409_s24 + $0xd30] sm:$0xff]  ;;  %v806_v37 = vld [vmem:[%s4409_s24 + $0xd40] sm:$0xff] }
 0x107   : > { %v1953_v22 = vadd.f32 %v1952_v39, %v784_v28  ;;  %v2036_v9 = vadd.f32 %v780_v55, %v772_v46  ;;  %v807_v63 = vld [vmem:[%s4409_s24 + $0xd48] sm:$0xff]  ;;  %v808_v33 = vld [vmem:[%s4409_s24 + $0xd50] sm:$0xff]  ;;  %v1974_v54 = vadd.f32 %v1973_v11, %v785_v44  ;;  %v1995_v42 = vadd.f32 %v1994_v31, %v786_v62  ;;  %v805_v25 = vld [vmem:[%s4409_s24 + $0xd38] sm:$0xff] }
 0x108   : > { %6174 = vst [vmem:[#allocation28_spill] sm:$0xff] %v4890_v12  ;;  %v2016_v49 = vadd.f32 %v2015_v18, %v787_v38  ;;  %v2057_v29 = vadd.f32 %v781_v21, %v773_v61  ;;  %v809_v36 = vld [vmem:[%s4409_s24 + $0xd58] sm:$0xff]  ;;  %v810_v19 = vld [vmem:[%s4409_s24 + $0xd60] sm:$0xff]  ;;  %v811_v28 = vld [vmem:[%s4409_s24 + $0xd68] sm:$0xff]  ;;  %v1913_v46 = vadd.f32 %v1912_v52, %v798_v35  ;;  %v1934_v55 = vadd.f32 %v1933_v50, %v799_v41 }
 0x109   : > { %v1954_v5 = vadd.f32 %v1953_v22, %v792_v14  ;;  %v2037_v60 = vadd.f32 %v2036_v9, %v788_v16  ;;  %v812_v32 = vld [vmem:[%s4409_s24 + $0xd70] sm:$0xff]  ;;  %v814_v39 = vld [vmem:[%s4409_s24 + $0xd80] sm:$0xff]  ;;  %v815_v44 = vld [vmem:[%s4409_s24 + $0xd88] sm:$0xff]  ;;  %v1975_v31 = vadd.f32 %v1974_v54, %v793_v6  ;;  %v1996_v61 = vadd.f32 %v1995_v42, %v794_v1 }
 0x10a   : > { %v816_v18 = vld [vmem:[%s4409_s24 + $0xd90] sm:$0xff]  ;;  %v2017_v21 = vadd.f32 %v2016_v49, %v795_v45  ;;  %v2058_v62 = vadd.f32 %v2057_v29, %v789_v23  ;;  %v813_v38 = vld [vmem:[%s4409_s24 + $0xd78] sm:$0xff]  ;;  %v818_v35 = vld [vmem:[%s4409_s24 + $0xda0] sm:$0xff]  ;;  %v1914_v16 = vadd.f32 %v1913_v46, %v806_v37  ;;  %v1935_v41 = vadd.f32 %v1934_v55, %v807_v63 }
 0x10b   : > { %v817_v11 = vld [vmem:[%s4409_s24 + $0xd98] sm:$0xff]  ;;  %v819_v14 = vld [vmem:[%s4409_s24 + $0xda8] sm:$0xff]  ;;  %v1955_v52 = vadd.f32 %v1954_v5, %v800_v43  ;;  %v2038_v50 = vadd.f32 %v2037_v60, %v796_v27  ;;  %v820_v22 = vld [vmem:[%s4409_s24 + $0xdb0] sm:$0xff]  ;;  %v1976_v23 = vadd.f32 %v1975_v31, %v801_v7  ;;  %v1997_v45 = vadd.f32 %v1996_v61, %v802_v51 }
 0x10c   : > { %v822_v9 = vld [vmem:[%s4409_s24 + $0xdc0] sm:$0xff]  ;;  %v823_v6 = vld [vmem:[%s4409_s24 + $0xdc8] sm:$0xff]  ;;  %v824_v1 = vld [vmem:[%s4409_s24 + $0xdd0] sm:$0xff]  ;;  %v2018_v54 = vadd.f32 %v2017_v21, %v803_v30  ;;  %v2059_v42 = vadd.f32 %v2058_v62, %v797_v26  ;;  %v1915_v27 = vadd.f32 %v1914_v16, %v814_v39  ;;  %v1936_v63 = vadd.f32 %v1935_v41, %v815_v44 }
 0x10d   : > { %v821_v49 = vld [vmem:[%s4409_s24 + $0xdb8] sm:$0xff]  ;;  %v826_v37 = vld [vmem:[%s4409_s24 + $0xde0] sm:$0xff]  ;;  %v827_v43 = vld [vmem:[%s4409_s24 + $0xde8] sm:$0xff]  ;;  %v1956_v46 = vadd.f32 %v1955_v52, %v808_v33  ;;  %v2039_v55 = vadd.f32 %v2038_v50, %v804_v8  ;;  %v1977_v26 = vadd.f32 %v1976_v23, %v809_v36  ;;  %v1998_v30 = vadd.f32 %v1997_v45, %v810_v19 }
 0x10e   : > { %v825_v29 = vld [vmem:[%s4409_s24 + $0xdd8] sm:$0xff]  ;;  %v828_v5 = vld [vmem:[%s4409_s24 + $0xdf0] sm:$0xff]  ;;  %v830_v60 = vld [vmem:[%s4409_s24 + $0xe00] sm:$0xff]  ;;  %v2019_v31 = vadd.f32 %v2018_v54, %v811_v28  ;;  %v2060_v61 = vadd.f32 %v2059_v42, %v805_v25  ;;  %v1916_v8 = vadd.f32 %v1915_v27, %v822_v9  ;;  %v1937_v44 = vadd.f32 %v1936_v63, %v823_v6 }
 0x10f   : > { %v831_v7 = vld [vmem:[%s4409_s24 + $0xe08] sm:$0xff]  ;;  %v832_v51 = vld [vmem:[%s4409_s24 + $0xe10] sm:$0xff]  ;;  %v829_v21 = vld [vmem:[%s4409_s24 + $0xdf8] sm:$0xff]  ;;  %v1957_v16 = vadd.f32 %v1956_v46, %v816_v18  ;;  %v2040_v41 = vadd.f32 %v2039_v55, %v812_v32  ;;  %v1978_v25 = vadd.f32 %v1977_v26, %v817_v11  ;;  %v1999_v28 = vadd.f32 %v1998_v30, %v818_v35 }
 0x110   : > { %v833_v62 = vld [vmem:[%s4409_s24 + $0xe18] sm:$0xff]  ;;  %v834_v39 = vld [vmem:[%s4409_s24 + $0xe20] sm:$0xff]  ;;  %v835_v33 = vld [vmem:[%s4409_s24 + $0xe28] sm:$0xff]  ;;  %v2020_v23 = vadd.f32 %v2019_v31, %v819_v14  ;;  %v2061_v45 = vadd.f32 %v2060_v61, %v813_v38  ;;  %v1917_v32 = vadd.f32 %v1916_v8, %v830_v60  ;;  %v1938_v6 = vadd.f32 %v1937_v44, %v831_v7 }
 0x111   : > { %v836_v52 = vld [vmem:[%s4409_s24 + $0xe30] sm:$0xff]  ;;  %v838_v50 = vld [vmem:[%s4409_s24 + $0xe40] sm:$0xff]  ;;  %v839_v36 = vld [vmem:[%s4409_s24 + $0xe48] sm:$0xff]  ;;  %v1958_v27 = vadd.f32 %v1957_v16, %v824_v1  ;;  %v2041_v63 = vadd.f32 %v2040_v41, %v820_v22  ;;  %v1979_v38 = vadd.f32 %v1978_v25, %v825_v29  ;;  %v2000_v14 = vadd.f32 %v1999_v28, %v826_v37 }
 0x112   : > { %v840_v19 = vld [vmem:[%s4409_s24 + $0xe50] sm:$0xff]  ;;  %v837_v54 = vld [vmem:[%s4409_s24 + $0xe38] sm:$0xff]  ;;  %v842_v9 = vld [vmem:[%s4409_s24 + $0xe60] sm:$0xff]  ;;  %v2021_v26 = vadd.f32 %v2020_v23, %v827_v43  ;;  %v2062_v30 = vadd.f32 %v2061_v45, %v821_v49  ;;  %v1918_v22 = vadd.f32 %v1917_v32, %v838_v50  ;;  %v1939_v7 = vadd.f32 %v1938_v6, %v839_v36 }
 0x113   : > { %v841_v42 = vld [vmem:[%s4409_s24 + $0xe58] sm:$0xff]  ;;  %v843_v18 = vld [vmem:[%s4409_s24 + $0xe68] sm:$0xff]  ;;  %v844_v46 = vld [vmem:[%s4409_s24 + $0xe70] sm:$0xff]  ;;  %v1959_v8 = vadd.f32 %v1958_v27, %v832_v51  ;;  %v2042_v44 = vadd.f32 %v2041_v63, %v828_v5  ;;  %v1980_v49 = vadd.f32 %v1979_v38, %v833_v62  ;;  %v2001_v43 = vadd.f32 %v2000_v14, %v834_v39 }
 0x114   : > { %v846_v55 = vld [vmem:[%s4409_s24 + $0xe80] sm:$0xff]  ;;  %v847_v11 = vld [vmem:[%s4409_s24 + $0xe88] sm:$0xff]  ;;  %v848_v35 = vld [vmem:[%s4409_s24 + $0xe90] sm:$0xff]  ;;  %v2022_v25 = vadd.f32 %v2021_v26, %v835_v33  ;;  %v2063_v28 = vadd.f32 %v2062_v30, %v829_v21 }
 0x115   : > { %v845_v31 = vld [vmem:[%s4409_s24 + $0xe78] sm:$0xff]  ;;  %v850_v60 = vld [vmem:[%s4409_s24 + $0xea0] sm:$0xff]  ;;  %v851_v1 = vld [vmem:[%s4409_s24 + $0xea8] sm:$0xff]  ;;  %v1919_v5 = vadd.f32 %v1918_v22, %v846_v55  ;;  %v1940_v36 = vadd.f32 %v1939_v7, %v847_v11  ;;  %v1960_v32 = vadd.f32 %v1959_v8, %v840_v19  ;;  %v2043_v6 = vadd.f32 %v2042_v44, %v836_v52 }
 0x116   : > { %v849_v61 = vld [vmem:[%s4409_s24 + $0xe98] sm:$0xff]  ;;  %v852_v16 = vld [vmem:[%s4409_s24 + $0xeb0] sm:$0xff]  ;;  %v854_v41 = vld [vmem:[%s4409_s24 + $0xec0] sm:$0xff]  ;;  %v1981_v21 = vadd.f32 %v1980_v49, %v841_v42  ;;  %v2002_v33 = vadd.f32 %v2001_v43, %v842_v9  ;;  %v2023_v38 = vadd.f32 %v2022_v25, %v843_v18  ;;  %v2064_v14 = vadd.f32 %v2063_v28, %v837_v54 }
 0x117   : > { %v855_v29 = vld [vmem:[%s4409_s24 + $0xec8] sm:$0xff]  ;;  %v856_v37 = vld [vmem:[%s4409_s24 + $0xed0] sm:$0xff]  ;;  %v853_v23 = vld [vmem:[%s4409_s24 + $0xeb8] sm:$0xff]  ;;  %v1920_v19 = vadd.f32 %v1919_v5, %v854_v41  ;;  %v1961_v22 = vadd.f32 %v1960_v32, %v848_v35  ;;  %v2044_v7 = vadd.f32 %v2043_v6, %v844_v46 }
 0x118   : > { %v857_v45 = vld [vmem:[%s4409_s24 + $0xed8] sm:$0xff]  ;;  %v858_v50 = vld [vmem:[%s4409_s24 + $0xee0] sm:$0xff]  ;;  %v859_v51 = vld [vmem:[%s4409_s24 + $0xee8] sm:$0xff]  ;;  %v1941_v52 = vadd.f32 %v1940_v36, %v855_v29  ;;  %v1982_v9 = vadd.f32 %v1981_v21, %v849_v61  ;;  %v2003_v18 = vadd.f32 %v2002_v33, %v850_v60  ;;  %v2024_v54 = vadd.f32 %v2023_v38, %v851_v1 }
 0x119   : > { %v860_v27 = vld [vmem:[%s4409_s24 + $0xef0] sm:$0xff]  ;;  %v862_v63 = vld [vmem:[%s4409_s24 + $0xf00] sm:$0xff]  ;;  %v863_v62 = vld [vmem:[%s4409_s24 + $0xf08] sm:$0xff]  ;;  %v2065_v49 = vadd.f32 %v2064_v14, %v845_v31  ;;  %v1962_v35 = vadd.f32 %v1961_v22, %v856_v37  ;;  %v2045_v46 = vadd.f32 %v2044_v7, %v852_v16 }
 0x11a   : > { %v864_v39 = vld [vmem:[%s4409_s24 + $0xf10] sm:$0xff]  ;;  %v861_v26 = vld [vmem:[%s4409_s24 + $0xef8] sm:$0xff]  ;;  %v866_v55 = vld [vmem:[%s4409_s24 + $0xf20] sm:$0xff]  ;;  %v1921_v41 = vadd.f32 %v1920_v19, %v862_v63  ;;  %v1942_v29 = vadd.f32 %v1941_v52, %v863_v62  ;;  %v1983_v61 = vadd.f32 %v1982_v9, %v857_v45  ;;  %v2004_v60 = vadd.f32 %v2003_v18, %v858_v50 }
 0x11b   : > { %v865_v30 = vld [vmem:[%s4409_s24 + $0xf18] sm:$0xff]  ;;  %v867_v11 = vld [vmem:[%s4409_s24 + $0xf28] sm:$0xff]  ;;  %v868_v8 = vld [vmem:[%s4409_s24 + $0xf30] sm:$0xff]  ;;  %v2025_v1 = vadd.f32 %v2024_v54, %v859_v51  ;;  %v2066_v31 = vadd.f32 %v2065_v49, %v853_v23  ;;  %v1963_v37 = vadd.f32 %v1962_v35, %v864_v39  ;;  %v2046_v16 = vadd.f32 %v2045_v46, %v860_v27 }
 0x11c   : > { %v870_v44 = vld [vmem:[%s4409_s24 + $0xf40] sm:$0xff]  ;;  %v871_v42 = vld [vmem:[%s4409_s24 + $0xf48] sm:$0xff]  ;;  %v869_v43 = vld [vmem:[%s4409_s24 + $0xf38] sm:$0xff]  ;;  %v1984_v45 = vadd.f32 %v1983_v61, %v865_v30  ;;  %v2005_v50 = vadd.f32 %v2004_v60, %v866_v55 }
 0x11d   : > { %v872_v25 = vld [vmem:[%s4409_s24 + $0xf50] sm:$0xff]  ;;  %v873_v28 = vld [vmem:[%s4409_s24 + $0xf58] sm:$0xff]  ;;  %v874_v5 = vld [vmem:[%s4409_s24 + $0xf60] sm:$0xff]  ;;  %v1922_v63 = vadd.f32 %v1921_v41, %v870_v44  ;;  %v1943_v62 = vadd.f32 %v1942_v29, %v871_v42  ;;  %v2026_v51 = vadd.f32 %v2025_v1, %v867_v11  ;;  %v2067_v23 = vadd.f32 %v2066_v31, %v861_v26 }
 0x11e   : > { %v878_v36 = vld [vmem:[%s4409_s24 + $0xf80] sm:$0xff]  ;;  %v879_v32 = vld [vmem:[%s4409_s24 + $0xf88] sm:$0xff]  ;;  %v876_v21 = vld [vmem:[%s4409_s24 + $0xf70] sm:$0xff]  ;;  %v1964_v39 = vadd.f32 %v1963_v37, %v872_v25  ;;  %v2047_v27 = vadd.f32 %v2046_v16, %v868_v8  ;;  %v1985_v49 = vadd.f32 %v1984_v45, %v873_v28  ;;  %v2006_v30 = vadd.f32 %v2005_v50, %v874_v5 }
 0x11f   : > { %v875_v6 = vld [vmem:[%s4409_s24 + $0xf68] sm:$0xff]  ;;  %v877_v33 = vld [vmem:[%s4409_s24 + $0xf78] sm:$0xff]  ;;  %v880_v38 = vld [vmem:[%s4409_s24 + $0xf90] sm:$0xff]  ;;  %v1923_v44 = vadd.f32 %v1922_v63, %v878_v36  ;;  %v1944_v42 = vadd.f32 %v1943_v62, %v879_v32  ;;  %v2068_v11 = vadd.f32 %v2067_v23, %v869_v43 }
 0x120   : > { %v886_v14 = vld [vmem:[%s4409_s24 + $0xfc0] sm:$0xff]  ;;  %v887_v19 = vld [vmem:[%s4409_s24 + $0xfc8] sm:$0xff]  ;;  %v881_v52 = vld [vmem:[%s4409_s24 + $0xf98] sm:$0xff]  ;;  %v2027_v55 = vadd.f32 %v2026_v51, %v875_v6  ;;  %v1965_v61 = vadd.f32 %v1964_v39, %v880_v38  ;;  %v2048_v60 = vadd.f32 %v2047_v27, %v876_v21 }
 0x121   : > { %v882_v22 = vld [vmem:[%s4409_s24 + $0xfa0] sm:$0xff]  ;;  %v883_v7 = vld [vmem:[%s4409_s24 + $0xfa8] sm:$0xff]  ;;  %v884_v9 = vld [vmem:[%s4409_s24 + $0xfb0] sm:$0xff]  ;;  %v1924_v35 = vadd.f32 %v1923_v44, %v886_v14  ;;  %v1945_v46 = vadd.f32 %v1944_v42, %v887_v19  ;;  %v1986_v32 = vadd.f32 %v1985_v49, %v881_v52  ;;  %v2069_v8 = vadd.f32 %v2068_v11, %v877_v33 }
 0x122   : > { %v885_v18 = vld [vmem:[%s4409_s24 + $0xfb8] sm:$0xff]  ;;  %v888_v54 = vld [vmem:[%s4409_s24 + $0xfd0] sm:$0xff]  ;;  %v890_v26 = vld [vmem:[%s4409_s24 + $0xfe0] sm:$0xff]  ;;  %v2007_v25 = vadd.f32 %v2006_v30, %v882_v22  ;;  %v2028_v1 = vadd.f32 %v2027_v55, %v883_v7  ;;  %v2049_v37 = vadd.f32 %v2048_v60, %v884_v9 }
 0x123   : > { %v889_v41 = vld [vmem:[%s4409_s24 + $0xfd8] sm:$0xff]  ;;  %v891_v29 = vld [vmem:[%s4409_s24 + $0xfe8] sm:$0xff]  ;;  %v892_v36 = vld [vmem:[%s4409_s24 + $0xff0] sm:$0xff]  ;;  %v1925_v63 = vrot.slane %v1924_v35, 4  ;;  %v1946_v62 = vrot.slane %v1945_v46, 4  ;;  %v1966_v28 = vadd.f32 %v1965_v61, %v888_v54  ;;  %v2070_v16 = vadd.f32 %v2069_v8, %v885_v18 }
 0x124   : > { %v893_v31 = vld [vmem:[%s4409_s24 + $0xff8] sm:$0xff]  ;;  %v1987_v5 = vadd.f32 %v1986_v32, %v889_v41  ;;  %v2008_v6 = vadd.f32 %v2007_v25, %v890_v26  ;;  %v2029_v43 = vadd.f32 %v2028_v1, %v891_v29  ;;  %v2050_v19 = vadd.f32 %v2049_v37, %v892_v36  ;;  %v894_v26 = vld [vmem:[%s4409_s24 + $0x1000] sm:$0xff]  ;;  %v895_v29 = vld [vmem:[%s4409_s24 + $0x1008] sm:$0xff] }
 0x125   : > { %v1926_v45 = vadd.f32 %v1925_v63, %v1924_v35  ;;  %v1947_v50 = vadd.f32 %v1946_v62, %v1945_v46  ;;  %v1967_v14 = vrot.slane %v1966_v28, 4  ;;  %v2071_v23 = vadd.f32 %v2070_v16, %v893_v31  ;;  %v896_v36 = vld [vmem:[%s4409_s24 + $0x1010] sm:$0xff]  ;;  %v902_v32 = vld [vmem:[%s4409_s24 + $0x1040] sm:$0xff]  ;;  %v903_v25 = vld [vmem:[%s4409_s24 + $0x1048] sm:$0xff] }
 0x126   : > { %v1988_v38 = vrot.slane %v1987_v5, 4  ;;  %v2009_v21 = vrot.slane %v2008_v6, 4  ;;  %v2030_v51 = vrot.slane %v2029_v43, 4  ;;  %v2051_v7 = vrot.slane %v2050_v19, 4  ;;  %v904_v1 = vld [vmem:[%s4409_s24 + $0x1050] sm:$0xff]  ;;  %v898_v37 = vld [vmem:[%s4409_s24 + $0x1020] sm:$0xff] }
 0x127   : > { %v1927_v52 = vrot.slane %v1926_v45, 2  ;;  %v1948_v33 = vrot.slane %v1947_v50, 2  ;;  %v1968_v22 = vadd.f32 %v1967_v14, %v1966_v28  ;;  %v2072_v27 = vrot.slane %v2071_v23, 4  ;;  %v897_v28 = vld [vmem:[%s4409_s24 + $0x1018] sm:$0xff]  ;;  %v907_v16 = vld [vmem:[%s4409_s24 + $0x1068] sm:$0xff] }
 0x128   : > { %v1989_v44 = vadd.f32 %v1988_v38, %v1987_v5  ;;  %v2010_v42 = vadd.f32 %v2009_v21, %v2008_v6  ;;  %v2031_v39 = vadd.f32 %v2030_v51, %v2029_v43  ;;  %v2052_v49 = vadd.f32 %v2051_v7, %v2050_v19  ;;  %v899_v5 = vld [vmem:[%s4409_s24 + $0x1028] sm:$0xff]  ;;  %v905_v6 = vld [vmem:[%s4409_s24 + $0x1058] sm:$0xff]  ;;  %v906_v43 = vld [vmem:[%s4409_s24 + $0x1060] sm:$0xff] }
 0x129   : > { %v1928_v9 = vadd.f32 %v1927_v52, %v1926_v45  ;;  %v1949_v18 = vadd.f32 %v1948_v33, %v1947_v50  ;;  %v1969_v54 = vrot.slane %v1968_v22, 2  ;;  %v2073_v41 = vadd.f32 %v2072_v27, %v2071_v23  ;;  %v900_v38 = vld [vmem:[%s4409_s24 + $0x1030] sm:$0xff]  ;;  %v910_v51 = vld [vmem:[%s4409_s24 + $0x1080] sm:$0xff]  ;;  %v911_v23 = vld [vmem:[%s4409_s24 + $0x1088] sm:$0xff] }
 0x12a   : > { %v1990_v30 = vrot.slane %v1989_v44, 2  ;;  %v2011_v55 = vrot.slane %v2010_v42, 2  ;;  %v2032_v11 = vrot.slane %v2031_v39, 2  ;;  %v2053_v60 = vrot.slane %v2052_v49, 2  ;;  %v908_v21 = vld [vmem:[%s4409_s24 + $0x1070] sm:$0xff]  ;;  %v913_v27 = vld [vmem:[%s4409_s24 + $0x1098] sm:$0xff] }
 0x12b   : > { %v1929_v35 = vrot.slane %v1928_v9, 1  ;;  %v1950_v46 = vrot.slane %v1949_v18, 1  ;;  %v1970_v61 = vadd.f32 %v1969_v54, %v1968_v22  ;;  %v2074_v62 = vrot.slane %v2073_v41, 2  ;;  %v912_v52 = vld [vmem:[%s4409_s24 + $0x1090] sm:$0xff] }
 0x12c   : > { %v1991_v8 = vadd.f32 %v1990_v30, %v1989_v44  ;;  %v2012_v31 = vadd.f32 %v2011_v55, %v2010_v42  ;;  %v2033_v63 = vadd.f32 %v2032_v11, %v2031_v39  ;;  %v2054_v19 = vadd.f32 %v2053_v60, %v2052_v49  ;;  %v901_v42 = vld [vmem:[%s4409_s24 + $0x1038] sm:$0xff]  ;;  %v916_v11 = vld [vmem:[%s4409_s24 + $0x10b0] sm:$0xff] }
 0x12d   : > { %v4998_v45 = vadd.f32 %v1929_v35, %v1928_v9  ;;  %v5000_v50 = vadd.f32 %v1950_v46, %v1949_v18  ;;  %v1971_v14 = vrot.slane %v1970_v61, 1  ;;  %v2075_v44 = vadd.f32 %v2074_v62, %v2073_v41  ;;  %v909_v39 = vld [vmem:[%s4409_s24 + $0x1078] sm:$0xff]  ;;  %v914_v9 = vld [vmem:[%s4409_s24 + $0x10a0] sm:$0xff]  ;;  %v915_v18 = vld [vmem:[%s4409_s24 + $0x10a8] sm:$0xff] }
 0x12e   : > { %v1992_v33 = vrot.slane %v1991_v8, 1  ;;  %v2013_v22 = vrot.slane %v2012_v31, 1  ;;  %v2034_v7 = vrot.slane %v2033_v63, 1  ;;  %v2055_v49 = vrot.slane %v2054_v19, 1  ;;  %v918_v35 = vld [vmem:[%s4409_s24 + $0x10c0] sm:$0xff]  ;;  %v919_v46 = vld [vmem:[%s4409_s24 + $0x10c8] sm:$0xff] }
 0x12f   : > { %v5012_v54 = vadd.f32 %v1971_v14, %v1970_v61  ;;  %v2078_v30 = vadd.f32 %v902_v32, %v894_v26  ;;  %v2099_v55 = vadd.f32 %v903_v25, %v895_v29  ;;  %v920_v41 = vld [vmem:[%s4409_s24 + $0x10d0] sm:$0xff]  ;;  %v2076_v24 = vrot.slane %v2075_v44, 1  ;;  %v917_v61 = vld [vmem:[%s4409_s24 + $0x10b8] sm:$0xff]  ;;  %v922_v26 = vld [vmem:[%s4409_s24 + $0x10e0] sm:$0xff] }
 0x130   : > { %v5018_v60 = vadd.f32 %v1992_v33, %v1991_v8  ;;  %v5020_v62 = vadd.f32 %v2013_v22, %v2012_v31  ;;  %v5022_v12 = vadd.f32 %v2034_v7, %v2033_v63  ;;  %v921_v14 = vld [vmem:[%s4409_s24 + $0x10d8] sm:$0xff]  ;;  %v923_v29 = vld [vmem:[%s4409_s24 + $0x10e8] sm:$0xff]  ;;  %v5028_v32 = vadd.f32 %v2055_v49, %v2054_v19  ;;  %v924_v8 = vld [vmem:[%s4409_s24 + $0x10f0] sm:$0xff] }
 0x131   : > { %v2079_v25 = vadd.f32 %v2078_v30, %v910_v51  ;;  %v2100_v10 = vadd.f32 %v2099_v55, %v911_v23  ;;  %v2120_v20 = vadd.f32 %v904_v1, %v896_v36  ;;  %v926_v31 = vld [vmem:[%s4409_s24 + $0x1100] sm:$0xff]  ;;  %v927_v63 = vld [vmem:[%s4409_s24 + $0x1108] sm:$0xff]  ;;  %v928_v33 = vld [vmem:[%s4409_s24 + $0x1110] sm:$0xff]  ;;  %v5034_v22 = vadd.f32 %v2076_v24, %v2075_v44 }
 0x132   : > { %6175 = vst [vmem:[#allocation29_spill] sm:$0xff] %v5018_v60  ;;  %6176 = vst [vmem:[#allocation30_spill] sm:$0xff] %v5020_v62  ;;  %v2141_v7 = vadd.f32 %v905_v6, %v897_v28  ;;  %v2183_v3 = vadd.f32 %v907_v16, %v899_v5  ;;  %v925_v62 = vld [vmem:[%s4409_s24 + $0x10f8] sm:$0xff]  ;;  %v930_v51 = vld [vmem:[%s4409_s24 + $0x1120] sm:$0xff]  ;;  %v2204_v30 = vadd.f32 %v908_v21, %v900_v38 }
 0x133   : > { %6177 = vst [vmem:[#allocation31_spill] sm:$0xff] %v5022_v12  ;;  %6178 = vst [vmem:[#allocation32_spill] sm:$0xff] %v5028_v32  ;;  %v2162_v12 = vadd.f32 %v906_v43, %v898_v37  ;;  %v929_v19 = vld [vmem:[%s4409_s24 + $0x1118] sm:$0xff]  ;;  %v931_v36 = vld [vmem:[%s4409_s24 + $0x1128] sm:$0xff]  ;;  %v2080_v1 = vadd.f32 %v2079_v25, %v918_v35  ;;  %v2101_v23 = vadd.f32 %v2100_v10, %v919_v46 }
 0x134   : > { %6179 = vst [vmem:[#allocation33_spill] sm:$0xff] %v5034_v22  ;;  %v2121_v49 = vadd.f32 %v2120_v20, %v912_v52  ;;  %v932_v55 = vld [vmem:[%s4409_s24 + $0x1130] sm:$0xff]  ;;  %v934_v32 = vld [vmem:[%s4409_s24 + $0x1140] sm:$0xff]  ;;  %v935_v24 = vld [vmem:[%s4409_s24 + $0x1148] sm:$0xff]  ;;  %v2142_v37 = vadd.f32 %v2141_v7, %v913_v27  ;;  %v2184_v6 = vadd.f32 %v2183_v3, %v915_v18  ;;  %v2225_v43 = vadd.f32 %v909_v39, %v901_v42 }
 0x135   : > { %v936_v28 = vld [vmem:[%s4409_s24 + $0x1150] sm:$0xff]  ;;  %v2163_v5 = vadd.f32 %v2162_v12, %v914_v9  ;;  %v933_v16 = vld [vmem:[%s4409_s24 + $0x1138] sm:$0xff]  ;;  %v938_v35 = vld [vmem:[%s4409_s24 + $0x1160] sm:$0xff]  ;;  %v2081_v20 = vadd.f32 %v2080_v1, %v926_v31  ;;  %v2102_v38 = vadd.f32 %v2101_v23, %v927_v63  ;;  %v2205_v52 = vadd.f32 %v2204_v30, %v916_v11 }
 0x136   : > { %v937_v44 = vld [vmem:[%s4409_s24 + $0x1158] sm:$0xff]  ;;  %v939_v10 = vld [vmem:[%s4409_s24 + $0x1168] sm:$0xff]  ;;  %v2122_v21 = vadd.f32 %v2121_v49, %v920_v41  ;;  %v940_v46 = vld [vmem:[%s4409_s24 + $0x1170] sm:$0xff]  ;;  %v2143_v12 = vadd.f32 %v2142_v37, %v921_v14  ;;  %v2185_v39 = vadd.f32 %v2184_v6, %v923_v29  ;;  %v2226_v9 = vadd.f32 %v2225_v43, %v917_v61 }
 0x137   : > { %v942_v25 = vld [vmem:[%s4409_s24 + $0x1180] sm:$0xff]  ;;  %v943_v27 = vld [vmem:[%s4409_s24 + $0x1188] sm:$0xff]  ;;  %v944_v3 = vld [vmem:[%s4409_s24 + $0x1190] sm:$0xff]  ;;  %v2164_v42 = vadd.f32 %v2163_v5, %v922_v26  ;;  %v2082_v11 = vadd.f32 %v2081_v20, %v934_v32  ;;  %v2103_v63 = vadd.f32 %v2102_v38, %v935_v24  ;;  %v2206_v23 = vadd.f32 %v2205_v52, %v924_v8 }
 0x138   : > { %v941_v18 = vld [vmem:[%s4409_s24 + $0x1178] sm:$0xff]  ;;  %v946_v31 = vld [vmem:[%s4409_s24 + $0x11a0] sm:$0xff]  ;;  %v947_v41 = vld [vmem:[%s4409_s24 + $0x11a8] sm:$0xff]  ;;  %v2123_v1 = vadd.f32 %v2122_v21, %v928_v33  ;;  %v2144_v61 = vadd.f32 %v2143_v12, %v929_v19  ;;  %v2186_v37 = vadd.f32 %v2185_v39, %v931_v36  ;;  %v2227_v5 = vadd.f32 %v2226_v9, %v925_v62 }
 0x139   : > { %v945_v7 = vld [vmem:[%s4409_s24 + $0x1198] sm:$0xff]  ;;  %v948_v49 = vld [vmem:[%s4409_s24 + $0x11b0] sm:$0xff]  ;;  %v950_v30 = vld [vmem:[%s4409_s24 + $0x11c0] sm:$0xff]  ;;  %v2165_v29 = vadd.f32 %v2164_v42, %v930_v51  ;;  %v2083_v8 = vadd.f32 %v2082_v11, %v942_v25  ;;  %v2104_v24 = vadd.f32 %v2103_v63, %v943_v27  ;;  %v2207_v38 = vadd.f32 %v2206_v23, %v932_v55 }
 0x13a   : > { %v951_v14 = vld [vmem:[%s4409_s24 + $0x11c8] sm:$0xff]  ;;  %v952_v26 = vld [vmem:[%s4409_s24 + $0x11d0] sm:$0xff]  ;;  %v949_v6 = vld [vmem:[%s4409_s24 + $0x11b8] sm:$0xff]  ;;  %v2124_v20 = vadd.f32 %v2123_v1, %v936_v28  ;;  %v2145_v62 = vadd.f32 %v2144_v61, %v937_v44  ;;  %v2187_v12 = vadd.f32 %v2186_v37, %v939_v10  ;;  %v2228_v42 = vadd.f32 %v2227_v5, %v933_v16 }
 0x13b   : > { %v953_v43 = vld [vmem:[%s4409_s24 + $0x11d8] sm:$0xff]  ;;  %v954_v32 = vld [vmem:[%s4409_s24 + $0x11e0] sm:$0xff]  ;;  %v955_v33 = vld [vmem:[%s4409_s24 + $0x11e8] sm:$0xff]  ;;  %v2166_v36 = vadd.f32 %v2165_v29, %v938_v35  ;;  %v2084_v55 = vadd.f32 %v2083_v8, %v950_v30  ;;  %v2105_v27 = vadd.f32 %v2104_v24, %v951_v14  ;;  %v2208_v63 = vadd.f32 %v2207_v38, %v940_v46 }
 0x13c   : > { %v956_v21 = vld [vmem:[%s4409_s24 + $0x11f0] sm:$0xff]  ;;  %v958_v52 = vld [vmem:[%s4409_s24 + $0x1200] sm:$0xff]  ;;  %v959_v19 = vld [vmem:[%s4409_s24 + $0x1208] sm:$0xff]  ;;  %v2125_v11 = vadd.f32 %v2124_v20, %v944_v3  ;;  %v2146_v16 = vadd.f32 %v2145_v62, %v945_v7  ;;  %v2188_v61 = vadd.f32 %v2187_v12, %v947_v41  ;;  %v2229_v29 = vadd.f32 %v2228_v42, %v941_v18 }
 0x13d   : > { %v960_v51 = vld [vmem:[%s4409_s24 + $0x1210] sm:$0xff]  ;;  %v957_v39 = vld [vmem:[%s4409_s24 + $0x11f8] sm:$0xff]  ;;  %v962_v25 = vld [vmem:[%s4409_s24 + $0x1220] sm:$0xff]  ;;  %v2167_v10 = vadd.f32 %v2166_v36, %v946_v31  ;;  %v2085_v46 = vadd.f32 %v2084_v55, %v958_v52  ;;  %v2106_v14 = vadd.f32 %v2105_v27, %v959_v19  ;;  %v2209_v24 = vadd.f32 %v2208_v63, %v948_v49 }
 0x13e   : > { %v961_v9 = vld [vmem:[%s4409_s24 + $0x1218] sm:$0xff]  ;;  %v963_v28 = vld [vmem:[%s4409_s24 + $0x1228] sm:$0xff]  ;;  %v964_v1 = vld [vmem:[%s4409_s24 + $0x1230] sm:$0xff]  ;;  %v2126_v8 = vadd.f32 %v2125_v11, %v952_v26  ;;  %v2147_v18 = vadd.f32 %v2146_v16, %v953_v43  ;;  %v2189_v62 = vadd.f32 %v2188_v61, %v955_v33  ;;  %v2230_v36 = vadd.f32 %v2229_v29, %v949_v6 }
 0x13f   : > { %v966_v23 = vld [vmem:[%s4409_s24 + $0x1240] sm:$0xff]  ;;  %v967_v44 = vld [vmem:[%s4409_s24 + $0x1248] sm:$0xff]  ;;  %v968_v35 = vld [vmem:[%s4409_s24 + $0x1250] sm:$0xff]  ;;  %v2168_v41 = vadd.f32 %v2167_v10, %v954_v32  ;;  %v2210_v27 = vadd.f32 %v2209_v24, %v956_v21 }
 0x140   : > { %v965_v37 = vld [vmem:[%s4409_s24 + $0x1238] sm:$0xff]  ;;  %v970_v30 = vld [vmem:[%s4409_s24 + $0x1260] sm:$0xff]  ;;  %v971_v3 = vld [vmem:[%s4409_s24 + $0x1268] sm:$0xff]  ;;  %v2086_v49 = vadd.f32 %v2085_v46, %v966_v23  ;;  %v2107_v19 = vadd.f32 %v2106_v14, %v967_v44  ;;  %v2127_v55 = vadd.f32 %v2126_v8, %v960_v51  ;;  %v2148_v6 = vadd.f32 %v2147_v18, %v961_v9 }
 0x141   : > { %v969_v5 = vld [vmem:[%s4409_s24 + $0x1258] sm:$0xff]  ;;  %v972_v20 = vld [vmem:[%s4409_s24 + $0x1270] sm:$0xff]  ;;  %v974_v38 = vld [vmem:[%s4409_s24 + $0x1280] sm:$0xff]  ;;  %v2169_v33 = vadd.f32 %v2168_v41, %v962_v25  ;;  %v2190_v16 = vadd.f32 %v2189_v62, %v963_v28  ;;  %v2231_v10 = vadd.f32 %v2230_v36, %v957_v39  ;;  %v2211_v14 = vadd.f32 %v2210_v27, %v964_v1 }
 0x142   : > { %v975_v7 = vld [vmem:[%s4409_s24 + $0x1288] sm:$0xff]  ;;  %v976_v31 = vld [vmem:[%s4409_s24 + $0x1290] sm:$0xff]  ;;  %v973_v12 = vld [vmem:[%s4409_s24 + $0x1278] sm:$0xff]  ;;  %v2087_v21 = vadd.f32 %v2086_v49, %v974_v38  ;;  %v2128_v46 = vadd.f32 %v2127_v55, %v968_v35  ;;  %v2149_v39 = vadd.f32 %v2148_v6, %v969_v5 }
 0x143   : > { %v977_v42 = vld [vmem:[%s4409_s24 + $0x1298] sm:$0xff]  ;;  %v978_v52 = vld [vmem:[%s4409_s24 + $0x12a0] sm:$0xff]  ;;  %v979_v26 = vld [vmem:[%s4409_s24 + $0x12a8] sm:$0xff]  ;;  %v2108_v44 = vadd.f32 %v2107_v19, %v975_v7  ;;  %v2170_v28 = vadd.f32 %v2169_v33, %v970_v30  ;;  %v2191_v18 = vadd.f32 %v2190_v16, %v971_v3  ;;  %v2232_v41 = vadd.f32 %v2231_v10, %v965_v37 }
 0x144   : > { %v980_v11 = vld [vmem:[%s4409_s24 + $0x12b0] sm:$0xff]  ;;  %v982_v63 = vld [vmem:[%s4409_s24 + $0x12c0] sm:$0xff]  ;;  %v983_v43 = vld [vmem:[%s4409_s24 + $0x12c8] sm:$0xff]  ;;  %v2129_v49 = vadd.f32 %v2128_v46, %v976_v31  ;;  %v2212_v19 = vadd.f32 %v2211_v14, %v972_v20  ;;  %v2150_v30 = vadd.f32 %v2149_v39, %v977_v42 }
 0x145   : > { %v984_v32 = vld [vmem:[%s4409_s24 + $0x12d0] sm:$0xff]  ;;  %v981_v61 = vld [vmem:[%s4409_s24 + $0x12b8] sm:$0xff]  ;;  %v986_v23 = vld [vmem:[%s4409_s24 + $0x12e0] sm:$0xff]  ;;  %v2088_v35 = vadd.f32 %v2087_v21, %v982_v63  ;;  %v2109_v1 = vadd.f32 %v2108_v44, %v983_v43  ;;  %v2171_v3 = vadd.f32 %v2170_v28, %v978_v52  ;;  %v2192_v37 = vadd.f32 %v2191_v18, %v979_v26 }
 0x146   : > { %v985_v29 = vld [vmem:[%s4409_s24 + $0x12d8] sm:$0xff]  ;;  %v987_v51 = vld [vmem:[%s4409_s24 + $0x12e8] sm:$0xff]  ;;  %v988_v8 = vld [vmem:[%s4409_s24 + $0x12f0] sm:$0xff]  ;;  %v2233_v6 = vadd.f32 %v2232_v41, %v973_v12  ;;  %v2130_v31 = vadd.f32 %v2129_v49, %v984_v32  ;;  %v2213_v20 = vadd.f32 %v2212_v19, %v980_v11 }
 0x147   : > { %v990_v24 = vld [vmem:[%s4409_s24 + $0x1300] sm:$0xff]  ;;  %v991_v9 = vld [vmem:[%s4409_s24 + $0x1308] sm:$0xff]  ;;  %v992_v25 = vld [vmem:[%s4409_s24 + $0x1310] sm:$0xff]  ;;  %v2151_v42 = vadd.f32 %v2150_v30, %v985_v29  ;;  %v2172_v52 = vadd.f32 %v2171_v3, %v986_v23  ;;  %v2193_v26 = vadd.f32 %v2192_v37, %v987_v51 }
 0x148   : > { %v989_v62 = vld [vmem:[%s4409_s24 + $0x12f8] sm:$0xff]  ;;  %v994_v38 = vld [vmem:[%s4409_s24 + $0x1320] sm:$0xff]  ;;  %v995_v7 = vld [vmem:[%s4409_s24 + $0x1328] sm:$0xff]  ;;  %v2089_v63 = vadd.f32 %v2088_v35, %v990_v24  ;;  %v2110_v43 = vadd.f32 %v2109_v1, %v991_v9  ;;  %v2234_v12 = vadd.f32 %v2233_v6, %v981_v61  ;;  %v2131_v32 = vadd.f32 %v2130_v31, %v992_v25 }
 0x149   : > { %v993_v36 = vld [vmem:[%s4409_s24 + $0x1318] sm:$0xff]  ;;  %v996_v55 = vld [vmem:[%s4409_s24 + $0x1330] sm:$0xff]  ;;  %v998_v27 = vld [vmem:[%s4409_s24 + $0x1340] sm:$0xff]  ;;  %v2214_v11 = vadd.f32 %v2213_v20, %v988_v8  ;;  %v2173_v23 = vadd.f32 %v2172_v52, %v994_v38  ;;  %v2194_v51 = vadd.f32 %v2193_v26, %v995_v7 }
 0x14a   : > { %v999_v5 = vld [vmem:[%s4409_s24 + $0x1348] sm:$0xff]  ;;  %v997_v33 = vld [vmem:[%s4409_s24 + $0x1338] sm:$0xff]  ;;  %v1000_v16 = vld [vmem:[%s4409_s24 + $0x1350] sm:$0xff]  ;;  %v2090_v24 = vadd.f32 %v2089_v63, %v998_v27  ;;  %v2152_v29 = vadd.f32 %v2151_v42, %v993_v36  ;;  %v2235_v61 = vadd.f32 %v2234_v12, %v989_v62 }
 0x14b   : > { %v1001_v10 = vld [vmem:[%s4409_s24 + $0x1358] sm:$0xff]  ;;  %v1002_v21 = vld [vmem:[%s4409_s24 + $0x1360] sm:$0xff]  ;;  %v1007_v46 = vld [vmem:[%s4409_s24 + $0x1388] sm:$0xff]  ;;  %v2111_v9 = vadd.f32 %v2110_v43, %v999_v5  ;;  %v2132_v25 = vadd.f32 %v2131_v32, %v1000_v16  ;;  %v2215_v8 = vadd.f32 %v2214_v11, %v996_v55 }
 0x14c   : > { %v1006_v44 = vld [vmem:[%s4409_s24 + $0x1380] sm:$0xff]  ;;  %v1003_v14 = vld [vmem:[%s4409_s24 + $0x1368] sm:$0xff]  ;;  %v1004_v39 = vld [vmem:[%s4409_s24 + $0x1370] sm:$0xff]  ;;  %v2153_v6 = vadd.f32 %v2152_v29, %v1001_v10  ;;  %v2174_v36 = vadd.f32 %v2173_v23, %v1002_v21  ;;  %v2236_v7 = vadd.f32 %v2235_v61, %v997_v33 }
 0x14d   : > { %v1005_v28 = vld [vmem:[%s4409_s24 + $0x1378] sm:$0xff]  ;;  %v1008_v18 = vld [vmem:[%s4409_s24 + $0x1390] sm:$0xff]  ;;  %v1014_v41 = vld [vmem:[%s4409_s24 + $0x13c0] sm:$0xff]  ;;  %v2091_v27 = vadd.f32 %v2090_v24, %v1006_v44  ;;  %v2112_v5 = vadd.f32 %v2111_v9, %v1007_v46  ;;  %v2195_v38 = vadd.f32 %v2194_v51, %v1003_v14  ;;  %v2216_v52 = vadd.f32 %v2215_v8, %v1004_v39 }
 0x14e   : > { %v1015_v35 = vld [vmem:[%s4409_s24 + $0x13c8] sm:$0xff]  ;;  %v1009_v1 = vld [vmem:[%s4409_s24 + $0x1398] sm:$0xff]  ;;  %v1010_v49 = vld [vmem:[%s4409_s24 + $0x13a0] sm:$0xff]  ;;  %v2133_v42 = vadd.f32 %v2132_v25, %v1008_v18  ;;  %v2237_v55 = vadd.f32 %v2236_v7, %v1005_v28 }
 0x14f   : > { %v1011_v19 = vld [vmem:[%s4409_s24 + $0x13a8] sm:$0xff]  ;;  %v1012_v30 = vld [vmem:[%s4409_s24 + $0x13b0] sm:$0xff]  ;;  %v1013_v3 = vld [vmem:[%s4409_s24 + $0x13b8] sm:$0xff]  ;;  %v2092_v31 = vadd.f32 %v2091_v27, %v1014_v41  ;;  %v2113_v20 = vadd.f32 %v2112_v5, %v1015_v35  ;;  %v2154_v46 = vadd.f32 %v2153_v6, %v1009_v1  ;;  %v2175_v16 = vadd.f32 %v2174_v36, %v1010_v49 }
 0x150   : > { %v1016_v37 = vld [vmem:[%s4409_s24 + $0x13d0] sm:$0xff]  ;;  %v1017_v63 = vld [vmem:[%s4409_s24 + $0x13d8] sm:$0xff]  ;;  %v1018_v62 = vld [vmem:[%s4409_s24 + $0x13e0] sm:$0xff]  ;;  %v2196_v26 = vadd.f32 %v2195_v38, %v1011_v19  ;;  %v2217_v32 = vadd.f32 %v2216_v52, %v1012_v30  ;;  %v2238_v11 = vadd.f32 %v2237_v55, %v1013_v3 }
 0x151   : > { %v1019_v43 = vld [vmem:[%s4409_s24 + $0x13e8] sm:$0xff]  ;;  %v1020_v44 = vld [vmem:[%s4409_s24 + $0x13f0] sm:$0xff]  ;;  %v1021_v12 = vld [vmem:[%s4409_s24 + $0x13f8] sm:$0xff]  ;;  %v2093_v24 = vrot.slane %v2092_v31, 4  ;;  %v2114_v9 = vrot.slane %v2113_v20, 4  ;;  %v2134_v10 = vadd.f32 %v2133_v42, %v1016_v37  ;;  %v2155_v21 = vadd.f32 %v2154_v46, %v1017_v63 }
 0x152   : > { %v2176_v14 = vadd.f32 %v2175_v16, %v1018_v62  ;;  %v2197_v33 = vadd.f32 %v2196_v26, %v1019_v43  ;;  %v2218_v35 = vadd.f32 %v2217_v32, %v1020_v44  ;;  %v2239_v61 = vadd.f32 %v2238_v11, %v1021_v12  ;;  %v1022_v62 = vld [vmem:[%s4409_s24 + $0x1400] sm:$0xff]  ;;  %v1023_v43 = vld [vmem:[%s4409_s24 + $0x1408] sm:$0xff]  ;;  %v1024_v44 = vld [vmem:[%s4409_s24 + $0x1410] sm:$0xff] }
 0x153   : > { %v2094_v29 = vadd.f32 %v2093_v24, %v2092_v31  ;;  %v2115_v23 = vadd.f32 %v2114_v9, %v2113_v20  ;;  %v2135_v41 = vrot.slane %v2134_v10, 4  ;;  %v2156_v18 = vrot.slane %v2155_v21, 4  ;;  %v1030_v46 = vld [vmem:[%s4409_s24 + $0x1440] sm:$0xff]  ;;  %v1031_v16 = vld [vmem:[%s4409_s24 + $0x1448] sm:$0xff]  ;;  %v1032_v26 = vld [vmem:[%s4409_s24 + $0x1450] sm:$0xff] }
 0x154   : > { %v2177_v39 = vrot.slane %v2176_v14, 4  ;;  %v2198_v51 = vrot.slane %v2197_v33, 4  ;;  %v2219_v19 = vrot.slane %v2218_v35, 4  ;;  %v2240_v8 = vrot.slane %v2239_v61, 4  ;;  %v1026_v32 = vld [vmem:[%s4409_s24 + $0x1420] sm:$0xff]  ;;  %v1035_v11 = vld [vmem:[%s4409_s24 + $0x1468] sm:$0xff] }
 0x155   : > { %v2095_v1 = vrot.slane %v2094_v29, 2  ;;  %v2116_v28 = vrot.slane %v2115_v23, 2  ;;  %v2136_v49 = vadd.f32 %v2135_v41, %v2134_v10  ;;  %v2157_v27 = vadd.f32 %v2156_v18, %v2155_v21  ;;  %v1025_v10 = vld [vmem:[%s4409_s24 + $0x1418] sm:$0xff]  ;;  %v1027_v21 = vld [vmem:[%s4409_s24 + $0x1428] sm:$0xff]  ;;  %v1028_v18 = vld [vmem:[%s4409_s24 + $0x1430] sm:$0xff] }
 0x156   : > { %v2178_v5 = vadd.f32 %v2177_v39, %v2176_v14  ;;  %v2199_v25 = vadd.f32 %v2198_v51, %v2197_v33  ;;  %v2220_v6 = vadd.f32 %v2219_v19, %v2218_v35  ;;  %v2241_v63 = vadd.f32 %v2240_v8, %v2239_v61  ;;  %v1033_v14 = vld [vmem:[%s4409_s24 + $0x1458] sm:$0xff]  ;;  %v1034_v33 = vld [vmem:[%s4409_s24 + $0x1460] sm:$0xff]  ;;  %v1036_v39 = vld [vmem:[%s4409_s24 + $0x1470] sm:$0xff] }
 0x157   : > { %v2096_v30 = vadd.f32 %v2095_v1, %v2094_v29  ;;  %v2117_v3 = vadd.f32 %v2116_v28, %v2115_v23  ;;  %v2137_v37 = vrot.slane %v2136_v49, 2  ;;  %v2158_v36 = vrot.slane %v2157_v27, 2  ;;  %v1038_v51 = vld [vmem:[%s4409_s24 + $0x1480] sm:$0xff]  ;;  %v1039_v61 = vld [vmem:[%s4409_s24 + $0x1488] sm:$0xff]  ;;  %v1040_v1 = vld [vmem:[%s4409_s24 + $0x1490] sm:$0xff] }
 0x158   : > { %v2179_v38 = vrot.slane %v2178_v5, 2  ;;  %v2200_v7 = vrot.slane %v2199_v25, 2  ;;  %v2221_v52 = vrot.slane %v2220_v6, 2  ;;  %v2242_v9 = vrot.slane %v2241_v63, 2  ;;  %v1041_v8 = vld [vmem:[%s4409_s24 + $0x1498] sm:$0xff] }
 0x159   : > { %v2097_v31 = vrot.slane %v2096_v30, 1  ;;  %v2118_v20 = vrot.slane %v2117_v3, 1  ;;  %v2138_v42 = vadd.f32 %v2137_v37, %v2136_v49  ;;  %v2159_v55 = vadd.f32 %v2158_v36, %v2157_v27 }
 0x15a   : > { %v2180_v12 = vadd.f32 %v2179_v38, %v2178_v5  ;;  %v2201_v24 = vadd.f32 %v2200_v7, %v2199_v25  ;;  %v2222_v35 = vadd.f32 %v2221_v52, %v2220_v6  ;;  %v2243_v27 = vadd.f32 %v2242_v9, %v2241_v63  ;;  %v1029_v5 = vld [vmem:[%s4409_s24 + $0x1438] sm:$0xff]  ;;  %v1044_v7 = vld [vmem:[%s4409_s24 + $0x14b0] sm:$0xff] }
 0x15b   : > { %v5142_v29 = vadd.f32 %v2097_v31, %v2096_v30  ;;  %v5144_v23 = vadd.f32 %v2118_v20, %v2117_v3  ;;  %v2139_v41 = vrot.slane %v2138_v42, 1  ;;  %v2160_v28 = vrot.slane %v2159_v55, 1  ;;  %v1037_v25 = vld [vmem:[%s4409_s24 + $0x1478] sm:$0xff]  ;;  %v1042_v30 = vld [vmem:[%s4409_s24 + $0x14a0] sm:$0xff]  ;;  %v1043_v3 = vld [vmem:[%s4409_s24 + $0x14a8] sm:$0xff] }
 0x15c   : > { %v2181_v49 = vrot.slane %v2180_v12, 1  ;;  %v2202_v19 = vrot.slane %v2201_v24, 1  ;;  %v2223_v6 = vrot.slane %v2222_v35, 1  ;;  %v2246_v36 = vadd.f32 %v1030_v46, %v1022_v62  ;;  %v1046_v31 = vld [vmem:[%s4409_s24 + $0x14c0] sm:$0xff]  ;;  %v1047_v20 = vld [vmem:[%s4409_s24 + $0x14c8] sm:$0xff]  ;;  %v1048_v63 = vld [vmem:[%s4409_s24 + $0x14d0] sm:$0xff] }
 0x15d   : > { %v5156_v37 = vadd.f32 %v2139_v41, %v2138_v42  ;;  %v2267_v38 = vadd.f32 %v1031_v16, %v1023_v43  ;;  %v5162_v52 = vadd.f32 %v2160_v28, %v2159_v55  ;;  %v2244_v34 = vrot.slane %v2243_v27, 1  ;;  %v1045_v42 = vld [vmem:[%s4409_s24 + $0x14b8] sm:$0xff]  ;;  %v1050_v62 = vld [vmem:[%s4409_s24 + $0x14e0] sm:$0xff]  ;;  %v1051_v43 = vld [vmem:[%s4409_s24 + $0x14e8] sm:$0xff] }
 0x15e   : > { %v5164_v9 = vadd.f32 %v2181_v49, %v2180_v12  ;;  %v5166_v22 = vadd.f32 %v2202_v19, %v2201_v24  ;;  %v1049_v41 = vld [vmem:[%s4409_s24 + $0x14d8] sm:$0xff]  ;;  %v5172_v46 = vadd.f32 %v2223_v6, %v2222_v35  ;;  %v2247_v16 = vadd.f32 %v2246_v36, %v1038_v51  ;;  %v1052_v55 = vld [vmem:[%s4409_s24 + $0x14f0] sm:$0xff]  ;;  %v1054_v12 = vld [vmem:[%s4409_s24 + $0x1500] sm:$0xff] }
 0x15f   : > { %6180 = vst [vmem:[#allocation34_spill] sm:$0xff] %v5156_v37  ;;  %6181 = vst [vmem:[#allocation35_spill] sm:$0xff] %v5162_v52  ;;  %v2268_v17 = vadd.f32 %v2267_v38, %v1039_v61  ;;  %v2288_v2 = vadd.f32 %v1032_v26, %v1024_v44  ;;  %v1055_v24 = vld [vmem:[%s4409_s24 + $0x1508] sm:$0xff]  ;;  %v1056_v28 = vld [vmem:[%s4409_s24 + $0x1510] sm:$0xff]  ;;  %v5178_v49 = vadd.f32 %v2244_v34, %v2243_v27 }
 0x160   : > { %6182 = vst [vmem:[#allocation36_spill] sm:$0xff] %v5164_v9  ;;  %6183 = vst [vmem:[#allocation37_spill] sm:$0xff] %v5166_v22  ;;  %v2309_v19 = vadd.f32 %v1033_v14, %v1025_v10  ;;  %v2330_v22 = vadd.f32 %v1034_v33, %v1026_v32  ;;  %v2351_v9 = vadd.f32 %v1035_v11, %v1027_v21  ;;  %v1053_v52 = vld [vmem:[%s4409_s24 + $0x14f8] sm:$0xff]  ;;  %v1058_v51 = vld [vmem:[%s4409_s24 + $0x1520] sm:$0xff] }
 0x161   : > { %6184 = vst [vmem:[#allocation38_spill] sm:$0xff] %v5172_v46  ;;  %6185 = vst [vmem:[#allocation39_spill] sm:$0xff] %v5178_v49  ;;  %v1057_v35 = vld [vmem:[%s4409_s24 + $0x1518] sm:$0xff]  ;;  %v1059_v44 = vld [vmem:[%s4409_s24 + $0x1528] sm:$0xff]  ;;  %v2248_v26 = vadd.f32 %v2247_v16, %v1046_v31  ;;  %v2269_v61 = vadd.f32 %v2268_v17, %v1047_v20  ;;  %v2289_v6 = vadd.f32 %v2288_v2, %v1040_v1 }
 0x162   : > { %v2372_v36 = vadd.f32 %v1036_v39, %v1028_v18  ;;  %v1060_v38 = vld [vmem:[%s4409_s24 + $0x1530] sm:$0xff]  ;;  %v1062_v46 = vld [vmem:[%s4409_s24 + $0x1540] sm:$0xff]  ;;  %v1063_v34 = vld [vmem:[%s4409_s24 + $0x1548] sm:$0xff]  ;;  %v2310_v32 = vadd.f32 %v2309_v19, %v1041_v8  ;;  %v2331_v21 = vadd.f32 %v2330_v22, %v1042_v30  ;;  %v2352_v14 = vadd.f32 %v2351_v9, %v1043_v3 }
 0x163   : > { %v1064_v10 = vld [vmem:[%s4409_s24 + $0x1550] sm:$0xff]  ;;  %v2393_v33 = vadd.f32 %v1037_v25, %v1029_v5  ;;  %v1061_v11 = vld [vmem:[%s4409_s24 + $0x1538] sm:$0xff]  ;;  %v1066_v31 = vld [vmem:[%s4409_s24 + $0x1560] sm:$0xff]  ;;  %v2249_v17 = vadd.f32 %v2248_v26, %v1054_v12  ;;  %v2270_v18 = vadd.f32 %v2269_v61, %v1055_v24  ;;  %v2290_v39 = vadd.f32 %v2289_v6, %v1048_v63 }
 0x164   : > { %v1065_v27 = vld [vmem:[%s4409_s24 + $0x1558] sm:$0xff]  ;;  %v1067_v2 = vld [vmem:[%s4409_s24 + $0x1568] sm:$0xff]  ;;  %v2373_v1 = vadd.f32 %v2372_v36, %v1044_v7  ;;  %v1068_v20 = vld [vmem:[%s4409_s24 + $0x1570] sm:$0xff]  ;;  %v2311_v5 = vadd.f32 %v2310_v32, %v1049_v41  ;;  %v2332_v25 = vadd.f32 %v2331_v21, %v1050_v62  ;;  %v2353_v30 = vadd.f32 %v2352_v14, %v1051_v43 }
 0x165   : > { %v1070_v16 = vld [vmem:[%s4409_s24 + $0x1580] sm:$0xff]  ;;  %v1071_v8 = vld [vmem:[%s4409_s24 + $0x1588] sm:$0xff]  ;;  %v1072_v22 = vld [vmem:[%s4409_s24 + $0x1590] sm:$0xff]  ;;  %v2394_v3 = vadd.f32 %v2393_v33, %v1045_v42  ;;  %v2250_v7 = vadd.f32 %v2249_v17, %v1062_v46  ;;  %v2271_v24 = vadd.f32 %v2270_v18, %v1063_v34  ;;  %v2291_v26 = vadd.f32 %v2290_v39, %v1056_v28 }
 0x166   : > { %v1069_v9 = vld [vmem:[%s4409_s24 + $0x1578] sm:$0xff]  ;;  %v1074_v12 = vld [vmem:[%s4409_s24 + $0x15a0] sm:$0xff]  ;;  %v1075_v63 = vld [vmem:[%s4409_s24 + $0x15a8] sm:$0xff]  ;;  %v2374_v61 = vadd.f32 %v2373_v1, %v1052_v55  ;;  %v2312_v42 = vadd.f32 %v2311_v5, %v1057_v35  ;;  %v2333_v43 = vadd.f32 %v2332_v25, %v1058_v51  ;;  %v2354_v32 = vadd.f32 %v2353_v30, %v1059_v44 }
 0x167   : > { %v1073_v19 = vld [vmem:[%s4409_s24 + $0x1598] sm:$0xff]  ;;  %v1076_v6 = vld [vmem:[%s4409_s24 + $0x15b0] sm:$0xff]  ;;  %v1078_v36 = vld [vmem:[%s4409_s24 + $0x15c0] sm:$0xff]  ;;  %v2395_v21 = vadd.f32 %v2394_v3, %v1053_v52  ;;  %v2251_v55 = vadd.f32 %v2250_v7, %v1070_v16  ;;  %v2272_v34 = vadd.f32 %v2271_v24, %v1071_v8  ;;  %v2292_v17 = vadd.f32 %v2291_v26, %v1064_v10 }
 0x168   : > { %v1079_v41 = vld [vmem:[%s4409_s24 + $0x15c8] sm:$0xff]  ;;  %v1080_v62 = vld [vmem:[%s4409_s24 + $0x15d0] sm:$0xff]  ;;  %v1077_v14 = vld [vmem:[%s4409_s24 + $0x15b8] sm:$0xff]  ;;  %v2375_v18 = vadd.f32 %v2374_v61, %v1060_v38  ;;  %v2313_v52 = vadd.f32 %v2312_v42, %v1065_v27  ;;  %v2334_v44 = vadd.f32 %v2333_v43, %v1066_v31  ;;  %v2355_v5 = vadd.f32 %v2354_v32, %v1067_v2 }
 0x169   : > { %v1081_v33 = vld [vmem:[%s4409_s24 + $0x15d8] sm:$0xff]  ;;  %v1082_v46 = vld [vmem:[%s4409_s24 + $0x15e0] sm:$0xff]  ;;  %v1083_v28 = vld [vmem:[%s4409_s24 + $0x15e8] sm:$0xff]  ;;  %v2396_v25 = vadd.f32 %v2395_v21, %v1061_v11  ;;  %v2252_v38 = vadd.f32 %v2251_v55, %v1078_v36  ;;  %v2273_v8 = vadd.f32 %v2272_v34, %v1079_v41  ;;  %v2293_v7 = vadd.f32 %v2292_v17, %v1072_v22 }
 0x16a   : > { %v1084_v39 = vld [vmem:[%s4409_s24 + $0x15f0] sm:$0xff]  ;;  %v1086_v1 = vld [vmem:[%s4409_s24 + $0x1600] sm:$0xff]  ;;  %v1087_v35 = vld [vmem:[%s4409_s24 + $0x1608] sm:$0xff]  ;;  %v2376_v24 = vadd.f32 %v2375_v18, %v1068_v20  ;;  %v2314_v11 = vadd.f32 %v2313_v52, %v1073_v19  ;;  %v2335_v2 = vadd.f32 %v2334_v44, %v1074_v12  ;;  %v2356_v42 = vadd.f32 %v2355_v5, %v1075_v63 }
 0x16b   : > { %v1088_v51 = vld [vmem:[%s4409_s24 + $0x1610] sm:$0xff]  ;;  %v1085_v30 = vld [vmem:[%s4409_s24 + $0x15f8] sm:$0xff]  ;;  %v1090_v16 = vld [vmem:[%s4409_s24 + $0x1620] sm:$0xff]  ;;  %v2397_v43 = vadd.f32 %v2396_v25, %v1069_v9  ;;  %v2253_v20 = vadd.f32 %v2252_v38, %v1086_v1  ;;  %v2274_v41 = vadd.f32 %v2273_v8, %v1087_v35  ;;  %v2294_v55 = vadd.f32 %v2293_v7, %v1080_v62 }
 0x16c   : > { %v1089_v3 = vld [vmem:[%s4409_s24 + $0x1618] sm:$0xff]  ;;  %v1091_v10 = vld [vmem:[%s4409_s24 + $0x1628] sm:$0xff]  ;;  %v1092_v26 = vld [vmem:[%s4409_s24 + $0x1630] sm:$0xff]  ;;  %v2377_v34 = vadd.f32 %v2376_v24, %v1076_v6  ;;  %v2315_v9 = vadd.f32 %v2314_v11, %v1081_v33  ;;  %v2336_v63 = vadd.f32 %v2335_v2, %v1082_v46  ;;  %v2357_v52 = vadd.f32 %v2356_v42, %v1083_v28 }
 0x16d   : > { %v1094_v61 = vld [vmem:[%s4409_s24 + $0x1640] sm:$0xff]  ;;  %v1095_v27 = vld [vmem:[%s4409_s24 + $0x1648] sm:$0xff]  ;;  %v1096_v31 = vld [vmem:[%s4409_s24 + $0x1650] sm:$0xff]  ;;  %v2398_v44 = vadd.f32 %v2397_v43, %v1077_v14  ;;  %v2295_v38 = vadd.f32 %v2294_v55, %v1088_v51 }
 0x16e   : > { %v1093_v32 = vld [vmem:[%s4409_s24 + $0x1638] sm:$0xff]  ;;  %v1098_v36 = vld [vmem:[%s4409_s24 + $0x1660] sm:$0xff]  ;;  %v1099_v22 = vld [vmem:[%s4409_s24 + $0x1668] sm:$0xff]  ;;  %v2254_v6 = vadd.f32 %v2253_v20, %v1094_v61  ;;  %v2275_v35 = vadd.f32 %v2274_v41, %v1095_v27  ;;  %v2378_v8 = vadd.f32 %v2377_v34, %v1084_v39  ;;  %v2316_v14 = vadd.f32 %v2315_v9, %v1089_v3 }
 0x16f   : > { %v1097_v21 = vld [vmem:[%s4409_s24 + $0x1658] sm:$0xff]  ;;  %v1100_v17 = vld [vmem:[%s4409_s24 + $0x1670] sm:$0xff]  ;;  %v1102_v18 = vld [vmem:[%s4409_s24 + $0x1680] sm:$0xff]  ;;  %v2337_v28 = vadd.f32 %v2336_v63, %v1090_v16  ;;  %v2358_v11 = vadd.f32 %v2357_v52, %v1091_v10  ;;  %v2399_v2 = vadd.f32 %v2398_v44, %v1085_v30  ;;  %v2296_v20 = vadd.f32 %v2295_v38, %v1096_v31 }
 0x170   : > { %v1103_v19 = vld [vmem:[%s4409_s24 + $0x1688] sm:$0xff]  ;;  %v1104_v12 = vld [vmem:[%s4409_s24 + $0x1690] sm:$0xff]  ;;  %v1101_v5 = vld [vmem:[%s4409_s24 + $0x1678] sm:$0xff]  ;;  %v2255_v39 = vadd.f32 %v2254_v6, %v1102_v18  ;;  %v2379_v41 = vadd.f32 %v2378_v8, %v1092_v26  ;;  %v2317_v30 = vadd.f32 %v2316_v14, %v1097_v21 }
 0x171   : > { %v1105_v25 = vld [vmem:[%s4409_s24 + $0x1698] sm:$0xff]  ;;  %v1106_v1 = vld [vmem:[%s4409_s24 + $0x16a0] sm:$0xff]  ;;  %v1107_v62 = vld [vmem:[%s4409_s24 + $0x16a8] sm:$0xff]  ;;  %v2276_v27 = vadd.f32 %v2275_v35, %v1103_v19  ;;  %v2338_v10 = vadd.f32 %v2337_v28, %v1098_v36  ;;  %v2359_v9 = vadd.f32 %v2358_v11, %v1099_v22  ;;  %v2400_v63 = vadd.f32 %v2399_v2, %v1093_v32 }
 0x172   : > { %v1108_v7 = vld [vmem:[%s4409_s24 + $0x16b0] sm:$0xff]  ;;  %v1110_v24 = vld [vmem:[%s4409_s24 + $0x16c0] sm:$0xff]  ;;  %v1111_v33 = vld [vmem:[%s4409_s24 + $0x16c8] sm:$0xff]  ;;  %v2297_v6 = vadd.f32 %v2296_v20, %v1104_v12  ;;  %v2380_v35 = vadd.f32 %v2379_v41, %v1100_v17  ;;  %v2318_v36 = vadd.f32 %v2317_v30, %v1105_v25 }
 0x173   : > { %v1112_v46 = vld [vmem:[%s4409_s24 + $0x16d0] sm:$0xff]  ;;  %v1109_v42 = vld [vmem:[%s4409_s24 + $0x16b8] sm:$0xff]  ;;  %v1114_v61 = vld [vmem:[%s4409_s24 + $0x16e0] sm:$0xff]  ;;  %v2256_v31 = vadd.f32 %v2255_v39, %v1110_v24  ;;  %v2277_v26 = vadd.f32 %v2276_v27, %v1111_v33  ;;  %v2339_v22 = vadd.f32 %v2338_v10, %v1106_v1  ;;  %v2360_v32 = vadd.f32 %v2359_v9, %v1107_v62 }
 0x174   : > { %v1113_v43 = vld [vmem:[%s4409_s24 + $0x16d8] sm:$0xff]  ;;  %v1115_v51 = vld [vmem:[%s4409_s24 + $0x16e8] sm:$0xff]  ;;  %v1116_v55 = vld [vmem:[%s4409_s24 + $0x16f0] sm:$0xff]  ;;  %v2401_v14 = vadd.f32 %v2400_v63, %v1101_v5  ;;  %v2298_v12 = vadd.f32 %v2297_v6, %v1112_v46  ;;  %v2381_v17 = vadd.f32 %v2380_v35, %v1108_v7 }
 0x175   : > { %v1118_v34 = vld [vmem:[%s4409_s24 + $0x1700] sm:$0xff]  ;;  %v1119_v3 = vld [vmem:[%s4409_s24 + $0x1708] sm:$0xff]  ;;  %v1120_v16 = vld [vmem:[%s4409_s24 + $0x1710] sm:$0xff]  ;;  %v2319_v25 = vadd.f32 %v2318_v36, %v1113_v43  ;;  %v2340_v1 = vadd.f32 %v2339_v22, %v1114_v61  ;;  %v2361_v62 = vadd.f32 %v2360_v32, %v1115_v51 }
 0x176   : > { %v1117_v52 = vld [vmem:[%s4409_s24 + $0x16f8] sm:$0xff]  ;;  %v1122_v18 = vld [vmem:[%s4409_s24 + $0x1720] sm:$0xff]  ;;  %v1123_v19 = vld [vmem:[%s4409_s24 + $0x1728] sm:$0xff]  ;;  %v2257_v24 = vadd.f32 %v2256_v31, %v1118_v34  ;;  %v2278_v33 = vadd.f32 %v2277_v26, %v1119_v3  ;;  %v2402_v5 = vadd.f32 %v2401_v14, %v1109_v42  ;;  %v2299_v46 = vadd.f32 %v2298_v12, %v1120_v16 }
 0x177   : > { %v1121_v44 = vld [vmem:[%s4409_s24 + $0x1718] sm:$0xff]  ;;  %v1124_v38 = vld [vmem:[%s4409_s24 + $0x1730] sm:$0xff]  ;;  %v1126_v8 = vld [vmem:[%s4409_s24 + $0x1740] sm:$0xff]  ;;  %v2382_v7 = vadd.f32 %v2381_v17, %v1116_v55  ;;  %v2341_v61 = vadd.f32 %v2340_v1, %v1122_v18  ;;  %v2362_v51 = vadd.f32 %v2361_v62, %v1123_v19 }
 0x178   : > { %v1127_v21 = vld [vmem:[%s4409_s24 + $0x1748] sm:$0xff]  ;;  %v1125_v28 = vld [vmem:[%s4409_s24 + $0x1738] sm:$0xff]  ;;  %v1128_v11 = vld [vmem:[%s4409_s24 + $0x1750] sm:$0xff]  ;;  %v2258_v34 = vadd.f32 %v2257_v24, %v1126_v8  ;;  %v2320_v43 = vadd.f32 %v2319_v25, %v1121_v44  ;;  %v2403_v42 = vadd.f32 %v2402_v5, %v1117_v52 }
 0x179   : > { %v1129_v2 = vld [vmem:[%s4409_s24 + $0x1758] sm:$0xff]  ;;  %v1130_v39 = vld [vmem:[%s4409_s24 + $0x1760] sm:$0xff]  ;;  %v1135_v20 = vld [vmem:[%s4409_s24 + $0x1788] sm:$0xff]  ;;  %v2279_v3 = vadd.f32 %v2278_v33, %v1127_v21  ;;  %v2300_v16 = vadd.f32 %v2299_v46, %v1128_v11  ;;  %v2383_v55 = vadd.f32 %v2382_v7, %v1124_v38 }
 0x17a   : > { %v1134_v27 = vld [vmem:[%s4409_s24 + $0x1780] sm:$0xff]  ;;  %v1131_v41 = vld [vmem:[%s4409_s24 + $0x1768] sm:$0xff]  ;;  %v1132_v30 = vld [vmem:[%s4409_s24 + $0x1770] sm:$0xff]  ;;  %v2321_v14 = vadd.f32 %v2320_v43, %v1129_v2  ;;  %v2342_v44 = vadd.f32 %v2341_v61, %v1130_v39  ;;  %v2404_v19 = vadd.f32 %v2403_v42, %v1125_v28 }
 0x17b   : > { %v1133_v10 = vld [vmem:[%s4409_s24 + $0x1778] sm:$0xff]  ;;  %v1136_v9 = vld [vmem:[%s4409_s24 + $0x1790] sm:$0xff]  ;;  %v1142_v63 = vld [vmem:[%s4409_s24 + $0x17c0] sm:$0xff]  ;;  %v2259_v8 = vadd.f32 %v2258_v34, %v1134_v27  ;;  %v2280_v21 = vadd.f32 %v2279_v3, %v1135_v20  ;;  %v2363_v18 = vadd.f32 %v2362_v51, %v1131_v41  ;;  %v2384_v1 = vadd.f32 %v2383_v55, %v1132_v30 }
 0x17c   : > { %v1143_v31 = vld [vmem:[%s4409_s24 + $0x17c8] sm:$0xff]  ;;  %v1137_v26 = vld [vmem:[%s4409_s24 + $0x1798] sm:$0xff]  ;;  %v1138_v6 = vld [vmem:[%s4409_s24 + $0x17a0] sm:$0xff]  ;;  %v2301_v25 = vadd.f32 %v2300_v16, %v1136_v9  ;;  %v2405_v38 = vadd.f32 %v2404_v19, %v1133_v10 }
 0x17d   : > { %v1139_v35 = vld [vmem:[%s4409_s24 + $0x17a8] sm:$0xff]  ;;  %v1140_v36 = vld [vmem:[%s4409_s24 + $0x17b0] sm:$0xff]  ;;  %v1141_v22 = vld [vmem:[%s4409_s24 + $0x17b8] sm:$0xff]  ;;  %v2260_v12 = vadd.f32 %v2259_v8, %v1142_v63  ;;  %v2281_v17 = vadd.f32 %v2280_v21, %v1143_v31  ;;  %v2322_v20 = vadd.f32 %v2321_v14, %v1137_v26  ;;  %v2343_v11 = vadd.f32 %v2342_v44, %v1138_v6 }
 0x17e   : > { %v1144_v32 = vld [vmem:[%s4409_s24 + $0x17d0] sm:$0xff]  ;;  %v1145_v24 = vld [vmem:[%s4409_s24 + $0x17d8] sm:$0xff]  ;;  %v1146_v52 = vld [vmem:[%s4409_s24 + $0x17e0] sm:$0xff]  ;;  %v2364_v62 = vadd.f32 %v2363_v18, %v1139_v35  ;;  %v2385_v46 = vadd.f32 %v2384_v1, %v1140_v36  ;;  %v2406_v7 = vadd.f32 %v2405_v38, %v1141_v22 }
 0x17f   : > { %v1147_v33 = vld [vmem:[%s4409_s24 + $0x17e8] sm:$0xff]  ;;  %v1148_v27 = vld [vmem:[%s4409_s24 + $0x17f0] sm:$0xff]  ;;  %v1149_v5 = vld [vmem:[%s4409_s24 + $0x17f8] sm:$0xff]  ;;  %v2261_v34 = vrot.slane %v2260_v12, 4  ;;  %v2282_v3 = vrot.slane %v2281_v17, 4  ;;  %v2302_v2 = vadd.f32 %v2301_v25, %v1144_v32  ;;  %v2323_v39 = vadd.f32 %v2322_v20, %v1145_v24 }
 0x180   : > { %v2344_v41 = vadd.f32 %v2343_v11, %v1146_v52  ;;  %v2365_v28 = vadd.f32 %v2364_v62, %v1147_v33  ;;  %v2386_v31 = vadd.f32 %v2385_v46, %v1148_v27  ;;  %v2407_v42 = vadd.f32 %v2406_v7, %v1149_v5  ;;  %v1150_v52 = vld [vmem:[%s4409_s24 + $0x1800] sm:$0xff]  ;;  %v1151_v33 = vld [vmem:[%s4409_s24 + $0x1808] sm:$0xff]  ;;  %v1152_v27 = vld [vmem:[%s4409_s24 + $0x1810] sm:$0xff] }
 0x181   : > { %v2262_v43 = vadd.f32 %v2261_v34, %v2260_v12  ;;  %v2283_v61 = vadd.f32 %v2282_v3, %v2281_v17  ;;  %v2303_v63 = vrot.slane %v2302_v2, 4  ;;  %v2324_v9 = vrot.slane %v2323_v39, 4  ;;  %v1158_v20 = vld [vmem:[%s4409_s24 + $0x1840] sm:$0xff]  ;;  %v1159_v11 = vld [vmem:[%s4409_s24 + $0x1848] sm:$0xff]  ;;  %v1160_v62 = vld [vmem:[%s4409_s24 + $0x1850] sm:$0xff] }
 0x182   : > { %v2345_v30 = vrot.slane %v2344_v41, 4  ;;  %v2366_v51 = vrot.slane %v2365_v28, 4  ;;  %v2387_v35 = vrot.slane %v2386_v31, 4  ;;  %v2408_v55 = vrot.slane %v2407_v42, 4  ;;  %v1154_v46 = vld [vmem:[%s4409_s24 + $0x1820] sm:$0xff]  ;;  %v1163_v7 = vld [vmem:[%s4409_s24 + $0x1868] sm:$0xff] }
 0x183   : > { %v2263_v26 = vrot.slane %v2262_v43, 2  ;;  %v2284_v10 = vrot.slane %v2283_v61, 2  ;;  %v2304_v6 = vadd.f32 %v2303_v63, %v2302_v2  ;;  %v2325_v8 = vadd.f32 %v2324_v9, %v2323_v39  ;;  %v1153_v2 = vld [vmem:[%s4409_s24 + $0x1818] sm:$0xff]  ;;  %v1155_v39 = vld [vmem:[%s4409_s24 + $0x1828] sm:$0xff]  ;;  %v1156_v9 = vld [vmem:[%s4409_s24 + $0x1830] sm:$0xff] }
 0x184   : > { %v2346_v21 = vadd.f32 %v2345_v30, %v2344_v41  ;;  %v2367_v16 = vadd.f32 %v2366_v51, %v2365_v28  ;;  %v2388_v14 = vadd.f32 %v2387_v35, %v2386_v31  ;;  %v2409_v24 = vadd.f32 %v2408_v55, %v2407_v42  ;;  %v1161_v41 = vld [vmem:[%s4409_s24 + $0x1858] sm:$0xff]  ;;  %v1162_v28 = vld [vmem:[%s4409_s24 + $0x1860] sm:$0xff]  ;;  %v1164_v30 = vld [vmem:[%s4409_s24 + $0x1870] sm:$0xff] }
 0x185   : > { %v2264_v36 = vadd.f32 %v2263_v26, %v2262_v43  ;;  %v2285_v22 = vadd.f32 %v2284_v10, %v2283_v61  ;;  %v2305_v32 = vrot.slane %v2304_v6, 2  ;;  %v2326_v44 = vrot.slane %v2325_v8, 2  ;;  %v1166_v51 = vld [vmem:[%s4409_s24 + $0x1880] sm:$0xff]  ;;  %v1167_v42 = vld [vmem:[%s4409_s24 + $0x1888] sm:$0xff]  ;;  %v1168_v26 = vld [vmem:[%s4409_s24 + $0x1890] sm:$0xff] }
 0x186   : > { %v2347_v18 = vrot.slane %v2346_v21, 2  ;;  %v2368_v19 = vrot.slane %v2367_v16, 2  ;;  %v2389_v1 = vrot.slane %v2388_v14, 2  ;;  %v2410_v3 = vrot.slane %v2409_v24, 2  ;;  %v1169_v55 = vld [vmem:[%s4409_s24 + $0x1898] sm:$0xff] }
 0x187   : > { %v2265_v12 = vrot.slane %v2264_v36, 1  ;;  %v2286_v17 = vrot.slane %v2285_v22, 1  ;;  %v2306_v25 = vadd.f32 %v2305_v32, %v2304_v6  ;;  %v2327_v38 = vadd.f32 %v2326_v44, %v2325_v8 }
 0x188   : > { %v2348_v5 = vadd.f32 %v2347_v18, %v2346_v21  ;;  %v2369_v34 = vadd.f32 %v2368_v19, %v2367_v16  ;;  %v2390_v31 = vadd.f32 %v2389_v1, %v2388_v14  ;;  %v2411_v8 = vadd.f32 %v2410_v3, %v2409_v24  ;;  %v1157_v21 = vld [vmem:[%s4409_s24 + $0x1838] sm:$0xff]  ;;  %v1172_v19 = vld [vmem:[%s4409_s24 + $0x18b0] sm:$0xff] }
 0x189   : > { %v5286_v43 = vadd.f32 %v2265_v12, %v2264_v36  ;;  %v5288_v61 = vadd.f32 %v2286_v17, %v2285_v22  ;;  %v2307_v63 = vrot.slane %v2306_v25, 1  ;;  %v2328_v10 = vrot.slane %v2327_v38, 1  ;;  %v1165_v16 = vld [vmem:[%s4409_s24 + $0x1878] sm:$0xff]  ;;  %v1170_v36 = vld [vmem:[%s4409_s24 + $0x18a0] sm:$0xff]  ;;  %v1171_v22 = vld [vmem:[%s4409_s24 + $0x18a8] sm:$0xff] }
 0x18a   : > { %v2349_v6 = vrot.slane %v2348_v5, 1  ;;  %v2370_v35 = vrot.slane %v2369_v34, 1  ;;  %v2391_v14 = vrot.slane %v2390_v31, 1  ;;  %v2414_v44 = vadd.f32 %v1158_v20, %v1150_v52  ;;  %v1174_v12 = vld [vmem:[%s4409_s24 + $0x18c0] sm:$0xff]  ;;  %v1175_v17 = vld [vmem:[%s4409_s24 + $0x18c8] sm:$0xff]  ;;  %v1176_v24 = vld [vmem:[%s4409_s24 + $0x18d0] sm:$0xff] }
 0x18b   : > { %6186 = vst [vmem:[#allocation40_spill] sm:$0xff] %v5288_v61  ;;  %v5300_v32 = vadd.f32 %v2307_v63, %v2306_v25  ;;  %v2435_v18 = vadd.f32 %v1159_v11, %v1151_v33  ;;  %v5306_v1 = vadd.f32 %v2328_v10, %v2327_v38  ;;  %v2412_v61 = vrot.slane %v2411_v8, 1  ;;  %v1173_v25 = vld [vmem:[%s4409_s24 + $0x18b8] sm:$0xff]  ;;  %v1178_v52 = vld [vmem:[%s4409_s24 + $0x18e0] sm:$0xff]  ;;  %v1179_v33 = vld [vmem:[%s4409_s24 + $0x18e8] sm:$0xff] }
 0x18c   : > { %v5308_v3 = vadd.f32 %v2349_v6, %v2348_v5  ;;  %v5310_v49 = vadd.f32 %v2370_v35, %v2369_v34  ;;  %v1177_v63 = vld [vmem:[%s4409_s24 + $0x18d8] sm:$0xff]  ;;  %v5316_v20 = vadd.f32 %v2391_v14, %v2390_v31  ;;  %v2415_v11 = vadd.f32 %v2414_v44, %v1166_v51  ;;  %v1180_v38 = vld [vmem:[%s4409_s24 + $0x18f0] sm:$0xff]  ;;  %v1182_v5 = vld [vmem:[%s4409_s24 + $0x1900] sm:$0xff] }
 0x18d   : > { %6187 = vst [vmem:[#allocation41_spill] sm:$0xff] %v5300_v32  ;;  %6188 = vst [vmem:[#allocation42_spill] sm:$0xff] %v5306_v1  ;;  %v2436_v32 = vadd.f32 %v2435_v18, %v1167_v42  ;;  %v2456_v60 = vadd.f32 %v1160_v62, %v1152_v27  ;;  %v1183_v34 = vld [vmem:[%s4409_s24 + $0x1908] sm:$0xff]  ;;  %v1184_v10 = vld [vmem:[%s4409_s24 + $0x1910] sm:$0xff]  ;;  %v5322_v6 = vadd.f32 %v2412_v61, %v2411_v8 }
 0x18e   : > { %6189 = vst [vmem:[#allocation43_spill] sm:$0xff] %v5308_v3  ;;  %6190 = vst [vmem:[#allocation44_spill] sm:$0xff] %v5310_v49  ;;  %v2477_v35 = vadd.f32 %v1161_v41, %v1153_v2  ;;  %v2498_v49 = vadd.f32 %v1162_v28, %v1154_v46  ;;  %v2519_v3 = vadd.f32 %v1163_v7, %v1155_v39  ;;  %v1181_v1 = vld [vmem:[%s4409_s24 + $0x18f8] sm:$0xff]  ;;  %v1186_v51 = vld [vmem:[%s4409_s24 + $0x1920] sm:$0xff] }
 0x18f   : > { %6191 = vst [vmem:[#allocation45_spill] sm:$0xff] %v5316_v20  ;;  %6192 = vst [vmem:[#allocation46_spill] sm:$0xff] %v5322_v6  ;;  %v1185_v31 = vld [vmem:[%s4409_s24 + $0x1918] sm:$0xff]  ;;  %v1187_v27 = vld [vmem:[%s4409_s24 + $0x1928] sm:$0xff]  ;;  %v2416_v62 = vadd.f32 %v2415_v11, %v1174_v12  ;;  %v2437_v42 = vadd.f32 %v2436_v32, %v1175_v17  ;;  %v2457_v14 = vadd.f32 %v2456_v60, %v1168_v26 }
 0x190   : > { %v2540_v44 = vadd.f32 %v1164_v30, %v1156_v9  ;;  %v1188_v18 = vld [vmem:[%s4409_s24 + $0x1930] sm:$0xff]  ;;  %v1190_v20 = vld [vmem:[%s4409_s24 + $0x1940] sm:$0xff]  ;;  %v1191_v61 = vld [vmem:[%s4409_s24 + $0x1948] sm:$0xff]  ;;  %v2478_v46 = vadd.f32 %v2477_v35, %v1169_v55  ;;  %v2499_v39 = vadd.f32 %v2498_v49, %v1170_v36  ;;  %v2520_v41 = vadd.f32 %v2519_v3, %v1171_v22 }
 0x191   : > { %v1192_v2 = vld [vmem:[%s4409_s24 + $0x1950] sm:$0xff]  ;;  %v2561_v28 = vadd.f32 %v1165_v16, %v1157_v21  ;;  %v1189_v7 = vld [vmem:[%s4409_s24 + $0x1938] sm:$0xff]  ;;  %v1194_v12 = vld [vmem:[%s4409_s24 + $0x1960] sm:$0xff]  ;;  %v2417_v9 = vadd.f32 %v2416_v62, %v1182_v5  ;;  %v2438_v30 = vadd.f32 %v2437_v42, %v1183_v34  ;;  %v2458_v26 = vadd.f32 %v2457_v14, %v1176_v24 }
 0x192   : > { %v1193_v8 = vld [vmem:[%s4409_s24 + $0x1958] sm:$0xff]  ;;  %v1195_v60 = vld [vmem:[%s4409_s24 + $0x1968] sm:$0xff]  ;;  %v2541_v32 = vadd.f32 %v2540_v44, %v1172_v19  ;;  %v1196_v17 = vld [vmem:[%s4409_s24 + $0x1970] sm:$0xff]  ;;  %v2479_v21 = vadd.f32 %v2478_v46, %v1177_v63  ;;  %v2500_v16 = vadd.f32 %v2499_v39, %v1178_v52  ;;  %v2521_v36 = vadd.f32 %v2520_v41, %v1179_v33 }
 0x193   : > { %v1198_v11 = vld [vmem:[%s4409_s24 + $0x1980] sm:$0xff]  ;;  %v1199_v55 = vld [vmem:[%s4409_s24 + $0x1988] sm:$0xff]  ;;  %v1200_v49 = vld [vmem:[%s4409_s24 + $0x1990] sm:$0xff]  ;;  %v2562_v22 = vadd.f32 %v2561_v28, %v1173_v25  ;;  %v2418_v19 = vadd.f32 %v2417_v9, %v1190_v20  ;;  %v2439_v34 = vadd.f32 %v2438_v30, %v1191_v61  ;;  %v2459_v62 = vadd.f32 %v2458_v26, %v1184_v10 }
 0x194   : > { %v1197_v3 = vld [vmem:[%s4409_s24 + $0x1978] sm:$0xff]  ;;  %v1202_v5 = vld [vmem:[%s4409_s24 + $0x19a0] sm:$0xff]  ;;  %v1203_v24 = vld [vmem:[%s4409_s24 + $0x19a8] sm:$0xff]  ;;  %v2542_v42 = vadd.f32 %v2541_v32, %v1180_v38  ;;  %v2480_v25 = vadd.f32 %v2479_v21, %v1185_v31  ;;  %v2501_v33 = vadd.f32 %v2500_v16, %v1186_v51  ;;  %v2522_v46 = vadd.f32 %v2521_v36, %v1187_v27 }
 0x195   : > { %v1201_v35 = vld [vmem:[%s4409_s24 + $0x1998] sm:$0xff]  ;;  %v1204_v14 = vld [vmem:[%s4409_s24 + $0x19b0] sm:$0xff]  ;;  %v1206_v44 = vld [vmem:[%s4409_s24 + $0x19c0] sm:$0xff]  ;;  %v2563_v39 = vadd.f32 %v2562_v22, %v1181_v1  ;;  %v2419_v38 = vadd.f32 %v2418_v19, %v1198_v11  ;;  %v2440_v61 = vadd.f32 %v2439_v34, %v1199_v55  ;;  %v2460_v9 = vadd.f32 %v2459_v62, %v1192_v2 }
 0x196   : > { %v1207_v63 = vld [vmem:[%s4409_s24 + $0x19c8] sm:$0xff]  ;;  %v1208_v52 = vld [vmem:[%s4409_s24 + $0x19d0] sm:$0xff]  ;;  %v1205_v41 = vld [vmem:[%s4409_s24 + $0x19b8] sm:$0xff]  ;;  %v2543_v30 = vadd.f32 %v2542_v42, %v1188_v18  ;;  %v2481_v1 = vadd.f32 %v2480_v25, %v1193_v8  ;;  %v2502_v27 = vadd.f32 %v2501_v33, %v1194_v12  ;;  %v2523_v21 = vadd.f32 %v2522_v46, %v1195_v60 }
 0x197   : > { %v1209_v28 = vld [vmem:[%s4409_s24 + $0x19d8] sm:$0xff]  ;;  %v1210_v20 = vld [vmem:[%s4409_s24 + $0x19e0] sm:$0xff]  ;;  %v1211_v10 = vld [vmem:[%s4409_s24 + $0x19e8] sm:$0xff]  ;;  %v2564_v16 = vadd.f32 %v2563_v39, %v1189_v7  ;;  %v2420_v18 = vadd.f32 %v2419_v38, %v1206_v44  ;;  %v2441_v55 = vadd.f32 %v2440_v61, %v1207_v63  ;;  %v2461_v19 = vadd.f32 %v2460_v9, %v1200_v49 }
 0x198   : > { %v1212_v26 = vld [vmem:[%s4409_s24 + $0x19f0] sm:$0xff]  ;;  %v1214_v32 = vld [vmem:[%s4409_s24 + $0x1a00] sm:$0xff]  ;;  %v1215_v31 = vld [vmem:[%s4409_s24 + $0x1a08] sm:$0xff]  ;;  %v2544_v34 = vadd.f32 %v2543_v30, %v1196_v17  ;;  %v2482_v7 = vadd.f32 %v2481_v1, %v1201_v35  ;;  %v2503_v60 = vadd.f32 %v2502_v27, %v1202_v5  ;;  %v2524_v25 = vadd.f32 %v2523_v21, %v1203_v24 }
 0x199   : > { %v1216_v51 = vld [vmem:[%s4409_s24 + $0x1a10] sm:$0xff]  ;;  %v1213_v36 = vld [vmem:[%s4409_s24 + $0x19f8] sm:$0xff]  ;;  %v1218_v11 = vld [vmem:[%s4409_s24 + $0x1a20] sm:$0xff]  ;;  %v2565_v33 = vadd.f32 %v2564_v16, %v1197_v3  ;;  %v2421_v17 = vadd.f32 %v2420_v18, %v1214_v32  ;;  %v2442_v63 = vadd.f32 %v2441_v55, %v1215_v31  ;;  %v2462_v38 = vadd.f32 %v2461_v19, %v1208_v52 }
 0x19a   : > { %v1217_v22 = vld [vmem:[%s4409_s24 + $0x1a18] sm:$0xff]  ;;  %v1219_v2 = vld [vmem:[%s4409_s24 + $0x1a28] sm:$0xff]  ;;  %v1220_v62 = vld [vmem:[%s4409_s24 + $0x1a30] sm:$0xff]  ;;  %v2545_v61 = vadd.f32 %v2544_v34, %v1204_v14  ;;  %v2483_v3 = vadd.f32 %v2482_v7, %v1209_v28  ;;  %v2504_v24 = vadd.f32 %v2503_v60, %v1210_v20  ;;  %v2525_v1 = vadd.f32 %v2524_v25, %v1211_v10 }
 0x19b   : > { %v1222_v42 = vld [vmem:[%s4409_s24 + $0x1a40] sm:$0xff]  ;;  %v1223_v8 = vld [vmem:[%s4409_s24 + $0x1a48] sm:$0xff]  ;;  %v1224_v12 = vld [vmem:[%s4409_s24 + $0x1a50] sm:$0xff]  ;;  %v2566_v27 = vadd.f32 %v2565_v33, %v1205_v41  ;;  %v2463_v18 = vadd.f32 %v2462_v38, %v1216_v51 }
 0x19c   : > { %v1221_v46 = vld [vmem:[%s4409_s24 + $0x1a38] sm:$0xff]  ;;  %v1226_v44 = vld [vmem:[%s4409_s24 + $0x1a60] sm:$0xff]  ;;  %v1227_v49 = vld [vmem:[%s4409_s24 + $0x1a68] sm:$0xff]  ;;  %v2422_v14 = vadd.f32 %v2421_v17, %v1222_v42  ;;  %v2443_v31 = vadd.f32 %v2442_v63, %v1223_v8  ;;  %v2546_v55 = vadd.f32 %v2545_v61, %v1212_v26  ;;  %v2484_v41 = vadd.f32 %v2483_v3, %v1217_v22 }
 0x19d   : > { %v1225_v39 = vld [vmem:[%s4409_s24 + $0x1a58] sm:$0xff]  ;;  %v1228_v9 = vld [vmem:[%s4409_s24 + $0x1a70] sm:$0xff]  ;;  %v1230_v30 = vld [vmem:[%s4409_s24 + $0x1a80] sm:$0xff]  ;;  %v2505_v10 = vadd.f32 %v2504_v24, %v1218_v11  ;;  %v2526_v7 = vadd.f32 %v2525_v1, %v1219_v2  ;;  %v2567_v60 = vadd.f32 %v2566_v27, %v1213_v36  ;;  %v2464_v17 = vadd.f32 %v2463_v18, %v1224_v12 }
 0x19e   : > { %v1231_v35 = vld [vmem:[%s4409_s24 + $0x1a88] sm:$0xff]  ;;  %v1232_v5 = vld [vmem:[%s4409_s24 + $0x1a90] sm:$0xff]  ;;  %v1229_v21 = vld [vmem:[%s4409_s24 + $0x1a78] sm:$0xff]  ;;  %v2423_v26 = vadd.f32 %v2422_v14, %v1230_v30  ;;  %v2547_v63 = vadd.f32 %v2546_v55, %v1220_v62  ;;  %v2485_v36 = vadd.f32 %v2484_v41, %v1225_v39 }
 0x19f   : > { %v1233_v16 = vld [vmem:[%s4409_s24 + $0x1a98] sm:$0xff]  ;;  %v1234_v32 = vld [vmem:[%s4409_s24 + $0x1aa0] sm:$0xff]  ;;  %v1235_v52 = vld [vmem:[%s4409_s24 + $0x1aa8] sm:$0xff]  ;;  %v2444_v8 = vadd.f32 %v2443_v31, %v1231_v35  ;;  %v2506_v2 = vadd.f32 %v2505_v10, %v1226_v44  ;;  %v2527_v3 = vadd.f32 %v2526_v7, %v1227_v49  ;;  %v2568_v24 = vadd.f32 %v2567_v60, %v1221_v46 }
 0x1a0   : > { %v1236_v19 = vld [vmem:[%s4409_s24 + $0x1ab0] sm:$0xff]  ;;  %v1238_v34 = vld [vmem:[%s4409_s24 + $0x1ac0] sm:$0xff]  ;;  %v1239_v28 = vld [vmem:[%s4409_s24 + $0x1ac8] sm:$0xff]  ;;  %v2465_v14 = vadd.f32 %v2464_v17, %v1232_v5  ;;  %v2548_v31 = vadd.f32 %v2547_v63, %v1228_v9  ;;  %v2486_v44 = vadd.f32 %v2485_v36, %v1233_v16 }
 0x1a1   : > { %v1240_v20 = vld [vmem:[%s4409_s24 + $0x1ad0] sm:$0xff]  ;;  %v1237_v25 = vld [vmem:[%s4409_s24 + $0x1ab8] sm:$0xff]  ;;  %v1242_v42 = vld [vmem:[%s4409_s24 + $0x1ae0] sm:$0xff]  ;;  %v2424_v12 = vadd.f32 %v2423_v26, %v1238_v34  ;;  %v2445_v62 = vadd.f32 %v2444_v8, %v1239_v28  ;;  %v2507_v49 = vadd.f32 %v2506_v2, %v1234_v32  ;;  %v2528_v46 = vadd.f32 %v2527_v3, %v1235_v52 }
 0x1a2   : > { %v1241_v33 = vld [vmem:[%s4409_s24 + $0x1ad8] sm:$0xff]  ;;  %v1243_v51 = vld [vmem:[%s4409_s24 + $0x1ae8] sm:$0xff]  ;;  %v1244_v38 = vld [vmem:[%s4409_s24 + $0x1af0] sm:$0xff]  ;;  %v2569_v41 = vadd.f32 %v2568_v24, %v1229_v21  ;;  %v2466_v5 = vadd.f32 %v2465_v14, %v1240_v20  ;;  %v2549_v9 = vadd.f32 %v2548_v31, %v1236_v19 }
 0x1a3   : > { %v1246_v61 = vld [vmem:[%s4409_s24 + $0x1b00] sm:$0xff]  ;;  %v1247_v22 = vld [vmem:[%s4409_s24 + $0x1b08] sm:$0xff]  ;;  %v1248_v11 = vld [vmem:[%s4409_s24 + $0x1b10] sm:$0xff]  ;;  %v2487_v16 = vadd.f32 %v2486_v44, %v1241_v33  ;;  %v2508_v32 = vadd.f32 %v2507_v49, %v1242_v42  ;;  %v2529_v52 = vadd.f32 %v2528_v46, %v1243_v51 }
 0x1a4   : > { %v1245_v1 = vld [vmem:[%s4409_s24 + $0x1af8] sm:$0xff]  ;;  %v1250_v30 = vld [vmem:[%s4409_s24 + $0x1b20] sm:$0xff]  ;;  %v1251_v35 = vld [vmem:[%s4409_s24 + $0x1b28] sm:$0xff]  ;;  %v2425_v34 = vadd.f32 %v2424_v12, %v1246_v61  ;;  %v2446_v28 = vadd.f32 %v2445_v62, %v1247_v22  ;;  %v2570_v21 = vadd.f32 %v2569_v41, %v1237_v25  ;;  %v2467_v20 = vadd.f32 %v2466_v5, %v1248_v11 }
 0x1a5   : > { %v1249_v27 = vld [vmem:[%s4409_s24 + $0x1b18] sm:$0xff]  ;;  %v1252_v18 = vld [vmem:[%s4409_s24 + $0x1b30] sm:$0xff]  ;;  %v1254_v55 = vld [vmem:[%s4409_s24 + $0x1b40] sm:$0xff]  ;;  %v2550_v19 = vadd.f32 %v2549_v9, %v1244_v38  ;;  %v2509_v42 = vadd.f32 %v2508_v32, %v1250_v30  ;;  %v2530_v51 = vadd.f32 %v2529_v52, %v1251_v35 }
 0x1a6   : > { %v1255_v39 = vld [vmem:[%s4409_s24 + $0x1b48] sm:$0xff]  ;;  %v1253_v10 = vld [vmem:[%s4409_s24 + $0x1b38] sm:$0xff]  ;;  %v1256_v7 = vld [vmem:[%s4409_s24 + $0x1b50] sm:$0xff]  ;;  %v2426_v61 = vadd.f32 %v2425_v34, %v1254_v55  ;;  %v2488_v33 = vadd.f32 %v2487_v16, %v1249_v27  ;;  %v2571_v25 = vadd.f32 %v2570_v21, %v1245_v1 }
 0x1a7   : > { %v1257_v60 = vld [vmem:[%s4409_s24 + $0x1b58] sm:$0xff]  ;;  %v1258_v26 = vld [vmem:[%s4409_s24 + $0x1b60] sm:$0xff]  ;;  %v1263_v17 = vld [vmem:[%s4409_s24 + $0x1b88] sm:$0xff]  ;;  %v2447_v22 = vadd.f32 %v2446_v28, %v1255_v39  ;;  %v2468_v11 = vadd.f32 %v2467_v20, %v1256_v7  ;;  %v2551_v38 = vadd.f32 %v2550_v19, %v1252_v18 }
 0x1a8   : > { %v1262_v8 = vld [vmem:[%s4409_s24 + $0x1b80] sm:$0xff]  ;;  %v1259_v63 = vld [vmem:[%s4409_s24 + $0x1b68] sm:$0xff]  ;;  %v1260_v36 = vld [vmem:[%s4409_s24 + $0x1b70] sm:$0xff]  ;;  %v2489_v41 = vadd.f32 %v2488_v33, %v1257_v60  ;;  %v2510_v27 = vadd.f32 %v2509_v42, %v1258_v26  ;;  %v2572_v35 = vadd.f32 %v2571_v25, %v1253_v10 }
 0x1a9   : > { %v1261_v2 = vld [vmem:[%s4409_s24 + $0x1b78] sm:$0xff]  ;;  %v1264_v3 = vld [vmem:[%s4409_s24 + $0x1b90] sm:$0xff]  ;;  %v1270_v24 = vld [vmem:[%s4409_s24 + $0x1bc0] sm:$0xff]  ;;  %v2427_v55 = vadd.f32 %v2426_v61, %v1262_v8  ;;  %v2448_v39 = vadd.f32 %v2447_v22, %v1263_v17  ;;  %v2531_v30 = vadd.f32 %v2530_v51, %v1259_v63  ;;  %v2552_v32 = vadd.f32 %v2551_v38, %v1260_v36 }
 0x1aa   : > { %v1271_v12 = vld [vmem:[%s4409_s24 + $0x1bc8] sm:$0xff]  ;;  %v1265_v62 = vld [vmem:[%s4409_s24 + $0x1b98] sm:$0xff]  ;;  %v1266_v14 = vld [vmem:[%s4409_s24 + $0x1ba0] sm:$0xff]  ;;  %v2469_v16 = vadd.f32 %v2468_v11, %v1264_v3  ;;  %v2573_v18 = vadd.f32 %v2572_v35, %v1261_v2 }
 0x1ab   : > { %v1267_v31 = vld [vmem:[%s4409_s24 + $0x1ba8] sm:$0xff]  ;;  %v1268_v44 = vld [vmem:[%s4409_s24 + $0x1bb0] sm:$0xff]  ;;  %v1269_v49 = vld [vmem:[%s4409_s24 + $0x1bb8] sm:$0xff]  ;;  %v2428_v5 = vadd.f32 %v2427_v55, %v1270_v24  ;;  %v2449_v9 = vadd.f32 %v2448_v39, %v1271_v12  ;;  %v2490_v17 = vadd.f32 %v2489_v41, %v1265_v62  ;;  %v2511_v7 = vadd.f32 %v2510_v27, %v1266_v14 }
 0x1ac   : > { %v1272_v46 = vld [vmem:[%s4409_s24 + $0x1bd0] sm:$0xff]  ;;  %v1273_v34 = vld [vmem:[%s4409_s24 + $0x1bd8] sm:$0xff]  ;;  %v1274_v1 = vld [vmem:[%s4409_s24 + $0x1be0] sm:$0xff]  ;;  %v2532_v52 = vadd.f32 %v2531_v30, %v1267_v31  ;;  %v2553_v20 = vadd.f32 %v2552_v32, %v1268_v44  ;;  %v2574_v19 = vadd.f32 %v2573_v18, %v1269_v49 }
 0x1ad   : > { %v1275_v28 = vld [vmem:[%s4409_s24 + $0x1be8] sm:$0xff]  ;;  %v1276_v8 = vld [vmem:[%s4409_s24 + $0x1bf0] sm:$0xff]  ;;  %v1277_v21 = vld [vmem:[%s4409_s24 + $0x1bf8] sm:$0xff]  ;;  %v2429_v61 = vrot.slane %v2428_v5, 4  ;;  %v2450_v22 = vrot.slane %v2449_v9, 4  ;;  %v2470_v60 = vadd.f32 %v2469_v16, %v1272_v46  ;;  %v2491_v26 = vadd.f32 %v2490_v17, %v1273_v34 }
 0x1ae   : > { %v2512_v63 = vadd.f32 %v2511_v7, %v1274_v1  ;;  %v2533_v10 = vadd.f32 %v2532_v52, %v1275_v28  ;;  %v2554_v12 = vadd.f32 %v2553_v20, %v1276_v8  ;;  %v2575_v25 = vadd.f32 %v2574_v19, %v1277_v21  ;;  %v1278_v1 = vld [vmem:[%s4409_s24 + $0x1c00] sm:$0xff]  ;;  %v1279_v28 = vld [vmem:[%s4409_s24 + $0x1c08] sm:$0xff]  ;;  %v1280_v8 = vld [vmem:[%s4409_s24 + $0x1c10] sm:$0xff] }
 0x1af   : > { %v2430_v33 = vadd.f32 %v2429_v61, %v2428_v5  ;;  %v2451_v42 = vadd.f32 %v2450_v22, %v2449_v9  ;;  %v2471_v24 = vrot.slane %v2470_v60, 4  ;;  %v2492_v3 = vrot.slane %v2491_v26, 4  ;;  %v1286_v17 = vld [vmem:[%s4409_s24 + $0x1c40] sm:$0xff]  ;;  %v1287_v7 = vld [vmem:[%s4409_s24 + $0x1c48] sm:$0xff]  ;;  %v1288_v52 = vld [vmem:[%s4409_s24 + $0x1c50] sm:$0xff] }
 0x1b0   : > { %v2513_v36 = vrot.slane %v2512_v63, 4  ;;  %v2534_v51 = vrot.slane %v2533_v10, 4  ;;  %v2555_v31 = vrot.slane %v2554_v12, 4  ;;  %v2576_v38 = vrot.slane %v2575_v25, 4  ;;  %v1282_v20 = vld [vmem:[%s4409_s24 + $0x1c20] sm:$0xff]  ;;  %v1291_v19 = vld [vmem:[%s4409_s24 + $0x1c68] sm:$0xff] }
 0x1b1   : > { %v2431_v62 = vrot.slane %v2430_v33, 2  ;;  %v2452_v2 = vrot.slane %v2451_v42, 2  ;;  %v2472_v14 = vadd.f32 %v2471_v24, %v2470_v60  ;;  %v2493_v55 = vadd.f32 %v2492_v3, %v2491_v26  ;;  %v1281_v60 = vld [vmem:[%s4409_s24 + $0x1c18] sm:$0xff]  ;;  %v1283_v26 = vld [vmem:[%s4409_s24 + $0x1c28] sm:$0xff]  ;;  %v1284_v3 = vld [vmem:[%s4409_s24 + $0x1c30] sm:$0xff] }
 0x1b2   : > { %v2514_v39 = vadd.f32 %v2513_v36, %v2512_v63  ;;  %v2535_v11 = vadd.f32 %v2534_v51, %v2533_v10  ;;  %v2556_v41 = vadd.f32 %v2555_v31, %v2554_v12  ;;  %v2577_v34 = vadd.f32 %v2576_v38, %v2575_v25  ;;  %v1289_v63 = vld [vmem:[%s4409_s24 + $0x1c58] sm:$0xff]  ;;  %v1290_v10 = vld [vmem:[%s4409_s24 + $0x1c60] sm:$0xff]  ;;  %v1292_v36 = vld [vmem:[%s4409_s24 + $0x1c70] sm:$0xff] }
 0x1b3   : > { %v2432_v44 = vadd.f32 %v2431_v62, %v2430_v33  ;;  %v2453_v49 = vadd.f32 %v2452_v2, %v2451_v42  ;;  %v2473_v46 = vrot.slane %v2472_v14, 2  ;;  %v2494_v27 = vrot.slane %v2493_v55, 2  ;;  %v1294_v51 = vld [vmem:[%s4409_s24 + $0x1c80] sm:$0xff]  ;;  %v1295_v25 = vld [vmem:[%s4409_s24 + $0x1c88] sm:$0xff]  ;;  %v1296_v62 = vld [vmem:[%s4409_s24 + $0x1c90] sm:$0xff] }
 0x1b4   : > { %v2515_v30 = vrot.slane %v2514_v39, 2  ;;  %v2536_v35 = vrot.slane %v2535_v11, 2  ;;  %v2557_v32 = vrot.slane %v2556_v41, 2  ;;  %v2578_v22 = vrot.slane %v2577_v34, 2  ;;  %v1297_v38 = vld [vmem:[%s4409_s24 + $0x1c98] sm:$0xff] }
 0x1b5   : > { %v2433_v5 = vrot.slane %v2432_v44, 1  ;;  %v2454_v9 = vrot.slane %v2453_v49, 1  ;;  %v2474_v16 = vadd.f32 %v2473_v46, %v2472_v14  ;;  %v2495_v18 = vadd.f32 %v2494_v27, %v2493_v55 }
 0x1b6   : > { %v2516_v21 = vadd.f32 %v2515_v30, %v2514_v39  ;;  %v2537_v61 = vadd.f32 %v2536_v35, %v2535_v11  ;;  %v2558_v12 = vadd.f32 %v2557_v32, %v2556_v41  ;;  %v2579_v55 = vadd.f32 %v2578_v22, %v2577_v34  ;;  %v1285_v39 = vld [vmem:[%s4409_s24 + $0x1c38] sm:$0xff]  ;;  %v1300_v35 = vld [vmem:[%s4409_s24 + $0x1cb0] sm:$0xff] }
 0x1b7   : > { %v5430_v33 = vadd.f32 %v2433_v5, %v2432_v44  ;;  %v5432_v42 = vadd.f32 %v2454_v9, %v2453_v49  ;;  %v2475_v24 = vrot.slane %v2474_v16, 1  ;;  %v2496_v2 = vrot.slane %v2495_v18, 1  ;;  %v1293_v11 = vld [vmem:[%s4409_s24 + $0x1c78] sm:$0xff]  ;;  %v1298_v44 = vld [vmem:[%s4409_s24 + $0x1ca0] sm:$0xff]  ;;  %v1299_v49 = vld [vmem:[%s4409_s24 + $0x1ca8] sm:$0xff] }
 0x1b8   : > { %v2517_v14 = vrot.slane %v2516_v21, 1  ;;  %v2538_v31 = vrot.slane %v2537_v61, 1  ;;  %v2559_v41 = vrot.slane %v2558_v12, 1  ;;  %v2582_v27 = vadd.f32 %v1286_v17, %v1278_v1  ;;  %v1302_v5 = vld [vmem:[%s4409_s24 + $0x1cc0] sm:$0xff]  ;;  %v1303_v9 = vld [vmem:[%s4409_s24 + $0x1cc8] sm:$0xff]  ;;  %v1304_v34 = vld [vmem:[%s4409_s24 + $0x1cd0] sm:$0xff] }
 0x1b9   : > { %6193 = vst [vmem:[#allocation47_spill] sm:$0xff] %v5432_v42  ;;  %v5444_v46 = vadd.f32 %v2475_v24, %v2474_v16  ;;  %v2603_v30 = vadd.f32 %v1287_v7, %v1279_v28  ;;  %v5450_v32 = vadd.f32 %v2496_v2, %v2495_v18  ;;  %v2580_v42 = vrot.slane %v2579_v55, 1  ;;  %v1301_v16 = vld [vmem:[%s4409_s24 + $0x1cb8] sm:$0xff]  ;;  %v1306_v1 = vld [vmem:[%s4409_s24 + $0x1ce0] sm:$0xff]  ;;  %v1307_v28 = vld [vmem:[%s4409_s24 + $0x1ce8] sm:$0xff] }
 0x1ba   : > { %v5452_v22 = vadd.f32 %v2517_v14, %v2516_v21  ;;  %v5454_v6 = vadd.f32 %v2538_v31, %v2537_v61  ;;  %v1305_v24 = vld [vmem:[%s4409_s24 + $0x1cd8] sm:$0xff]  ;;  %v5460_v17 = vadd.f32 %v2559_v41, %v2558_v12  ;;  %v2583_v7 = vadd.f32 %v2582_v27, %v1294_v51  ;;  %v1308_v18 = vld [vmem:[%s4409_s24 + $0x1cf0] sm:$0xff]  ;;  %v1310_v21 = vld [vmem:[%s4409_s24 + $0x1d00] sm:$0xff] }
 0x1bb   : > { %6194 = vst [vmem:[#allocation48_spill] sm:$0xff] %v5444_v46  ;;  %6195 = vst [vmem:[#allocation49_spill] sm:$0xff] %v5450_v32  ;;  %v2604_v46 = vadd.f32 %v2603_v30, %v1295_v25  ;;  %v2624_v37 = vadd.f32 %v1288_v52, %v1280_v8  ;;  %v1311_v61 = vld [vmem:[%s4409_s24 + $0x1d08] sm:$0xff]  ;;  %v1312_v2 = vld [vmem:[%s4409_s24 + $0x1d10] sm:$0xff]  ;;  %v5466_v14 = vadd.f32 %v2580_v42, %v2579_v55 }
 0x1bc   : > { %6196 = vst [vmem:[#allocation50_spill] sm:$0xff] %v5452_v22  ;;  %6197 = vst [vmem:[#allocation51_spill] sm:$0xff] %v5454_v6  ;;  %v2645_v31 = vadd.f32 %v1289_v63, %v1281_v60  ;;  %v2666_v6 = vadd.f32 %v1290_v10, %v1282_v20  ;;  %v2687_v22 = vadd.f32 %v1291_v19, %v1283_v26  ;;  %v1309_v32 = vld [vmem:[%s4409_s24 + $0x1cf8] sm:$0xff]  ;;  %v1314_v51 = vld [vmem:[%s4409_s24 + $0x1d20] sm:$0xff] }
 0x1bd   : > { %6198 = vst [vmem:[#allocation52_spill] sm:$0xff] %v5460_v17  ;;  %v1313_v12 = vld [vmem:[%s4409_s24 + $0x1d18] sm:$0xff]  ;;  %v1315_v8 = vld [vmem:[%s4409_s24 + $0x1d28] sm:$0xff]  ;;  %v2584_v52 = vadd.f32 %v2583_v7, %v1302_v5  ;;  %v2605_v25 = vadd.f32 %v2604_v46, %v1303_v9  ;;  %v2625_v41 = vadd.f32 %v2624_v37, %v1296_v62  ;;  %v2708_v27 = vadd.f32 %v1292_v36, %v1284_v3  ;;  %v1316_v30 = vld [vmem:[%s4409_s24 + $0x1d30] sm:$0xff] }
 0x1be   : > { %v1318_v17 = vld [vmem:[%s4409_s24 + $0x1d40] sm:$0xff]  ;;  %v1319_v42 = vld [vmem:[%s4409_s24 + $0x1d48] sm:$0xff]  ;;  %v1320_v60 = vld [vmem:[%s4409_s24 + $0x1d50] sm:$0xff]  ;;  %v2646_v20 = vadd.f32 %v2645_v31, %v1297_v38  ;;  %v2667_v26 = vadd.f32 %v2666_v6, %v1298_v44  ;;  %v2688_v63 = vadd.f32 %v2687_v22, %v1299_v49  ;;  %v2729_v10 = vadd.f32 %v1293_v11, %v1285_v39 }
 0x1bf   : > { %v1317_v19 = vld [vmem:[%s4409_s24 + $0x1d38] sm:$0xff]  ;;  %v1322_v5 = vld [vmem:[%s4409_s24 + $0x1d60] sm:$0xff]  ;;  %v1323_v37 = vld [vmem:[%s4409_s24 + $0x1d68] sm:$0xff]  ;;  %v2585_v3 = vadd.f32 %v2584_v52, %v1310_v21  ;;  %v2606_v36 = vadd.f32 %v2605_v25, %v1311_v61  ;;  %v2626_v62 = vadd.f32 %v2625_v41, %v1304_v34  ;;  %v2709_v46 = vadd.f32 %v2708_v27, %v1300_v35 }
 0x1c0   : > { %v1321_v55 = vld [vmem:[%s4409_s24 + $0x1d58] sm:$0xff]  ;;  %v1324_v9 = vld [vmem:[%s4409_s24 + $0x1d70] sm:$0xff]  ;;  %v1326_v7 = vld [vmem:[%s4409_s24 + $0x1d80] sm:$0xff]  ;;  %v2647_v39 = vadd.f32 %v2646_v20, %v1305_v24  ;;  %v2668_v11 = vadd.f32 %v2667_v26, %v1306_v1  ;;  %v2689_v44 = vadd.f32 %v2688_v63, %v1307_v28  ;;  %v2730_v49 = vadd.f32 %v2729_v10, %v1301_v16 }
 0x1c1   : > { %v1327_v38 = vld [vmem:[%s4409_s24 + $0x1d88] sm:$0xff]  ;;  %v1328_v6 = vld [vmem:[%s4409_s24 + $0x1d90] sm:$0xff]  ;;  %v1325_v22 = vld [vmem:[%s4409_s24 + $0x1d78] sm:$0xff]  ;;  %v2586_v35 = vadd.f32 %v2585_v3, %v1318_v17  ;;  %v2607_v61 = vadd.f32 %v2606_v36, %v1319_v42  ;;  %v2627_v52 = vadd.f32 %v2626_v62, %v1312_v2  ;;  %v2710_v25 = vadd.f32 %v2709_v46, %v1308_v18 }
 0x1c2   : > { %v1329_v31 = vld [vmem:[%s4409_s24 + $0x1d98] sm:$0xff]  ;;  %v1330_v21 = vld [vmem:[%s4409_s24 + $0x1da0] sm:$0xff]  ;;  %v1331_v34 = vld [vmem:[%s4409_s24 + $0x1da8] sm:$0xff]  ;;  %v2648_v16 = vadd.f32 %v2647_v39, %v1313_v12  ;;  %v2669_v28 = vadd.f32 %v2668_v11, %v1314_v51  ;;  %v2690_v20 = vadd.f32 %v2689_v44, %v1315_v8  ;;  %v2731_v26 = vadd.f32 %v2730_v49, %v1309_v32 }
 0x1c3   : > { %v1332_v41 = vld [vmem:[%s4409_s24 + $0x1db0] sm:$0xff]  ;;  %v1334_v27 = vld [vmem:[%s4409_s24 + $0x1dc0] sm:$0xff]  ;;  %v1335_v24 = vld [vmem:[%s4409_s24 + $0x1dc8] sm:$0xff]  ;;  %v2587_v18 = vadd.f32 %v2586_v35, %v1326_v7  ;;  %v2608_v42 = vadd.f32 %v2607_v61, %v1327_v38  ;;  %v2628_v3 = vadd.f32 %v2627_v52, %v1320_v60  ;;  %v2711_v36 = vadd.f32 %v2710_v25, %v1316_v30 }
 0x1c4   : > { %v1336_v1 = vld [vmem:[%s4409_s24 + $0x1dd0] sm:$0xff]  ;;  %v1333_v63 = vld [vmem:[%s4409_s24 + $0x1db8] sm:$0xff]  ;;  %v1338_v17 = vld [vmem:[%s4409_s24 + $0x1de0] sm:$0xff]  ;;  %v2649_v32 = vadd.f32 %v2648_v16, %v1321_v55  ;;  %v2670_v8 = vadd.f32 %v2669_v28, %v1322_v5  ;;  %v2691_v39 = vadd.f32 %v2690_v20, %v1323_v37  ;;  %v2732_v11 = vadd.f32 %v2731_v26, %v1317_v19 }
 0x1c5   : > { %v1337_v10 = vld [vmem:[%s4409_s24 + $0x1dd8] sm:$0xff]  ;;  %v1339_v2 = vld [vmem:[%s4409_s24 + $0x1de8] sm:$0xff]  ;;  %v1340_v62 = vld [vmem:[%s4409_s24 + $0x1df0] sm:$0xff]  ;;  %v2588_v30 = vadd.f32 %v2587_v18, %v1334_v27  ;;  %v2609_v38 = vadd.f32 %v2608_v42, %v1335_v24  ;;  %v2629_v35 = vadd.f32 %v2628_v3, %v1328_v6  ;;  %v2712_v61 = vadd.f32 %v2711_v36, %v1324_v9 }
 0x1c6   : > { %v1342_v46 = vld [vmem:[%s4409_s24 + $0x1e00] sm:$0xff]  ;;  %v1343_v12 = vld [vmem:[%s4409_s24 + $0x1e08] sm:$0xff]  ;;  %v1344_v51 = vld [vmem:[%s4409_s24 + $0x1e10] sm:$0xff]  ;;  %v2650_v19 = vadd.f32 %v2649_v32, %v1329_v31  ;;  %v2671_v37 = vadd.f32 %v2670_v8, %v1330_v21  ;;  %v2692_v16 = vadd.f32 %v2691_v39, %v1331_v34  ;;  %v2733_v28 = vadd.f32 %v2732_v11, %v1325_v22 }
 0x1c7   : > { %v1341_v44 = vld [vmem:[%s4409_s24 + $0x1df8] sm:$0xff]  ;;  %v1346_v7 = vld [vmem:[%s4409_s24 + $0x1e20] sm:$0xff]  ;;  %v1347_v60 = vld [vmem:[%s4409_s24 + $0x1e28] sm:$0xff]  ;;  %v2589_v9 = vadd.f32 %v2588_v30, %v1342_v46  ;;  %v2610_v24 = vadd.f32 %v2609_v38, %v1343_v12  ;;  %v2630_v18 = vadd.f32 %v2629_v35, %v1336_v1  ;;  %v2713_v42 = vadd.f32 %v2712_v61, %v1332_v41 }
 0x1c8   : > { %v1345_v49 = vld [vmem:[%s4409_s24 + $0x1e18] sm:$0xff]  ;;  %v1348_v52 = vld [vmem:[%s4409_s24 + $0x1e30] sm:$0xff]  ;;  %v1350_v25 = vld [vmem:[%s4409_s24 + $0x1e40] sm:$0xff]  ;;  %v2651_v22 = vadd.f32 %v2650_v19, %v1337_v10  ;;  %v2672_v34 = vadd.f32 %v2671_v37, %v1338_v17  ;;  %v2693_v32 = vadd.f32 %v2692_v16, %v1339_v2  ;;  %v2734_v8 = vadd.f32 %v2733_v28, %v1333_v63 }
 0x1c9   : > { %v1351_v55 = vld [vmem:[%s4409_s24 + $0x1e48] sm:$0xff]  ;;  %v1352_v5 = vld [vmem:[%s4409_s24 + $0x1e50] sm:$0xff]  ;;  %v1349_v20 = vld [vmem:[%s4409_s24 + $0x1e38] sm:$0xff]  ;;  %v2590_v41 = vadd.f32 %v2589_v9, %v1350_v25  ;;  %v2631_v30 = vadd.f32 %v2630_v18, %v1344_v51  ;;  %v2714_v38 = vadd.f32 %v2713_v42, %v1340_v62 }
 0x1ca   : > { %v1353_v26 = vld [vmem:[%s4409_s24 + $0x1e58] sm:$0xff]  ;;  %v1354_v27 = vld [vmem:[%s4409_s24 + $0x1e60] sm:$0xff]  ;;  %v1355_v6 = vld [vmem:[%s4409_s24 + $0x1e68] sm:$0xff]  ;;  %v2611_v12 = vadd.f32 %v2610_v24, %v1351_v55  ;;  %v2652_v63 = vadd.f32 %v2651_v22, %v1345_v49  ;;  %v2673_v2 = vadd.f32 %v2672_v34, %v1346_v7  ;;  %v2694_v19 = vadd.f32 %v2693_v32, %v1347_v60 }
 0x1cb   : > { %v1356_v3 = vld [vmem:[%s4409_s24 + $0x1e70] sm:$0xff]  ;;  %v1358_v36 = vld [vmem:[%s4409_s24 + $0x1e80] sm:$0xff]  ;;  %v1359_v31 = vld [vmem:[%s4409_s24 + $0x1e88] sm:$0xff]  ;;  %v2735_v37 = vadd.f32 %v2734_v8, %v1341_v44  ;;  %v2632_v9 = vadd.f32 %v2631_v30, %v1352_v5  ;;  %v2715_v24 = vadd.f32 %v2714_v38, %v1348_v52 }
 0x1cc   : > { %v1360_v21 = vld [vmem:[%s4409_s24 + $0x1e90] sm:$0xff]  ;;  %v1357_v39 = vld [vmem:[%s4409_s24 + $0x1e78] sm:$0xff]  ;;  %v1362_v46 = vld [vmem:[%s4409_s24 + $0x1ea0] sm:$0xff]  ;;  %v2591_v62 = vadd.f32 %v2590_v41, %v1358_v36  ;;  %v2612_v55 = vadd.f32 %v2611_v12, %v1359_v31  ;;  %v2653_v44 = vadd.f32 %v2652_v63, %v1353_v26  ;;  %v2674_v60 = vadd.f32 %v2673_v2, %v1354_v27 }
 0x1cd   : > { %v1361_v11 = vld [vmem:[%s4409_s24 + $0x1e98] sm:$0xff]  ;;  %v1363_v1 = vld [vmem:[%s4409_s24 + $0x1ea8] sm:$0xff]  ;;  %v1364_v35 = vld [vmem:[%s4409_s24 + $0x1eb0] sm:$0xff]  ;;  %v2695_v22 = vadd.f32 %v2694_v19, %v1355_v6  ;;  %v2736_v34 = vadd.f32 %v2735_v37, %v1349_v20  ;;  %v2633_v41 = vadd.f32 %v2632_v9, %v1360_v21  ;;  %v2716_v12 = vadd.f32 %v2715_v24, %v1356_v3 }
 0x1ce   : > { %v1366_v61 = vld [vmem:[%s4409_s24 + $0x1ec0] sm:$0xff]  ;;  %v1367_v10 = vld [vmem:[%s4409_s24 + $0x1ec8] sm:$0xff]  ;;  %v1368_v17 = vld [vmem:[%s4409_s24 + $0x1ed0] sm:$0xff]  ;;  %v2654_v27 = vadd.f32 %v2653_v44, %v1361_v11  ;;  %v2675_v6 = vadd.f32 %v2674_v60, %v1362_v46 }
 0x1cf   : > { %v1365_v16 = vld [vmem:[%s4409_s24 + $0x1eb8] sm:$0xff]  ;;  %v1370_v25 = vld [vmem:[%s4409_s24 + $0x1ee0] sm:$0xff]  ;;  %v1371_v51 = vld [vmem:[%s4409_s24 + $0x1ee8] sm:$0xff]  ;;  %v2592_v5 = vadd.f32 %v2591_v62, %v1366_v61  ;;  %v2613_v52 = vadd.f32 %v2612_v55, %v1367_v10  ;;  %v2696_v20 = vadd.f32 %v2695_v22, %v1363_v1  ;;  %v2737_v63 = vadd.f32 %v2736_v34, %v1357_v39 }
 0x1d0   : > { %v1369_v28 = vld [vmem:[%s4409_s24 + $0x1ed8] sm:$0xff]  ;;  %v1372_v18 = vld [vmem:[%s4409_s24 + $0x1ef0] sm:$0xff]  ;;  %v1374_v42 = vld [vmem:[%s4409_s24 + $0x1f00] sm:$0xff]  ;;  %v2634_v21 = vadd.f32 %v2633_v41, %v1368_v17  ;;  %v2717_v3 = vadd.f32 %v2716_v12, %v1364_v35  ;;  %v2676_v46 = vadd.f32 %v2675_v6, %v1370_v25 }
 0x1d1   : > { %v1375_v49 = vld [vmem:[%s4409_s24 + $0x1f08] sm:$0xff]  ;;  %v1376_v7 = vld [vmem:[%s4409_s24 + $0x1f10] sm:$0xff]  ;;  %v1373_v32 = vld [vmem:[%s4409_s24 + $0x1ef8] sm:$0xff]  ;;  %v2593_v61 = vadd.f32 %v2592_v5, %v1374_v42  ;;  %v2655_v11 = vadd.f32 %v2654_v27, %v1369_v28  ;;  %v2697_v1 = vadd.f32 %v2696_v20, %v1371_v51  ;;  %v2738_v39 = vadd.f32 %v2737_v63, %v1365_v16 }
 0x1d2   : > { %v1377_v8 = vld [vmem:[%s4409_s24 + $0x1f18] sm:$0xff]  ;;  %v1378_v36 = vld [vmem:[%s4409_s24 + $0x1f20] sm:$0xff]  ;;  %v1379_v31 = vld [vmem:[%s4409_s24 + $0x1f28] sm:$0xff]  ;;  %v2614_v10 = vadd.f32 %v2613_v52, %v1375_v49  ;;  %v2635_v17 = vadd.f32 %v2634_v21, %v1376_v7  ;;  %v2718_v35 = vadd.f32 %v2717_v3, %v1372_v18 }
 0x1d3   : > { %v1380_v30 = vld [vmem:[%s4409_s24 + $0x1f30] sm:$0xff]  ;;  %v1382_v38 = vld [vmem:[%s4409_s24 + $0x1f40] sm:$0xff]  ;;  %v1383_v26 = vld [vmem:[%s4409_s24 + $0x1f48] sm:$0xff]  ;;  %v2656_v28 = vadd.f32 %v2655_v11, %v1377_v8  ;;  %v2677_v25 = vadd.f32 %v2676_v46, %v1378_v36  ;;  %v2698_v51 = vadd.f32 %v2697_v1, %v1379_v31  ;;  %v2739_v16 = vadd.f32 %v2738_v39, %v1373_v32 }
 0x1d4   : > { %v1381_v2 = vld [vmem:[%s4409_s24 + $0x1f38] sm:$0xff]  ;;  %v1384_v19 = vld [vmem:[%s4409_s24 + $0x1f50] sm:$0xff]  ;;  %v1386_v62 = vld [vmem:[%s4409_s24 + $0x1f60] sm:$0xff]  ;;  %v2594_v42 = vadd.f32 %v2593_v61, %v1382_v38  ;;  %v2615_v49 = vadd.f32 %v2614_v10, %v1383_v26  ;;  %v2719_v18 = vadd.f32 %v2718_v35, %v1380_v30 }
 0x1d5   : > { %v1385_v37 = vld [vmem:[%s4409_s24 + $0x1f58] sm:$0xff]  ;;  %v1390_v55 = vld [vmem:[%s4409_s24 + $0x1f80] sm:$0xff]  ;;  %v1391_v9 = vld [vmem:[%s4409_s24 + $0x1f88] sm:$0xff]  ;;  %v2636_v7 = vadd.f32 %v2635_v17, %v1384_v19  ;;  %v2678_v8 = vadd.f32 %v2677_v25, %v1386_v62  ;;  %v2740_v31 = vadd.f32 %v2739_v16, %v1381_v2 }
 0x1d6   : > { %v1387_v24 = vld [vmem:[%s4409_s24 + $0x1f68] sm:$0xff]  ;;  %v1388_v44 = vld [vmem:[%s4409_s24 + $0x1f70] sm:$0xff]  ;;  %v1389_v60 = vld [vmem:[%s4409_s24 + $0x1f78] sm:$0xff]  ;;  %v2595_v38 = vadd.f32 %v2594_v42, %v1390_v55  ;;  %v2616_v26 = vadd.f32 %v2615_v49, %v1391_v9  ;;  %v2657_v63 = vadd.f32 %v2656_v28, %v1385_v37 }
 0x1d7   : > { %v1392_v22 = vld [vmem:[%s4409_s24 + $0x1f90] sm:$0xff]  ;;  %v1398_v34 = vld [vmem:[%s4409_s24 + $0x1fc0] sm:$0xff]  ;;  %v1399_v5 = vld [vmem:[%s4409_s24 + $0x1fc8] sm:$0xff]  ;;  %v2699_v36 = vadd.f32 %v2698_v51, %v1387_v24  ;;  %v2720_v46 = vadd.f32 %v2719_v18, %v1388_v44  ;;  %v2741_v30 = vadd.f32 %v2740_v31, %v1389_v60 }
 0x1d8   : > { %v1393_v52 = vld [vmem:[%s4409_s24 + $0x1f98] sm:$0xff]  ;;  %v1394_v41 = vld [vmem:[%s4409_s24 + $0x1fa0] sm:$0xff]  ;;  %v1395_v12 = vld [vmem:[%s4409_s24 + $0x1fa8] sm:$0xff]  ;;  %v2596_v21 = vadd.f32 %v2595_v38, %v1398_v34  ;;  %v2617_v3 = vadd.f32 %v2616_v26, %v1399_v5  ;;  %v2637_v11 = vadd.f32 %v2636_v7, %v1392_v22 }
 0x1d9   : > { %v1396_v27 = vld [vmem:[%s4409_s24 + $0x1fb0] sm:$0xff]  ;;  %v1397_v6 = vld [vmem:[%s4409_s24 + $0x1fb8] sm:$0xff]  ;;  %v1402_v32 = vld [vmem:[%s4409_s24 + $0x1fe0] sm:$0xff]  ;;  %v2658_v9 = vadd.f32 %v2657_v63, %v1393_v52  ;;  %v2679_v19 = vadd.f32 %v2678_v8, %v1394_v41  ;;  %v2700_v1 = vadd.f32 %v2699_v36, %v1395_v12 }
 0x1da   : > { %v1400_v20 = vld [vmem:[%s4409_s24 + $0x1fd0] sm:$0xff]  ;;  %v1401_v61 = vld [vmem:[%s4409_s24 + $0x1fd8] sm:$0xff]  ;;  %v1403_v10 = vld [vmem:[%s4409_s24 + $0x1fe8] sm:$0xff]  ;;  %v2597_v42 = vrot.slane %v2596_v21, 4  ;;  %v2618_v49 = vrot.slane %v2617_v3, 4  ;;  %v2721_v17 = vadd.f32 %v2720_v46, %v1396_v27  ;;  %v2742_v35 = vadd.f32 %v2741_v30, %v1397_v6 }
 0x1db   : > { %v1404_v55 = vld [vmem:[%s4409_s24 + $0x1ff0] sm:$0xff]  ;;  %v1405_v39 = vld [vmem:[%s4409_s24 + $0x1ff8] sm:$0xff]  ;;  %v2638_v37 = vadd.f32 %v2637_v11, %v1400_v20  ;;  %v2659_v62 = vadd.f32 %v2658_v9, %v1401_v61  ;;  %v2680_v24 = vadd.f32 %v2679_v19, %v1402_v32  ;;  %v2701_v2 = vadd.f32 %v2700_v1, %v1403_v10 }
 0x1dc   : > { %v2598_v28 = vadd.f32 %v2597_v42, %v2596_v21  ;;  %v2619_v25 = vadd.f32 %v2618_v49, %v2617_v3  ;;  %v2722_v5 = vadd.f32 %v2721_v17, %v1404_v55  ;;  %v2743_v16 = vadd.f32 %v2742_v35, %v1405_v39 }
 0x1dd   : > { %v2639_v34 = vrot.slane %v2638_v37, 4  ;;  %v2660_v22 = vrot.slane %v2659_v62, 4  ;;  %v2681_v44 = vrot.slane %v2680_v24, 4  ;;  %v2702_v51 = vrot.slane %v2701_v2, 4 }
 0x1de   : > { %v2599_v52 = vrot.slane %v2598_v28, 2  ;;  %v2620_v41 = vrot.slane %v2619_v25, 2  ;;  %v2723_v12 = vrot.slane %v2722_v5, 4  ;;  %v2744_v18 = vrot.slane %v2743_v16, 4 }
 0x1df   : > { %v2640_v60 = vadd.f32 %v2639_v34, %v2638_v37  ;;  %v2661_v38 = vadd.f32 %v2660_v22, %v2659_v62  ;;  %v2682_v26 = vadd.f32 %v2681_v44, %v2680_v24  ;;  %v2703_v7 = vadd.f32 %v2702_v51, %v2701_v2 }
 0x1e0   : > { %v2600_v27 = vadd.f32 %v2599_v52, %v2598_v28  ;;  %v2621_v20 = vadd.f32 %v2620_v41, %v2619_v25  ;;  %v2724_v6 = vadd.f32 %v2723_v12, %v2722_v5  ;;  %v2745_v61 = vadd.f32 %v2744_v18, %v2743_v16  ;;  %v6201_v41 = vld [vmem:[#allocation40_spill] sm:$0xff]  ;;  %v6203_v12 = vld [vmem:[#allocation35_spill] sm:$0xff]  ;;  %v6206_v18 = vld [vmem:[#allocation42_spill] sm:$0xff] }
 0x1e1   : > { %v2641_v63 = vrot.slane %v2640_v60, 2  ;;  %v2662_v8 = vrot.slane %v2661_v38, 2  ;;  %v2683_v36 = vrot.slane %v2682_v26, 2  ;;  %v2704_v31 = vrot.slane %v2703_v7, 2 }
 0x1e2   : > { %v2601_v32 = vrot.slane %v2600_v27, 1  ;;  %v2622_v10 = vrot.slane %v2621_v20, 1  ;;  %v2725_v3 = vrot.slane %v2724_v6, 2  ;;  %v2746_v9 = vrot.slane %v2745_v61, 2 }
 0x1e3   : > { %v2642_v21 = vadd.f32 %v2641_v63, %v2640_v60  ;;  %v2663_v11 = vadd.f32 %v2662_v8, %v2661_v38  ;;  %v2684_v46 = vadd.f32 %v2683_v36, %v2682_v26  ;;  %v2705_v55 = vadd.f32 %v2704_v31, %v2703_v7  ;;  %v6202_v60 = vld [vmem:[#allocation41_spill] sm:$0xff]  ;;  %v6204_v38 = vld [vmem:[#allocation47_spill] sm:$0xff]  ;;  %v6205_v26 = vld [vmem:[#allocation48_spill] sm:$0xff] }
 0x1e4   : > { %v2602_v19 = vadd.f32 %v2601_v32, %v2600_v27  ;;  %v2623_v1 = vadd.f32 %v2622_v10, %v2621_v20  ;;  %v2726_v39 = vadd.f32 %v2725_v3, %v2724_v6  ;;  %v2747_v17 = vadd.f32 %v2746_v9, %v2745_v61  ;;  %v6207_v20 = vld [vmem:[#allocation17_spill] sm:$0xff]  ;;  %v6211_v3 = vld [vmem:[#allocation30_spill] sm:$0xff] }
 0x1e5   : > { %v2643_v30 = vrot.slane %v2642_v21, 1  ;;  %v2664_v42 = vrot.slane %v2663_v11, 1  ;;  %v2685_v49 = vrot.slane %v2684_v46, 1  ;;  %v2706_v37 = vrot.slane %v2705_v55, 1  ;;  %v6208_v63 = vld [vmem:[#allocation21_spill] sm:$0xff] }
 0x1e6   : > { %v2727_v24 = vrot.slane %v2726_v39, 1  ;;  %v2748_v25 = vrot.slane %v2747_v17, 1  ;;  %v2815_v5 = vsel %vm2814_vm0, %v4710_v48, %v4574_v56  ;;  %v2828_v16 = vsel %vm2814_vm0, %v4712_v47, %v4576_v57  ;;  %v6209_v31 = vld [vmem:[#allocation49_spill] sm:$0xff] }
 0x1e7   : > { %v2644_v62 = vadd.f32 %v2643_v30, %v2642_v21  ;;  %v2665_v2 = vadd.f32 %v2664_v42, %v2663_v11  ;;  %v2686_v35 = vadd.f32 %v2685_v49, %v2684_v46  ;;  %v5562_v28 = vadd.f32 %v2706_v37, %v2705_v55  ;;  %v6210_v32 = vld [vmem:[#allocation25_spill] sm:$0xff]  ;;  %v6212_v46 = vld [vmem:[#allocation18_spill] sm:$0xff]  ;;  %v6215_v30 = vld [vmem:[#allocation23_spill] sm:$0xff] }
 0x1e8   : > { %v5564_v34 = vadd.f32 %v2727_v24, %v2726_v39  ;;  %v5569_v22 = vadd.f32 %v2748_v25, %v2747_v17  ;;  %v2817_v44 = vsel %vm2816_vm1, %v4854_v53, %v2815_v5  ;;  %v2835_v56 = vsel %vm2814_vm0, %v4724_v4, %v4578_v58  ;;  %v6213_v55 = vld [vmem:[#allocation22_spill] sm:$0xff]  ;;  %v6216_v39 = vld [vmem:[#allocation36_spill] sm:$0xff]  ;;  %v6218_v17 = vld [vmem:[#allocation27_spill] sm:$0xff] }
 0x1e9   : > { %v2819_v51 = vsel %vm2818_vm2, %v4998_v45, %v2817_v44  ;;  %v2829_v53 = vsel %vm2816_vm1, %v4856_v40, %v2828_v16  ;;  %v2836_v52 = vsel %vm2816_vm1, %v4868_v15, %v2835_v56  ;;  %v2842_v45 = vsel %vm2814_vm0, %v4730_v13, %v4584_v0  ;;  %v6200_v13 = vld [vmem:[#allocation29_spill] sm:$0xff]  ;;  %v6217_v49 = vld [vmem:[#allocation26_spill] sm:$0xff]  ;;  %v6219_v24 = vld [vmem:[#allocation20_spill] sm:$0xff] }
 0x1ea   : > { %v2821_v48 = vsel %vm2820_vm3, %v5142_v29, %v2819_v51  ;;  %v2830_v47 = vsel %vm2818_vm2, %v5000_v50, %v2829_v53  ;;  %v2837_v58 = vsel %vm2818_vm2, %v5012_v54, %v2836_v52  ;;  %v2843_v4 = vsel %vm2816_vm1, %v4874_v59, %v2842_v45  ;;  %v6199_v29 = vld [vmem:[#allocation34_spill] sm:$0xff]  ;;  %v374_v5 = vld [vmem:[#allocation2] sm:$0xff] }
 0x1eb   : > { %v2823_v57 = vsel %vm2822_vm4, %v5286_v43, %v2821_v48  ;;  %v2831_v15 = vsel %vm2820_vm3, %v5144_v23, %v2830_v47  ;;  %v2838_v0 = vsel %vm2820_vm3, %v6199_v29, %v2837_v58  ;;  %v2844_v43 = vsel %vm2818_vm2, %v6200_v13, %v2843_v4  ;;  %v6221_v44 = vld [vmem:[#allocation43_spill] sm:$0xff]  ;;  %v6223_v48 = vld [vmem:[#allocation32_spill] sm:$0xff]  ;;  %v6225_v47 = vld [vmem:[#allocation50_spill] sm:$0xff] }
 0x1ec   : > { %v2825_v40 = vsel %vm2824_vm5, %v5430_v33, %v2823_v57  ;;  %v2832_v54 = vsel %vm2822_vm4, %v6201_v41, %v2831_v15  ;;  %v2839_v59 = vsel %vm2822_vm4, %v6202_v60, %v2838_v0  ;;  %v2845_v33 = vsel %vm2820_vm3, %v6203_v12, %v2844_v43  ;;  %v6222_v16 = vld [vmem:[#allocation31_spill] sm:$0xff]  ;;  %v6224_v52 = vld [vmem:[#allocation28_spill] sm:$0xff]  ;;  %v6226_v4 = vld [vmem:[#allocation37_spill] sm:$0xff] }
 0x1ed   : > { %v2827_v50 = vsel %vm2826_vm6, %v2602_v19, %v2825_v40  ;;  %v2833_v23 = vsel %vm2824_vm5, %v6204_v38, %v2832_v54  ;;  %v2840_v7 = vsel %vm2824_vm5, %v6205_v26, %v2839_v59  ;;  %v2846_v27 = vsel %vm2822_vm4, %v6206_v18, %v2845_v33  ;;  %v6214_v19 = vld [vmem:[#allocation19_spill] sm:$0xff]  ;;  %v375_v57 = vld [vmem:[#allocation2 + $0x8] sm:$0xff]  ;;  %v6227_v15 = vld [vmem:[#allocation38_spill] sm:$0xff] }
 0x1ee   : > { %v2849_v6 = vsel %vm2814_vm0, %v6208_v63, %v6207_v20  ;;  %v2834_v8 = vsel %vm2826_vm6, %v2623_v1, %v2833_v23  ;;  %v2841_v36 = vsel %vm2826_vm6, %v2644_v62, %v2840_v7  ;;  %v2847_v61 = vsel %vm2824_vm5, %v6209_v31, %v2846_v27  ;;  %v6228_v0 = vld [vmem:[#allocation33_spill] sm:$0xff]  ;;  %v377_v41 = vld [vmem:[#allocation2 + $0x18] sm:$0xff]  ;;  %v378_v54 = vld [vmem:[#allocation2 + $0x20] sm:$0xff] }
 0x1ef   : > { %v2850_v10 = vsel %vm2816_vm1, %v6210_v32, %v2849_v6  ;;  %v2848_v21 = vsel %vm2826_vm6, %v2665_v2, %v2847_v61  ;;  %v2856_v9 = vsel %vm2814_vm0, %v6213_v55, %v6212_v46  ;;  %v2863_v1 = vsel %vm2814_vm0, %v6215_v30, %v6214_v19  ;;  %v6220_v2 = vld [vmem:[#allocation24_spill] sm:$0xff]  ;;  %v376_v43 = vld [vmem:[#allocation2 + $0x10] sm:$0xff]  ;;  %v6231_v23 = vld [vmem:[#allocation39_spill] sm:$0xff] }
 0x1f0   : > { %v2851_v11 = vsel %vm2818_vm2, %v6211_v3, %v2850_v10  ;;  %v2857_v37 = vsel %vm2816_vm1, %v6217_v49, %v2856_v9  ;;  %v2864_v62 = vsel %vm2816_vm1, %v6218_v17, %v2863_v1  ;;  %v2870_v25 = vsel %vm2814_vm0, %v6220_v2, %v6219_v24  ;;  %v6229_v59 = vld [vmem:[#allocation44_spill] sm:$0xff]  ;;  %v6230_v33 = vld [vmem:[#allocation45_spill] sm:$0xff]  ;;  %v381_v27 = vld [vmem:[#allocation2 + $0x38] sm:$0xff] }
 0x1f1   : > { %v2852_v42 = vsel %vm2820_vm3, %v6216_v39, %v2851_v11  ;;  %v2858_v56 = vsel %vm2818_vm2, %v6222_v16, %v2857_v37  ;;  %v2865_v53 = vsel %vm2818_vm2, %v6223_v48, %v2864_v62  ;;  %v2871_v45 = vsel %vm2816_vm1, %v6224_v52, %v2870_v25  ;;  %v379_v7 = vld [vmem:[#allocation2 + $0x28] sm:$0xff]  ;;  %v380_v18 = vld [vmem:[#allocation2 + $0x30] sm:$0xff]  ;;  %v6232_v20 = vld [vmem:[#allocation51_spill] sm:$0xff] }
 0x1f2   : > { %v2853_v51 = vsel %vm2822_vm4, %v6221_v44, %v2852_v42  ;;  %v2859_v40 = vsel %vm2820_vm3, %v6226_v4, %v2858_v56  ;;  %v2866_v29 = vsel %vm2820_vm3, %v6227_v15, %v2865_v53  ;;  %v2872_v13 = vsel %vm2818_vm2, %v6228_v0, %v2871_v45  ;;  %v6233_v6 = vld [vmem:[#allocation52_spill] sm:$0xff]  ;;  %v6234_v61 = vld [vmem:[#allocation46_spill] sm:$0xff] }
 0x1f3   : > { %v2854_v58 = vsel %vm2824_vm5, %v6225_v47, %v2853_v51  ;;  %v2860_v12 = vsel %vm2822_vm4, %v6229_v59, %v2859_v40  ;;  %v2867_v38 = vsel %vm2822_vm4, %v6230_v33, %v2866_v29  ;;  %v2873_v26 = vsel %vm2820_vm3, %v6231_v23, %v2872_v13  ;;  %v2953_v37 = vld [vmem:[%s6139_s1 + $0x100] sm:$0xff] (!%p3637_p10)  ;;  %v2954_v17 = vld [vmem:[%s6139_s1 + $0x108] sm:$0xff] (!%p3637_p10)  ;;  %v2939_v62 = vld [vmem:[%s6139_s1 + $0x90] sm:$0xff] (!%p3637_p10) }
 0x1f4   : > { %v2855_v60 = vsel %vm2826_vm6, %v2686_v35, %v2854_v58  ;;  %v2861_v63 = vsel %vm2824_vm5, %v6232_v20, %v2860_v12  ;;  %v2868_v31 = vsel %vm2824_vm5, %v6233_v6, %v2867_v38  ;;  %v2874_v35 = vsel %vm2822_vm4, %v6234_v61, %v2873_v26  ;;  %v2940_v2 = vld [vmem:[%s6139_s1 + $0x98] sm:$0xff] (!%p3637_p10)  ;;  %v2923_v25 = vld [vmem:[%s6139_s1 + $0x10] sm:$0xff] (!%p3637_p10)  ;;  %v2941_v45 = vld [vmem:[%s6139_s1 + $0xa0] sm:$0xff] (!%p3637_p10) }
 0x1f5   : > { %v2885_v32 = vadd.f32 %v2827_v50, %v374_v5  ;;  %v2862_v10 = vsel %vm2826_vm6, %v5562_v28, %v2861_v63  ;;  %v2869_v3 = vsel %vm2826_vm6, %v5564_v34, %v2868_v31  ;;  %v2875_v11 = vsel %vm2824_vm5, %v5466_v14, %v2874_v35  ;;  %2904 = sbr.rel (%p3637_p10) target bundleno = 1554 (0x612), region = 68  ;;  %v2937_v14 = vld [vmem:[%s6139_s1 + $0x80] sm:$0xff] (!%p3637_p10)  ;;  %v2938_v28 = vld [vmem:[%s6139_s1 + $0x88] sm:$0xff] (!%p3637_p10)  ;;  %v2924_v5 = vld [vmem:[%s6139_s1 + $0x18] sm:$0xff] (!%p3637_p10) }
 0x1f6   : > { %v2886_v46 = vadd.f32 %v2834_v8, %v375_v57  ;;  %v2876_v55 = vsel %vm2826_vm6, %v5569_v22, %v2875_v11  ;;  %v2887_v9 = vadd.f32 %v2841_v36, %v376_v43  ;;  %v2888_v19 = vadd.f32 %v2848_v21, %v377_v41  ;;  %v2921_v34 = vld [vmem:[%s6139_s1] sm:$0xff] (!%p3637_p10)  ;;  %v2922_v8 = vld [vmem:[%s6139_s1 + $0x8] sm:$0xff] (!%p3637_p10)  ;;  %v2971_v16 = vld [vmem:[%s6139_s1 + $0x190] sm:$0xff] (!%p3637_p10) }
 0x1f7   : > { %v2889_v30 = vadd.f32 %v2855_v60, %v378_v54  ;;  %2893 = vst [vmem:[#allocation2] sm:$0xff] %v2885_v32  ;;  %v2890_v1 = vadd.f32 %v2862_v10, %v379_v7  ;;  %v2891_v39 = vadd.f32 %v2869_v3, %v380_v18  ;;  %v2892_v50 = vadd.f32 %v2876_v55, %v381_v27  ;;  %v2969_v36 = vld [vmem:[%s6139_s1 + $0x180] sm:$0xff] (!%p3637_p10)  ;;  %v2970_v21 = vld [vmem:[%s6139_s1 + $0x188] sm:$0xff] (!%p3637_p10)  ;;  %v2972_v56 = vld [vmem:[%s6139_s1 + $0x198] sm:$0xff] (!%p3637_p10) }
 0x1f8   : > { %2894 = vst [vmem:[#allocation2 + $0x8] sm:$0xff] %v2886_v46  ;;  %2895 = vst [vmem:[#allocation2 + $0x10] sm:$0xff] %v2887_v9  ;;  %v3821_v22 = vpack.c.bf16 (!%p3637_p10), %v2938_v28, %v2937_v14  ;;  %v3823_v42 = vpack.c.bf16 (!%p3637_p10), %v2922_v8, %v2921_v34  ;;  %v3853_v49 = vpack.c.bf16 (!%p3637_p10), %v2970_v21, %v2969_v36  ;;  %v2955_v48 = vld [vmem:[%s6139_s1 + $0x110] sm:$0xff] (!%p3637_p10)  ;;  %v2956_v52 = vld [vmem:[%s6139_s1 + $0x118] sm:$0xff] (!%p3637_p10) }
 0x1f9   : > { %2896 = vst [vmem:[#allocation2 + $0x18] sm:$0xff] %v2888_v19  ;;  %2897 = vst [vmem:[#allocation2 + $0x20] sm:$0xff] %v2889_v30  ;;  %v3855_v24 = vpack.c.bf16 (!%p3637_p10), %v2954_v17, %v2953_v37  ;;  %v3825_v44 = vpack.c.bf16 (!%p3637_p10), %v2940_v2, %v2939_v62  ;;  %v3827_v51 = vpack.c.bf16 (!%p3637_p10), %v2924_v5, %v2923_v25  ;;  %v2942_v57 = vld [vmem:[%s6139_s1 + $0xa8] sm:$0xff] (!%p3637_p10)  ;;  %v2925_v4 = vld [vmem:[%s6139_s1 + $0x20] sm:$0xff] (!%p3637_p10) }
 0x1fa   : > { %2898 = vst [vmem:[#allocation2 + $0x28] sm:$0xff] %v2890_v1  ;;  %2899 = vst [vmem:[#allocation2 + $0x30] sm:$0xff] %v2891_v39  ;;  %3822 = vmatprep.subr.bf16.mxu0 (!%p3637_p10), %v3821_v22  ;;  %3854 = vmatprep.subr.bf16.mxu1 (!%p3637_p10), %v3853_v49  ;;  %v3857_v53 = vpack.c.bf16 (!%p3637_p10), %v2972_v56, %v2971_v16  ;;  %v3859_v47 = vpack.c.bf16 (!%p3637_p10), %v2956_v52, %v2955_v48  ;;  %v2926_v40 = vld [vmem:[%s6139_s1 + $0x28] sm:$0xff] (!%p3637_p10)  ;;  %v2973_v15 = vld [vmem:[%s6139_s1 + $0x1a0] sm:$0xff] (!%p3637_p10) }
 0x1fb   : > { %2900 = vst [vmem:[#allocation2 + $0x38] sm:$0xff] %v2892_v50  ;;  %3824 = vmatpush3.bf16.msra.mxu0 (!%p3637_p10), %v3823_v42  ;;  %3856 = vmatpush3.bf16.msra.mxu1 (!%p3637_p10), %v3855_v24  ;;  %v3829_v58 = vpack.c.bf16 (!%p3637_p10), %v2942_v57, %v2941_v45  ;;  %v2974_v29 = vld [vmem:[%s6139_s1 + $0x1a8] sm:$0xff] (!%p3637_p10)  ;;  %v2957_v0 = vld [vmem:[%s6139_s1 + $0x120] sm:$0xff] (!%p3637_p10)  ;;  %v3831_v43 = vpack.c.bf16 (!%p3637_p10), %v2926_v40, %v2925_v4  ;;  %v2943_v54 = vld [vmem:[%s6139_s1 + $0xb0] sm:$0xff] (!%p3637_p10) }
 0x1fc   : > { %3826 = vmatprep.subr.bf16.mxu0 %v3825_v44  ;;  %3858 = vmatprep.subr.bf16.mxu1 %v3857_v53  ;;  %v2958_v13 = vld [vmem:[%s6139_s1 + $0x128] sm:$0xff]  ;;  %v3861_v41 = vpack.c.bf16 %v2974_v29, %v2973_v15  ;;  %v2944_v60 = vld [vmem:[%s6139_s1 + $0xb8] sm:$0xff]  ;;  %v2927_v59 = vld [vmem:[%s6139_s1 + $0x30] sm:$0xff] }
 0x1fd   : > { %v3863_v12 = vpack.c.bf16 %v2958_v13, %v2957_v0  ;;  %v3833_v33 = vpack.c.bf16 %v2944_v60, %v2943_v54  ;;  %v2928_v38 = vld [vmem:[%s6139_s1 + $0x38] sm:$0xff]  ;;  %v2975_v23 = vld [vmem:[%s6139_s1 + $0x1b0] sm:$0xff]  ;;  %v2945_v20 = vld [vmem:[%s6139_s1 + $0xc0] sm:$0xff] }
 0x1fe   : > { %v2976_v26 = vld [vmem:[%s6139_s1 + $0x1b8] sm:$0xff]  ;;  %v2959_v18 = vld [vmem:[%s6139_s1 + $0x130] sm:$0xff]  ;;  %v2946_v63 = vld [vmem:[%s6139_s1 + $0xc8] sm:$0xff]  ;;  %v3835_v6 = vpack.c.bf16 %v2928_v38, %v2927_v59 }
 0x1ff   : > { %3828 = vmatpush3.bf16.msra.mxu0 %v3827_v51  ;;  %3860 = vmatpush3.bf16.msra.mxu1 %v3859_v47  ;;  %v3865_v7 = vpack.c.bf16 %v2976_v26, %v2975_v23  ;;  %v2960_v27 = vld [vmem:[%s6139_s1 + $0x138] sm:$0xff]  ;;  %v2977_v31 = vld [vmem:[%s6139_s1 + $0x1c0] sm:$0xff]  ;;  %v2978_v61 = vld [vmem:[%s6139_s1 + $0x1c8] sm:$0xff]  ;;  %v3837_v32 = vpack.c.bf16 %v2946_v63, %v2945_v20 }
 0x200   : > { %3830 = vmatprep.subr.bf16.mxu0 %v3829_v58  ;;  %3862 = vmatprep.subr.bf16.mxu1 %v3861_v41  ;;  %v3867_v35 = vpack.c.bf16 %v2960_v27, %v2959_v18  ;;  %v2929_v10 = vld [vmem:[%s6139_s1 + $0x40] sm:$0xff]  ;;  %v2930_v3 = vld [vmem:[%s6139_s1 + $0x48] sm:$0xff]  ;;  %v3869_v46 = vpack.c.bf16 %v2978_v61, %v2977_v31  ;;  %v2947_v9 = vld [vmem:[%s6139_s1 + $0xd0] sm:$0xff] }
 0x201   : > { %v2961_v11 = vld [vmem:[%s6139_s1 + $0x140] sm:$0xff]  ;;  %v2962_v55 = vld [vmem:[%s6139_s1 + $0x148] sm:$0xff]  ;;  %v2948_v19 = vld [vmem:[%s6139_s1 + $0xd8] sm:$0xff]  ;;  %v3839_v39 = vpack.c.bf16 %v2930_v3, %v2929_v10 }
 0x202   : > { %v2979_v30 = vld [vmem:[%s6139_s1 + $0x1d0] sm:$0xff]  ;;  %v2980_v1 = vld [vmem:[%s6139_s1 + $0x1d8] sm:$0xff]  ;;  %v3871_v50 = vpack.c.bf16 %v2962_v55, %v2961_v11  ;;  %v3841_v14 = vpack.c.bf16 %v2948_v19, %v2947_v9  ;;  %v2949_v21 = vld [vmem:[%s6139_s1 + $0xe0] sm:$0xff] }
 0x203   : > { %3832 = vmatpush3.bf16.msra.mxu0 %v3831_v43  ;;  %3864 = vmatpush3.bf16.msra.mxu1 %v3863_v12  ;;  %v2931_v28 = vld [vmem:[%s6139_s1 + $0x50] sm:$0xff]  ;;  %v2932_v34 = vld [vmem:[%s6139_s1 + $0x58] sm:$0xff]  ;;  %v3873_v8 = vpack.c.bf16 %v2980_v1, %v2979_v30  ;;  %v2950_v42 = vld [vmem:[%s6139_s1 + $0xe8] sm:$0xff] }
 0x204   : > { %3834 = vmatprep.subr.bf16.mxu0 %v3833_v33  ;;  %3866 = vmatprep.subr.bf16.mxu1 %v3865_v7  ;;  %v2963_v22 = vld [vmem:[%s6139_s1 + $0x150] sm:$0xff]  ;;  %v2964_v36 = vld [vmem:[%s6139_s1 + $0x158] sm:$0xff]  ;;  %v2981_v49 = vld [vmem:[%s6139_s1 + $0x1e0] sm:$0xff]  ;;  %v3843_v17 = vpack.c.bf16 %v2932_v34, %v2931_v28  ;;  %v3845_v25 = vpack.c.bf16 %v2950_v42, %v2949_v21 }
 0x205   : > { %v2982_v37 = vld [vmem:[%s6139_s1 + $0x1e8] sm:$0xff]  ;;  %v2933_v62 = vld [vmem:[%s6139_s1 + $0x60] sm:$0xff]  ;;  %v3875_v2 = vpack.c.bf16 %v2964_v36, %v2963_v22  ;;  %v2951_v56 = vld [vmem:[%s6139_s1 + $0xf0] sm:$0xff] }
 0x206   : > { %v2934_v24 = vld [vmem:[%s6139_s1 + $0x68] sm:$0xff]  ;;  %v2965_v5 = vld [vmem:[%s6139_s1 + $0x160] sm:$0xff]  ;;  %v3877_v16 = vpack.c.bf16 %v2982_v37, %v2981_v49  ;;  %v2952_v48 = vld [vmem:[%s6139_s1 + $0xf8] sm:$0xff] }
 0x207   : > { %3836 = vmatpush3.bf16.msra.mxu0 %v3835_v6  ;;  %3868 = vmatpush3.bf16.msra.mxu1 %v3867_v35  ;;  %v2966_v44 = vld [vmem:[%s6139_s1 + $0x168] sm:$0xff]  ;;  %v2908_v52 = vld [vmem:[#allocation2 + $0x18] sm:$0xff]  ;;  %v2983_v45 = vld [vmem:[%s6139_s1 + $0x1f0] sm:$0xff]  ;;  %v3847_v58 = vpack.c.bf16 %v2934_v24, %v2933_v62  ;;  %v3849_v40 = vpack.c.bf16 %v2952_v48, %v2951_v56 }
 0x208   : > { %3838 = vmatprep.subr.bf16.mxu0 %v3837_v32  ;;  %3870 = vmatprep.subr.bf16.mxu1 %v3869_v46  ;;  %v2906_v51 = vld [vmem:[#allocation2 + $0x8] sm:$0xff]  ;;  %v2984_v57 = vld [vmem:[%s6139_s1 + $0x1f8] sm:$0xff]  ;;  %v2916_v47 = vmul.f32 0.00390625, %v2908_v52  ;;  %v3879_v4 = vpack.c.bf16 %v2966_v44, %v2965_v5  ;;  %v2935_v15 = vld [vmem:[%s6139_s1 + $0x70] sm:$0xff] }
 0x209   : > { %v2914_v53 = vmul.f32 0.00390625, %v2906_v51  ;;  %v2936_v29 = vld [vmem:[%s6139_s1 + $0x78] sm:$0xff]  ;;  %v2967_v0 = vld [vmem:[%s6139_s1 + $0x170] sm:$0xff]  ;;  %v3881_v13 = vpack.c.bf16 %v2984_v57, %v2983_v45  ;;  %v3001_v41 = vld [vmem:[%s6139_s1 + $0x280] sm:$0xff] }
 0x20a   : > { %v2968_v43 = vld [vmem:[%s6139_s1 + $0x178] sm:$0xff]  ;;  %v3002_v54 = vld [vmem:[%s6139_s1 + $0x288] sm:$0xff]  ;;  %3190 = vmatprep.mubr.f32.mxu1 %v2916_v47  ;;  %v3033_v60 = vld [vmem:[%s6139_s1 + $0x380] sm:$0xff]  ;;  %v3851_v12 = vpack.c.bf16 %v2936_v29, %v2935_v15 }
 0x20b   : > { %3840 = vmatpush3.bf16.msra.mxu0 %v3839_v39  ;;  %3872 = vmatpush3.bf16.msra.mxu1 %v3871_v50  ;;  %v3034_v59 = vld [vmem:[%s6139_s1 + $0x388] sm:$0xff]  ;;  %v2905_v33 = vld [vmem:[#allocation2] sm:$0xff]  ;;  %v3883_v23 = vpack.c.bf16 %v2968_v43, %v2967_v0  ;;  %v3885_v26 = vpack.c.bf16 %v3002_v54, %v3001_v41  ;;  %v2907_v18 = vld [vmem:[#allocation2 + $0x10] sm:$0xff] }
 0x20c   : > { %3842 = vmatprep.subr.bf16.mxu0 %v3841_v14  ;;  %3874 = vmatprep.subr.bf16.mxu1 %v3873_v8  ;;  %v2985_v38 = vld [vmem:[%s6139_s1 + $0x200] sm:$0xff]  ;;  %v2986_v7 = vld [vmem:[%s6139_s1 + $0x208] sm:$0xff]  ;;  %v3917_v20 = vpack.c.bf16 %v3034_v59, %v3033_v60  ;;  %v3003_v6 = vld [vmem:[%s6139_s1 + $0x290] sm:$0xff]  ;;  %v2913_v61 = vmul.f32 0.00390625, %v2905_v33  ;;  %v2915_v3 = vmul.f32 0.00390625, %v2907_v18 }
 0x20d   : > { %3120 = vmatprep.mubr.f32.mxu0 %v2914_v53  ;;  %v3017_v27 = vld [vmem:[%s6139_s1 + $0x300] sm:$0xff]  ;;  %v3018_v63 = vld [vmem:[%s6139_s1 + $0x308] sm:$0xff]  ;;  %v3004_v31 = vld [vmem:[%s6139_s1 + $0x298] sm:$0xff]  ;;  %v3887_v10 = vpack.c.bf16 %v2986_v7, %v2985_v38 }
 0x20e   : > { %v3035_v35 = vld [vmem:[%s6139_s1 + $0x390] sm:$0xff]  ;;  %v3036_v32 = vld [vmem:[%s6139_s1 + $0x398] sm:$0xff]  ;;  %v3919_v11 = vpack.c.bf16 %v3018_v63, %v3017_v27  ;;  %v3889_v46 = vpack.c.bf16 %v3004_v31, %v3003_v6  ;;  %v3005_v39 = vld [vmem:[%s6139_s1 + $0x2a0] sm:$0xff] }
 0x20f   : > { %3844 = vmatpush3.bf16.msra.mxu0 %v3843_v17  ;;  %3876 = vmatpush3.bf16.msra.mxu1 %v3875_v2  ;;  %v2987_v55 = vld [vmem:[%s6139_s1 + $0x210] sm:$0xff]  ;;  %v2988_v9 = vld [vmem:[%s6139_s1 + $0x218] sm:$0xff]  ;;  %v3921_v30 = vpack.c.bf16 %v3036_v32, %v3035_v35  ;;  %v3006_v50 = vld [vmem:[%s6139_s1 + $0x2a8] sm:$0xff] }
 0x210   : > { %3846 = vmatprep.subr.bf16.mxu0 %v3845_v25  ;;  %3878 = vmatprep.subr.bf16.mxu1 %v3877_v16  ;;  %v3019_v19 = vld [vmem:[%s6139_s1 + $0x310] sm:$0xff]  ;;  %v3020_v1 = vld [vmem:[%s6139_s1 + $0x318] sm:$0xff]  ;;  %v3037_v14 = vld [vmem:[%s6139_s1 + $0x3a0] sm:$0xff]  ;;  %v3891_v34 = vpack.c.bf16 %v2988_v9, %v2987_v55  ;;  %v3893_v8 = vpack.c.bf16 %v3006_v50, %v3005_v39 }
 0x211   : > { %v3038_v28 = vld [vmem:[%s6139_s1 + $0x3a8] sm:$0xff]  ;;  %v3923_v22 = vpack.c.bf16 %v3020_v1, %v3019_v19  ;;  %v2989_v36 = vld [vmem:[%s6139_s1 + $0x220] sm:$0xff]  ;;  %v3007_v17 = vld [vmem:[%s6139_s1 + $0x2b0] sm:$0xff] }
 0x212   : > { %v2990_v21 = vld [vmem:[%s6139_s1 + $0x228] sm:$0xff]  ;;  %v3021_v42 = vld [vmem:[%s6139_s1 + $0x320] sm:$0xff]  ;;  %v3925_v49 = vpack.c.bf16 %v3038_v28, %v3037_v14  ;;  %v3008_v62 = vld [vmem:[%s6139_s1 + $0x2b8] sm:$0xff] }
 0x213   : > { %3848 = vmatpush3.bf16.msra.mxu0 %v3847_v58  ;;  %3880 = vmatpush3.bf16.msra.mxu1 %v3879_v4  ;;  %v3022_v37 = vld [vmem:[%s6139_s1 + $0x328] sm:$0xff]  ;;  %v3039_v24 = vld [vmem:[%s6139_s1 + $0x3b0] sm:$0xff]  ;;  %v3040_v2 = vld [vmem:[%s6139_s1 + $0x3b8] sm:$0xff]  ;;  %v3895_v25 = vpack.c.bf16 %v2990_v21, %v2989_v36  ;;  %v3897_v44 = vpack.c.bf16 %v3008_v62, %v3007_v17 }
 0x214   : > { %3850 = vmatprep.subr.bf16.mxu0 %v3849_v40  ;;  %3882 = vmatprep.subr.bf16.mxu1 %v3881_v13  ;;  %v3927_v5 = vpack.c.bf16 %v3022_v37, %v3021_v42  ;;  %v2991_v51 = vld [vmem:[%s6139_s1 + $0x230] sm:$0xff]  ;;  %v2992_v16 = vld [vmem:[%s6139_s1 + $0x238] sm:$0xff]  ;;  %v3929_v48 = vpack.c.bf16 %v3040_v2, %v3039_v24  ;;  %v3009_v52 = vld [vmem:[%s6139_s1 + $0x2c0] sm:$0xff] }
 0x215   : > { %v3023_v56 = vld [vmem:[%s6139_s1 + $0x330] sm:$0xff]  ;;  %v3024_v53 = vld [vmem:[%s6139_s1 + $0x338] sm:$0xff]  ;;  %v3010_v45 = vld [vmem:[%s6139_s1 + $0x2c8] sm:$0xff]  ;;  %v3899_v58 = vpack.c.bf16 %v2992_v16, %v2991_v51 }
 0x216   : > { %v3041_v57 = vld [vmem:[%s6139_s1 + $0x3c0] sm:$0xff]  ;;  %v3042_v47 = vld [vmem:[%s6139_s1 + $0x3c8] sm:$0xff]  ;;  %v2912_v40 = vld [vmem:[#allocation2 + $0x38] sm:$0xff]  ;;  %v3931_v15 = vpack.c.bf16 %v3024_v53, %v3023_v56  ;;  %v3901_v29 = vpack.c.bf16 %v3010_v45, %v3009_v52  ;;  %v4213_v56 = vmov 0.0|0.0   ;;  %v4215_v45 = vmov 0.0  }
 0x217   : > { %3852 = vmatpush3.bf16.msra.mxu0 %v3851_v12  ;;  %3884 = vmatpush3.bf16.msra.mxu1 %v3883_v23  ;;  %v2910_v4 = vld [vmem:[#allocation2 + $0x28] sm:$0xff]  ;;  %v2993_v0 = vld [vmem:[%s6139_s1 + $0x240] sm:$0xff]  ;;  %v2920_v54 = vmul.f32 0.00390625, %v2912_v40  ;;  %v3933_v60 = vpack.c.bf16 %v3042_v47, %v3041_v57  ;;  %v3011_v12 = vld [vmem:[%s6139_s1 + $0x2d0] sm:$0xff] }
 0x218   : > { %3886 = vmatprep.subr.bf16.mxu0 %v3885_v26  ;;  %3918 = vmatprep.subr.bf16.mxu1 %v3917_v20  ;;  %v2994_v13 = vld [vmem:[%s6139_s1 + $0x248] sm:$0xff]  ;;  %v3025_v43 = vld [vmem:[%s6139_s1 + $0x340] sm:$0xff]  ;;  %v2918_v41 = vmul.f32 0.00390625, %v2910_v4  ;;  %v3012_v33 = vld [vmem:[%s6139_s1 + $0x2d8] sm:$0xff] }
 0x219   : > { %v3026_v59 = vld [vmem:[%s6139_s1 + $0x348] sm:$0xff]  ;;  %v3043_v38 = vld [vmem:[%s6139_s1 + $0x3d0] sm:$0xff]  ;;  %v3044_v23 = vld [vmem:[%s6139_s1 + $0x3d8] sm:$0xff]  ;;  %v3903_v26 = vpack.c.bf16 %v2994_v13, %v2993_v0  ;;  %v3905_v18 = vpack.c.bf16 %v3012_v33, %v3011_v12 }
 0x21a   : > { %3121 = vmatmul.mubr.f32.vlgmr.msra.gmra.mrb[0].mxu0 %v2913_v61  ;;  %3191 = vmatmul.mubr.f32.vlgmr.msra.gmra.mrb[0].mxu1 %v2915_v3  ;;  %v3935_v7 = vpack.c.bf16 %v3026_v59, %v3025_v43  ;;  %v2995_v27 = vld [vmem:[%s6139_s1 + $0x250] sm:$0xff]  ;;  %v2996_v20 = vld [vmem:[%s6139_s1 + $0x258] sm:$0xff]  ;;  %v3937_v6 = vpack.c.bf16 %v3044_v23, %v3043_v38  ;;  %v3013_v61 = vld [vmem:[%s6139_s1 + $0x2e0] sm:$0xff] }
 0x21b   : > { %3888 = vmatpush3.bf16.msra.mxu0 %v3887_v10  ;;  %3920 = vmatpush3.bf16.msra.mxu1 %v3919_v11  ;;  %v3027_v63 = vld [vmem:[%s6139_s1 + $0x350] sm:$0xff]  ;;  %v3028_v31 = vld [vmem:[%s6139_s1 + $0x358] sm:$0xff]  ;;  %v3014_v35 = vld [vmem:[%s6139_s1 + $0x2e8] sm:$0xff]  ;;  %v3907_v3 = vpack.c.bf16 %v2996_v20, %v2995_v27 }
 0x21c   : > { %3890 = vmatprep.subr.bf16.mxu0 %v3889_v46  ;;  %3922 = vmatprep.subr.bf16.mxu1 %v3921_v30  ;;  %v3045_v32 = vld [vmem:[%s6139_s1 + $0x3e0] sm:$0xff]  ;;  %v3046_v10 = vld [vmem:[%s6139_s1 + $0x3e8] sm:$0xff]  ;;  %v3939_v11 = vpack.c.bf16 %v3028_v31, %v3027_v63  ;;  %v3909_v46 = vpack.c.bf16 %v3014_v35, %v3013_v61  ;;  %v3015_v39 = vld [vmem:[%s6139_s1 + $0x2f0] sm:$0xff] }
 0x21d   : > { %3260 = vmatprep.mubr.f32.mxu0 %v2918_v41  ;;  %3330 = vmatprep.mubr.f32.mxu1 %v2920_v54  ;;  %v2997_v55 = vld [vmem:[%s6139_s1 + $0x260] sm:$0xff]  ;;  %v2998_v9 = vld [vmem:[%s6139_s1 + $0x268] sm:$0xff]  ;;  %v3941_v30 = vpack.c.bf16 %v3046_v10, %v3045_v32  ;;  %v3016_v50 = vld [vmem:[%s6139_s1 + $0x2f8] sm:$0xff] }
 0x21e   : > { %v3029_v19 = vld [vmem:[%s6139_s1 + $0x360] sm:$0xff]  ;;  %v3030_v1 = vld [vmem:[%s6139_s1 + $0x368] sm:$0xff]  ;;  %v3047_v14 = vld [vmem:[%s6139_s1 + $0x3f0] sm:$0xff] }
 0x21f   : > { %3892 = vmatpush3.bf16.msra.mxu0 %v3891_v34  ;;  %3924 = vmatpush3.bf16.msra.mxu1 %v3923_v22  ;;  %v3048_v28 = vld [vmem:[%s6139_s1 + $0x3f8] sm:$0xff]  ;;  %v3911_v34 = vpack.c.bf16 %v2998_v9, %v2997_v55  ;;  %v3943_v22 = vpack.c.bf16 %v3030_v1, %v3029_v19  ;;  %v2999_v36 = vld [vmem:[%s6139_s1 + $0x270] sm:$0xff]  ;;  %v2909_v62 = vld [vmem:[#allocation2 + $0x20] sm:$0xff] }
 0x220   : > { %3894 = vmatprep.subr.bf16.mxu0 %v3893_v8  ;;  %3926 = vmatprep.subr.bf16.mxu1 %v3925_v49  ;;  %v3913_v8 = vpack.c.bf16 %v3016_v50, %v3015_v39  ;;  %v3000_v21 = vld [vmem:[%s6139_s1 + $0x278] sm:$0xff]  ;;  %v3945_v42 = vpack.c.bf16 %v3048_v28, %v3047_v14  ;;  %v3031_v49 = vld [vmem:[%s6139_s1 + $0x370] sm:$0xff]  ;;  %v3338_v51 = vld [vmem:[%s6141_s3 + $0x8] sm:$0xff] }
 0x221   : > { %v3032_v37 = vld [vmem:[%s6139_s1 + $0x378] sm:$0xff]  ;;  %v3915_v17 = vpack.c.bf16 %v3000_v21, %v2999_v36  ;;  %v2911_v2 = vld [vmem:[#allocation2 + $0x30] sm:$0xff]  ;;  %v3422_v57 = vld [vmem:[%s6143_s5] sm:$0xff] }
 0x222   : > { %v3947_v24 = vpack.c.bf16 %v3032_v37, %v3031_v49  ;;  %v3340_v53 = vld [vmem:[%s6141_s3 + $0x18] sm:$0xff]  ;;  %v3423_v47 = vld [vmem:[%s6143_s5 + $0x8] sm:$0xff]  ;;  %v3638_v0 = vld [vmem:[#allocation7] ss:$0 sm:$0xff] }
 0x223   : > { %3896 = vmatpush3.bf16.msra.mxu0 %v3895_v25  ;;  %3928 = vmatpush3.bf16.msra.mxu1 %v3927_v5  ;;  %v2917_v25 = vmul.f32 0.00390625, %v2909_v62  ;;  %v2919_v5 = vmul.f32 0.00390625, %v2911_v2  ;;  %v3956_v4 = vpack.c.bf16 %v3423_v47, %v3422_v57  ;;  %v3425_v40 = vld [vmem:[%s6143_s5 + $0x18] sm:$0xff]  ;;  %v3641_v35 = vld [vmem:[#allocation9] ss:$0 sm:$0xff] }
 0x224   : > { %3898 = vmatprep.subr.bf16.mxu0 %v3897_v44  ;;  %3930 = vmatprep.subr.bf16.mxu1 %v3929_v48  ;;  %v3337_v44 = vld [vmem:[%s6141_s3] sm:$0xff]  ;;  %v3339_v48 = vld [vmem:[%s6141_s3 + $0x10] sm:$0xff] }
 0x225   : > { %v3950_v16 = vpack.c.bf16 %v3338_v51, %v3337_v44  ;;  %v3953_v52 = vpack.c.bf16 %v3340_v53, %v3339_v48  ;;  %v3639_v28 = vld [vmem:[#allocation3] ss:$0 sm:$0xff] }
 0x227   : > { %3900 = vmatpush3.bf16.msra.mxu0 %v3899_v58  ;;  %3932 = vmatpush3.bf16.msra.mxu1 %v3931_v15  ;;  %v3424_v58 = vld [vmem:[%s6143_s5 + $0x10] sm:$0xff] }
 0x228   : > { %3902 = vmatprep.subr.bf16.mxu0 %v3901_v29  ;;  %3934 = vmatprep.subr.bf16.mxu1 %v3933_v60  ;;  %v3959_v15 = vpack.c.bf16 %v3425_v40, %v3424_v58 }
 0x22b   : > { %3904 = vmatpush3.bf16.msra.mxu0 %v3903_v26  ;;  %3936 = vmatpush3.bf16.msra.mxu1 %v3935_v7 }
 0x22c   : > { %3906 = vmatprep.subr.bf16.mxu0 %v3905_v18  ;;  %3938 = vmatprep.subr.bf16.mxu1 %v3937_v6 }
 0x22f   : > { %3908 = vmatpush3.bf16.msra.mxu0 %v3907_v3  ;;  %3940 = vmatpush3.bf16.msra.mxu1 %v3939_v11 }
 0x230   : > { %3910 = vmatprep.subr.bf16.mxu0 %v3909_v46  ;;  %3942 = vmatprep.subr.bf16.mxu1 %v3941_v30 }
 0x233   : > { %3912 = vmatpush3.bf16.msra.mxu0 %v3911_v34  ;;  %3944 = vmatpush3.bf16.msra.mxu1 %v3943_v22 }
 0x234   : > { %3914 = vmatprep.subr.bf16.mxu0 %v3913_v8  ;;  %3946 = vmatprep.subr.bf16.mxu1 %v3945_v42 }
 0x237   : > { %3916 = vmatpush3.bf16.msra.mxu0 %v3915_v17  ;;  %3948 = vmatpush3.bf16.msra.mxu1 %v3947_v24 }
 0x238   : > { %3949 = vmatprep.subr.bf16.mxu0 %v4213_v56  ;;  %3955 = vmatprep.subr.bf16.mxu1 %v4213_v56 }
 0x23a   : > { %3261 = vmatmul.mubr.f32.vlgmr.msra.gmra.mrb[2].mxu0 %v2917_v25  ;;  %3331 = vmatmul.mubr.f32.vlgmr.msra.gmra.mrb[2].mxu1 %v2919_v5 }
 0x23b   : > { %3951 = vmatpush3.bf16.msra.mxu0 %v3950_v16  ;;  %3807 = vmatprep.mubr.msk.f32.mxu0 %vm4214_vm7, %v4215_v45 }
 0x23c   : > { %3952 = vmatprep.subr.bf16.mxu0 %v4213_v56  ;;  %3818 = vmatprep.mubr.msk.f32.mxu1 %vm4214_vm7, %v4215_v45 }
 0x23d   : > { %3957 = vmatpush3.bf16.msra.mxu1 %v3956_v4 }
 0x23e   : > { %3958 = vmatprep.subr.bf16.mxu1 %v4213_v56 }
 0x23f   : > { %3954 = vmatpush3.bf16.msra.mxu0 %v3953_v52 }
 0x241   : > { %3960 = vmatpush3.bf16.msra.mxu1 %v3959_v15 }
 0x2ed   : > { %v3681_v29 = vpop.f32.mrb[0].mxu0  ;;  %v3716_v43 = vpop.f32.mrb[0].mxu1 }
 0x2ee   : > { %v3682_v13 = vpop.f32.mrb[1].mxu0  ;;  %v3717_v54 = vpop.f32.mrb[1].mxu1 }
 0x2ef   : > { %v3683_v41 = vadd.f32 %v3682_v13, %v3681_v29  ;;  %v3718_v60 = vadd.f32 %v3717_v54, %v3716_v43 }
 0x2f1   : > { %v3123_v59 = vadd.f32 %v3683_v41, %v3638_v0 }
 0x2f3   : > { %v3193_v12 = vadd.f32 %v3718_v60, %v3123_v59 }
 0x30d   : > { %v3751_v33 = vpop.f32.mrb[2].mxu0  ;;  %v3786_v23 = vpop.f32.mrb[2].mxu1 }
 0x30e   : > { %v3752_v38 = vpop.f32.mrb[3].mxu0  ;;  %v3787_v7 = vpop.f32.mrb[3].mxu1 }
 0x30f   : > { %v3753_v26 = vadd.f32 %v3752_v38, %v3751_v33  ;;  %v3788_v18 = vadd.f32 %v3787_v7, %v3786_v23 }
 0x311   : > { %v3263_v27 = vadd.f32 %v3753_v26, %v3193_v12 }
 0x313   : > { %v3333_v20 = vadd.f32 %v3788_v18, %v3263_v27 }
 0x315   : > { %v3336_v63 = vmax.f32 %v3333_v20, 0.0 }
 0x317   : > { %3433 = vrot.lane.b32.xlu0 %v3336_v63, %s4216_s17  ;;  %3808 = vmatmul.mubr.msk.f32.vlgmr.msra.gmra.mrb[4].mxu0 %vm3348_vm8, %v3336_v63 }
 0x389   : > { %v3434_v6 = vpop.permute.xlu0 %3433 }
 0x38a   : > { %3819 = vmatmul.mubr.msk.f32.vlgmr.msra.gmra.mrb[4].mxu1 %vm3348_vm8, %v3434_v6 }
 0x3ea   : > { %v3418_v31 = vpop.f32.mrb[4].mxu0 }
 0x3eb   : > { %v3809_v61 = vpop.f32.mrb[5].mxu0  ;;  %v3419_v34 = vadd.f32 %v3639_v28, %v3418_v31 }
 0x45d   : > { %v3503_v32 = vpop.f32.mrb[4].mxu1 }
 0x45e   : > { %v3504_v10 = vadd.f32 %v3641_v35, %v3503_v32  ;;  %v3820_v3 = vpop.f32.mrb[5].mxu1 }
 0x460   : > { %v3508_v11 = vsel %vm3507_vm9, %v3504_v10, -inf }
 0x461   : > { %3509 = vmax.xlane.f32.xlu0 %v3508_v11 }
 0x4ee   : > { %v3510_v46 = vpop.xlane.xlu0 %3509 }
 0x4ef   : > { %v3511_v55 = vsub.f32 %v3504_v10, %v3510_v46 }
 0x4f1   : > { %v3512_v9 = vmul.f32 1.442695, %v3511_v55 }
 0x4f3   : > { %4058 = vpow2.f32 %v3512_v9 }
 0x4fd   : > { %v4059_v19 = vpop.eup %4058 }
 0x4fe   : > { %v3514_v30 = vsel %vm3507_vm9, %v4059_v19, 0.0 }
 0x4ff   : > { %3515 = vadd.xlane.f32.xlu1 %v3514_v30 }
 0x58c   : > { %v3516_v1 = vpop.xlane.xlu1 %3515 }
 0x58d   : > { %4060 = vlog2.f32 %v3516_v1 }
 0x597   : > { %v4061_v39 = vpop.eup %4060 }
 0x598   : > { %v3518_v50 = vmul.f32 0.6931472, %v4061_v39 }
 0x59a   : > { %v3519_v14 = vsub.f32 %v3511_v55, %v3518_v50 }
 0x59c   : > { %3521 = vrot.lane.b32.xlu1 %v3519_v14, %s4217_s18 }
 0x60e   : > { %v3522_v22 = vpop.permute.xlu1 %3521 }
 0x60f   : > { %v3525_v8 = vsel %vm3524_vm10, %v3419_v34, %v3522_v22 }
 0x610   : > { %v3527_v36 = vsel %vm3526_vm11, %v3525_v8, 0.0 }
 0x611   : > { %3528 = vst [vmem:[#allocation10] sm:$0xff] %v3527_v36 }
 0x612 PF: > { %s6235_s22 = sadd.s32 4294967295, %s4202_s8   ;;  %s4218_s26 = smov [#allocation10]  }
 0x613   : > { %p6094_p1 = scmp.eq.s32.totalorder %s6235_s22, 1  ;;  %s3538_s10 = sshll.u32 %s4218_s26, 4  ;;  %s3539_s10 = int_to_ptr.vmem [resolvable:$true] %s3538_s10 }
 0x614   : > { %s4118_s21 = scalar_lea.vmem %s3539_s10, 128  ;;  %p4125_p7 = scmp.lt.s32.totalorder %s3539_s10, %s3539_s10 }
 0x615   : > { %p4119_p2 = scmp.ne.s32.totalorder %s3539_s10, %s4118_s21  ;;  %p4126_p9 = scmp.lt.s32.totalorder %s4118_s21, %s4118_s21 }
 0x617   : > { %p4120_p4 = pnand %p4119_p2, %p6094_p1  ;;  %p4127_p11 = por %p4126_p9, %p4125_p7 }
 0x619   : > { %p4121_p6 = pneg %p4120_p4 }
 0x61b   : > { %p4128_p13 = pnand %p4127_p11, %p4121_p6 }
 0x61d   : > { %4131 = shalt.err (!%p4128_p13)
}
 0x61e   : > { %s4132_s4 = scalar_lea.hbm %s6145_s7, 128 }
 0x61f   : > { %p4133_p0 = scmp.ne.s32.totalorder %s6145_s7, %s4132_s4  ;;  %p4138_p8 = scmp.lt.u32.totalorder %s4132_s4, %s6145_s7 }
 0x621   : > { %p4134_p12 = pnand %p4133_p0, %p6094_p1 }
 0x623   : > { %p4135_p5 = pneg %p4134_p12 }
 0x625   : > { %p4140_p3 = pnand %p4138_p8, %p4135_p5 }
 0x627   : > { %4143 = shalt.err (!%p4140_p3)
}
 0x628   : > { %3979 = dma.vmem_to_hbm [thread:$0]  (%p6094_p1), %s3539_s10, 128, %s6145_s7, [#allocation6]  }
 0x629   : > { %4177 = dma.done.wait (%p6094_p1), [#allocation6], 128  }
 0x62a   : > { %4179 = vsyncadd (%p6094_p1), [#allocation6], 4294967168 }
 0x62b PF: > { %s24_s8 = sadd.s32 1, %s4202_s8   ;;  %s6237_s26 = smov %s4186_s27 }
 0x62c   : > { %p21_p10 = scmp.ge.s32.totalorder %s24_s8, 4   ;;  %s6238_s27 = smov %s4190_s28 }
 0x62d   : > { %s6239_s28 = smov %s4320_s15  ;;  %s6240_s29 = smov %s4198_s30 }
 0x62e   : > { %s6241_s30 = smov %s6243_s9  ;;  %23 = sbr.rel (!%p21_p10) target bundleno = 9 (0x9), region = 107 }
 0x635   :  { %3551 = vsyncpa [#allocation5], 1 }
 0x636   :  { %3553 = vsyncpa [#allocation5 + $0x1], 1 }
 0x637   :  { %3554 = vsyncpa [#allocation8], 1 }
 0x638   :  { %3555 = vsyncpa [#allocation6], 1 }
 0x639   :  { %3557 = vsyncpa [#allocation6 + $0x1], 1 }

</bundles_post_ra>
